<compile_context>
chip_gen: v7x
topology: tpu7x:2x2x1
jax: 0.10.0
libtpu: 0.0.40
codegen_flags: <defaults>
</compile_context>

<pallas_src>
import functools

import jax
import jax.numpy as jnp
from jax.experimental import pallas as pl
from jax.experimental.pallas import tpu as pltpu

EPS = 1e-5


def _round_up(x, m):
    return (x + m - 1) // m * m


# --------------------------------------------------------------------------------------
# Kernel 1:  h = relu(x * scale1 + bias1) @ W1     (+ per-tile BN2 stat partials)
# --------------------------------------------------------------------------------------
def _bn_relu_conv1x1_kernel(x_ref, s_ref, b_ref, w_ref, h_ref, st_ref, *, m_valid):
    # x_ref: (tm, Cin) f32   s_ref/b_ref: (1, Cin) f32   w_ref: (Cin, Ci) bf16
    # h_ref: (tm, Ci) bf16   st_ref: (8, Ci) f32  (row0 = sum, row1 = sum of squares)
    tm = x_ref.shape[0]
    ci = h_ref.shape[1]

    a = jnp.maximum(x_ref[...] * s_ref[...] + b_ref[...], 0.0)              # BN1+ReLU, f32
    h = jnp.dot(a.astype(jnp.bfloat16), w_ref[...],
                preferred_element_type=jnp.float32)                          # (tm, Ci) f32
    h_ref[...] = h.astype(jnp.bfloat16)

    # Partial statistics for BN2 (mask padded tail rows if the grid was padded).
    if m_valid is not None:
        rows = jax.lax.broadcasted_iota(jnp.int32, (tm, 1), 0) + pl.program_id(0) * tm
        h = jnp.where(rows < m_valid, h, 0.0)
    psum = jnp.sum(h, axis=0, keepdims=True)
    pssq = jnp.sum(h * h, axis=0, keepdims=True)
    st_ref[...] = jnp.concatenate(
        [psum, pssq, jnp.zeros((6, ci), jnp.float32)], axis=0)


def bn_relu_conv1x1(x_flat, scale, bias, w_bf16, *, tm=512):
    M, cin = x_flat.shape
    ci = w_bf16.shape[1]

    tm = min(tm, _round_up(M, 8))
    grid = -(-M // tm)
    mp = grid * tm
    if mp != M:
        x_flat = jnp.pad(x_flat, ((0, mp - M), (0, 0)))

    kernel = functools.partial(_bn_relu_conv1x1_kernel,
                               m_valid=M if mp != M else None)
    h, stats = pl.pallas_call(
        kernel,
        out_shape=[jax.ShapeDtypeStruct((mp, ci), jnp.bfloat16),
                   jax.ShapeDtypeStruct((grid * 8, ci), jnp.float32)],
        grid_spec=pltpu.PrefetchScalarGridSpec(
            num_scalar_prefetch=0,
            grid=(grid,),
            in_specs=[
                pl.BlockSpec((tm, cin), lambda i: (i, 0)),
                pl.BlockSpec((1, cin), lambda i: (0, 0)),
                pl.BlockSpec((1, cin), lambda i: (0, 0)),
                pl.BlockSpec((cin, ci), lambda i: (0, 0)),
            ],
            out_specs=[
                pl.BlockSpec((tm, ci), lambda i: (i, 0)),
                pl.BlockSpec((8, ci), lambda i: (i, 0)),
            ]),
        compiler_params=pltpu.CompilerParams(
            dimension_semantics=("parallel",),
            vmem_limit_bytes=48 * 1024 * 1024),
    )(x_flat, scale, bias, w_bf16)
    return h, stats


# --------------------------------------------------------------------------------------
# Kernel 2:  y = conv3x3(relu(h * scale2 + bias2), W2), padding=1
# --------------------------------------------------------------------------------------
def _bn_relu_conv3x3_kernel(h_ref, s_ref, b_ref, w_ref, o_ref, pad_ref,
                            *, H, W, row_block):
    # h_ref: (1, H*W, C) bf16   s_ref/b_ref: (1, C) f32   w_ref: (9, C, Gp) bf16
    # o_ref: (1, H*(W+2), Gp) f32   pad_ref (scratch): (P, C) f32  flat padded activation
    C = h_ref.shape[2]
    wp = W + 2
    L = H * wp
    P = pad_ref.shape[0]

    # ---- stage the zero-padded BN2+ReLU activation into the flat scratch -------------
    # Only the border rows are zeroed (no full per-step fill); every scratch element is
    # rewritten each grid step, so there is no cross-step state (megacore-safe).
    pad_ref[0:wp + 1, :] = jnp.zeros((wp + 1, C), jnp.float32)        # top pad row (+ left pad of row 0)
    tail = (H + 1) * wp + 1
    pad_ref[tail:, :] = jnp.zeros((P - tail, C), jnp.float32)         # bottom pad row + slack
    zero2 = jnp.zeros((2, C), jnp.float32)
    s = s_ref[...]
    b = b_ref[...]
    for y in range(H):                                                # static, unrolled
        base = (y + 1) * wp
        row = h_ref[0, y * W:(y + 1) * W, :].astype(jnp.float32)
        pad_ref[base + 1:base + 1 + W, :] = jnp.maximum(row * s + b, 0.0)
        pad_ref[base + W + 1:base + W + 3, :] = zero2                 # right pad of y / left pad of y+1

    # ---- 3x3 conv: 9 shifted contiguous row-slices -> bf16 matmuls, per row block ----
    for rb in range(0, L, row_block):
        nb = min(row_block, L - rb)
        acc = None
        for k in range(9):
            ky, kx = divmod(k, 3)
            off = ky * wp + kx + rb
            patch = pad_ref[off:off + nb, :].astype(jnp.bfloat16)     # (nb, C)
            d = jnp.dot(patch, w_ref[k], preferred_element_type=jnp.float32)
            acc = d if acc is None else acc + d
        o_ref[0, rb:rb + nb, :] = acc                                 # lane-dense (Gp=128) store


def bn_relu_conv3x3(h3, scale, bias, w9p, *, H, W, row_block=256):
    N, HW, C = h3.shape
    Gp = w9p.shape[2]
    wp = W + 2
    L = H * wp
    P = _round_up((H + 2) * wp + 2, 8)
    kernel = functools.partial(_bn_relu_conv3x3_kernel, H=H, W=W, row_block=row_block)
    return pl.pallas_call(
        kernel,
        out_shape=jax.ShapeDtypeStruct((N, L, Gp), jnp.float32),
        grid_spec=pltpu.PrefetchScalarGridSpec(
            num_scalar_prefetch=0,
            grid=(N,),
            in_specs=[
                pl.BlockSpec((1, HW, C), lambda n: (n, 0, 0)),
                pl.BlockSpec((1, C), lambda n: (0, 0)),
                pl.BlockSpec((1, C), lambda n: (0, 0)),
                pl.BlockSpec((9, C, Gp), lambda n: (0, 0, 0)),
            ],
            out_specs=pl.BlockSpec((1, L, Gp), lambda n: (n, 0, 0)),
            scratch_shapes=[pltpu.VMEM((P, C), jnp.float32)]),
        compiler_params=pltpu.CompilerParams(
            dimension_semantics=("parallel",),
            vmem_limit_bytes=48 * 1024 * 1024),
    )(h3, scale, bias, w9p)


# --------------------------------------------------------------------------------------
# Parameters (deterministic, PyTorch shapes)
# --------------------------------------------------------------------------------------
def init_params(key, in_channels, growth_rate):
    inner = 4 * growth_rate
    k1, k2 = jax.random.split(key)
    # PyTorch layouts: conv1 (inner, Cin, 1, 1), conv2 (G, inner, 3, 3)
    w1_pt = jax.random.normal(k1, (inner, in_channels, 1, 1), jnp.float32) * 0.1
    w2_pt = jax.random.normal(k2, (growth_rate, inner, 3, 3), jnp.float32) * 0.1
    w1 = jnp.transpose(w1_pt[:, :, 0, 0], (1, 0))                               # (Cin, inner)
    w2 = jnp.transpose(w2_pt, (2, 3, 1, 0)).reshape(9, inner, growth_rate)      # (9, inner, G)
    return dict(
        w1=w1, w2=w2,
        g1=jnp.ones((in_channels,), jnp.float32), b1=jnp.zeros((in_channels,), jnp.float32),
        g2=jnp.ones((inner,), jnp.float32), b2=jnp.zeros((inner,), jnp.float32),
    )


# --------------------------------------------------------------------------------------
# Full Bottleneck forward (NCHW in / NCHW out, like the PyTorch module)
# --------------------------------------------------------------------------------------
def bottleneck_forward(x_nchw, params):
    N, Cin, H, W = x_nchw.shape
    ci = params["w1"].shape[1]
    G = params["w2"].shape[2]
    M = N * H * W

    x_nhwc = jnp.transpose(x_nchw, (0, 2, 3, 1)).astype(jnp.float32)
    x_flat = x_nhwc.reshape(M, Cin)

    # BN1 batch statistics (training-mode forward, biased variance) folded to scale/bias.
    m1 = jnp.mean(x_flat, axis=0)
    v1 = jnp.mean(jnp.square(x_flat - m1), axis=0)
    s1 = params["g1"] / jnp.sqrt(v1 + EPS)
    b1 = params["b1"] - m1 * s1

    # Kernel 1: BN1 + ReLU + 1x1 conv  (+ fused BN2 statistics partials, bf16 h).
    h_flat, stats = bn_relu_conv1x1(x_flat, s1[None, :], b1[None, :],
                                    params["w1"].astype(jnp.bfloat16))
    st = stats.reshape(-1, 8, ci)
    m2 = jnp.sum(st[:, 0, :], axis=0) / M
    v2 = jnp.sum(st[:, 1, :], axis=0) / M - m2 * m2
    s2 = params["g2"] / jnp.sqrt(v2 + EPS)
    b2 = params["b2"] - m2 * s2

    # Kernel 2: BN2 + ReLU + 3x3 conv (padding=1), lane-dense (128) padded output channels.
    Gp = _round_up(G, 128)
    w2p = jnp.pad(params["w2"], ((0, 0), (0, 0), (0, Gp - G))).astype(jnp.bfloat16)
    h3 = h_flat[:M].reshape(N, H * W, ci)
    o = bn_relu_conv3x3(h3, s2[None, :], b2[None, :], w2p, H=H, W=W)
    y = o.reshape(N, H, W + 2, Gp)[:, :, :W, :G]                      # trim pad cols/channels

    y_nchw = jnp.transpose(y, (0, 3, 1, 2))
    return jnp.concatenate([x_nchw.astype(jnp.float32), y_nchw], axis=1)


# --------------------------------------------------------------------------------------
# Pure-JAX reference (for correctness check)
# --------------------------------------------------------------------------------------
def reference_forward(x_nchw, params, in_channels, growth_rate):
    inner = 4 * growth_rate
    x = x_nchw.astype(jnp.float32)

    def bn(z, g, b):
        m = jnp.mean(z, axis=(0, 2, 3), keepdims=True)
        v = jnp.mean((z - m) ** 2, axis=(0, 2, 3), keepdims=True)
        return (z - m) / jnp.sqrt(v + EPS) * g[None, :, None, None] + b[None, :, None, None]

    a1 = jax.nn.relu(bn(x, params["g1"], params["b1"]))
    w1_pt = jnp.transpose(params["w1"], (1, 0))[:, :, None, None]
    h = jax.lax.conv_general_dilated(a1, w1_pt, (1, 1), "VALID",
                                     dimension_numbers=("NCHW", "OIHW", "NCHW"))
    a2 = jax.nn.relu(bn(h, params["g2"], params["b2"]))
    w2_pt = jnp.transpose(params["w2"].reshape(3, 3, inner, growth_rate), (3, 2, 0, 1))
    y = jax.lax.conv_general_dilated(a2, w2_pt, (1, 1), ((1, 1), (1, 1)),
                                     dimension_numbers=("NCHW", "OIHW", "NCHW"))
    return jnp.concatenate([x, y], axis=1)


if __name__ == "__main__":
    in_channels, growth_rate = 8, 4
    N, H, W = 2, 16, 16

    key = jax.random.PRNGKey(0)
    kx, kp = jax.random.split(key)
    x = jax.random.normal(kx, (N, in_channels, H, W), jnp.float32)   # NCHW, like PyTorch
    params = init_params(kp, in_channels, growth_rate)

    out = jax.jit(bottleneck_forward)(x, params)
    out = jax.block_until_ready(out)

    assert out.shape == (N, in_channels + growth_rate, H, W), out.shape

    ref = jax.block_until_ready(reference_forward(x, params, in_channels, growth_rate))
    err = float(jnp.max(jnp.abs(out - ref)))
    # Tolerance accommodates bf16 MXU inputs / bf16 intermediate h vs the f32 reference.
    if err > 5e-2:
        raise AssertionError(f"mismatch vs reference, max abs err = {err}")

    print("KERNEL_OK")
</pallas_src>

<mosaic_0001>
module attributes {stable_mosaic.version = 11 : i64} {
  func.func @_bn_relu_conv1x1_kernel(%arg0: i32, %arg1: memref<512x8xf32, #tpu.memory_space<vmem>>, %arg2: memref<1x8xf32, #tpu.memory_space<vmem>>, %arg3: memref<1x8xf32, #tpu.memory_space<vmem>>, %arg4: memref<8x16xbf16, #tpu.memory_space<vmem>>, %arg5: memref<512x16xbf16, #tpu.memory_space<vmem>>, %arg6: memref<8x16xf32, #tpu.memory_space<vmem>>) attributes {dimension_semantics = [#tpu.dimension_semantics<parallel>], iteration_bounds = array<i64: 1>, scalar_prefetch = 0 : i64, scratch_operands = 0 : i64, tpu.core_type = #tpu.core_type<tc>, window_params = [{transform_indices = @transform_0, window_bounds = array<i64: 512, 8>}, {pipeline_mode = #tpu.pipeline_mode<synchronous>, transform_indices = @transform_1, window_bounds = array<i64: 1, 8>}, {pipeline_mode = #tpu.pipeline_mode<synchronous>, transform_indices = @transform_2, window_bounds = array<i64: 1, 8>}, {pipeline_mode = #tpu.pipeline_mode<synchronous>, transform_indices = @transform_3, window_bounds = array<i64: 8, 16>}, {transform_indices = @transform_4, window_bounds = array<i64: 512, 16>}, {transform_indices = @transform_5, window_bounds = array<i64: 8, 16>}]} {
    %c0 = arith.constant 0 : index
    %c0_0 = arith.constant 0 : index
    %0 = vector.load %arg1[%c0, %c0_0] : memref<512x8xf32, #tpu.memory_space<vmem>>, vector<512x8xf32>
    %c0_1 = arith.constant 0 : index
    %c0_2 = arith.constant 0 : index
    %1 = vector.load %arg2[%c0_1, %c0_2] : memref<1x8xf32, #tpu.memory_space<vmem>>, vector<1x8xf32>
    %2 = vector.broadcast %1 : vector<1x8xf32> to vector<512x8xf32>
    %3 = arith.mulf %0, %2 : vector<512x8xf32>
    %c0_3 = arith.constant 0 : index
    %c0_4 = arith.constant 0 : index
    %4 = vector.load %arg3[%c0_3, %c0_4] : memref<1x8xf32, #tpu.memory_space<vmem>>, vector<1x8xf32>
    %5 = vector.broadcast %4 : vector<1x8xf32> to vector<512x8xf32>
    %6 = arith.addf %3, %5 : vector<512x8xf32>
    %cst = arith.constant 0.000000e+00 : f32
    %7 = vector.broadcast %cst : f32 to vector<512x8xf32>
    %8 = arith.maximumf %6, %7 : vector<512x8xf32>
    %9 = arith.truncf %8 : vector<512x8xf32> to vector<512x8xbf16>
    %c0_5 = arith.constant 0 : index
    %c0_6 = arith.constant 0 : index
    %10 = vector.load %arg4[%c0_5, %c0_6] : memref<8x16xbf16, #tpu.memory_space<vmem>>, vector<8x16xbf16>
    %cst_7 = arith.constant dense<0.000000e+00> : vector<512x16xf32>
    %11 = tpu.matmul %9, %10, %cst_7 {dimension_numbers = #tpu.dot_dimension_numbers<[1], [0], [0], [1], [0, 0, 1, 1], [], []>} : vector<512x8xbf16>, vector<8x16xbf16>, vector<512x16xf32> -> vector<512x16xf32>
    %12 = arith.truncf %11 : vector<512x16xf32> to vector<512x16xbf16>
    %c0_8 = arith.constant 0 : index
    %c0_9 = arith.constant 0 : index
    %13 = vector.load %arg5[%c0_8, %c0_9] : memref<512x16xbf16, #tpu.memory_space<vmem>>, vector<512x16xbf16>
    tpu.vector_store %arg5[%c0_8, %c0_9], %12 {strides = array<i32>} : memref<512x16xbf16, #tpu.memory_space<vmem>>, vector<512x16xbf16>,
    %cst_10 = arith.constant dense<0.000000e+00> : vector<16xf32>
    %14 = vector.multi_reduction <add>, %11, %cst_10 [0] : vector<512x16xf32> to vector<16xf32>
    %15 = vector.shape_cast %14 : vector<16xf32> to vector<1x16xf32>
    %16 = arith.mulf %11, %11 : vector<512x16xf32>
    %cst_11 = arith.constant dense<0.000000e+00> : vector<16xf32>
    %17 = vector.multi_reduction <add>, %16, %cst_11 [0] : vector<512x16xf32> to vector<16xf32>
    %18 = vector.shape_cast %17 : vector<16xf32> to vector<1x16xf32>
    %cst_12 = arith.constant 0.000000e+00 : f32
    %19 = vector.broadcast %cst_12 : f32 to vector<6x16xf32>
    %20 = tpu.concatenate %15, %18, %19 in 0 : vector<1x16xf32>, vector<1x16xf32>, vector<6x16xf32> -> vector<8x16xf32>
    %c0_13 = arith.constant 0 : index
    %c0_14 = arith.constant 0 : index
    %21 = vector.load %arg6[%c0_13, %c0_14] : memref<8x16xf32, #tpu.memory_space<vmem>>, vector<8x16xf32>
    tpu.vector_store %arg6[%c0_13, %c0_14], %20 {strides = array<i32>} : memref<8x16xf32, #tpu.memory_space<vmem>>, vector<8x16xf32>,
    return
  }
  func.func @transform_0(%arg0: i32) -> (i32, i32) {
    %c0_i32 = arith.constant 0 : i32
    %c0_i32_0 = arith.constant 0 : i32
    return %arg0, %c0_i32 : i32, i32
  }
  func.func @transform_1(%arg0: i32) -> (i32, i32) {
    %c0_i32 = arith.constant 0 : i32
    %c0_i32_0 = arith.constant 0 : i32
    %c0_i32_1 = arith.constant 0 : i32
    return %c0_i32, %c0_i32_0 : i32, i32
  }
  func.func @transform_2(%arg0: i32) -> (i32, i32) {
    %c0_i32 = arith.constant 0 : i32
    %c0_i32_0 = arith.constant 0 : i32
    %c0_i32_1 = arith.constant 0 : i32
    return %c0_i32, %c0_i32_0 : i32, i32
  }
  func.func @transform_3(%arg0: i32) -> (i32, i32) {
    %c0_i32 = arith.constant 0 : i32
    %c0_i32_0 = arith.constant 0 : i32
    %c0_i32_1 = arith.constant 0 : i32
    return %c0_i32, %c0_i32_0 : i32, i32
  }
  func.func @transform_4(%arg0: i32) -> (i32, i32) {
    %c0_i32 = arith.constant 0 : i32
    %c0_i32_0 = arith.constant 0 : i32
    return %arg0, %c0_i32 : i32, i32
  }
  func.func @transform_5(%arg0: i32) -> (i32, i32) {
    %c0_i32 = arith.constant 0 : i32
    %c0_i32_0 = arith.constant 0 : i32
    return %arg0, %c0_i32 : i32, i32
  }
}

module attributes {stable_mosaic.version = 11 : i64} {
  func.func @_bn_relu_conv3x3_kernel(%arg0: i32, %arg1: memref<1x256x16xbf16, #tpu.memory_space<vmem>>, %arg2: memref<1x16xf32, #tpu.memory_space<vmem>>, %arg3: memref<1x16xf32, #tpu.memory_space<vmem>>, %arg4: memref<9x16x128xbf16, #tpu.memory_space<vmem>>, %arg5: memref<1x288x128xf32, #tpu.memory_space<vmem>>, %arg6: memref<328x16xf32, #tpu.memory_space<vmem>>) attributes {dimension_semantics = [#tpu.dimension_semantics<parallel>], iteration_bounds = array<i64: 2>, scalar_prefetch = 0 : i64, scratch_operands = 1 : i64, tpu.core_type = #tpu.core_type<tc>, window_params = [{transform_indices = @transform_0, window_bounds = array<i64: 1, 256, 16>}, {pipeline_mode = #tpu.pipeline_mode<synchronous>, transform_indices = @transform_1, window_bounds = array<i64: 1, 16>}, {pipeline_mode = #tpu.pipeline_mode<synchronous>, transform_indices = @transform_2, window_bounds = array<i64: 1, 16>}, {pipeline_mode = #tpu.pipeline_mode<synchronous>, transform_indices = @transform_3, window_bounds = array<i64: 9, 16, 128>}, {transform_indices = @transform_4, window_bounds = array<i64: 1, 288, 128>}]} {
    %cst = arith.constant 0.000000e+00 : f32
    %0 = vector.broadcast %cst : f32 to vector<19x16xf32>
    %c0 = arith.constant 0 : index
    %c0_0 = arith.constant 0 : index
    %1 = vector.load %arg6[%c0, %c0_0] : memref<328x16xf32, #tpu.memory_space<vmem>>, vector<19x16xf32>
    tpu.vector_store %arg6[%c0, %c0_0], %0 {strides = array<i32>} : memref<328x16xf32, #tpu.memory_space<vmem>>, vector<19x16xf32>,
    %cst_1 = arith.constant 0.000000e+00 : f32
    %2 = vector.broadcast %cst_1 : f32 to vector<21x16xf32>
    %c307 = arith.constant 307 : index
    %c0_2 = arith.constant 0 : index
    %3 = vector.load %arg6[%c307, %c0_2] : memref<328x16xf32, #tpu.memory_space<vmem>>, vector<21x16xf32>
    tpu.vector_store %arg6[%c307, %c0_2], %2 {strides = array<i32>} : memref<328x16xf32, #tpu.memory_space<vmem>>, vector<21x16xf32>,
    %cst_3 = arith.constant 0.000000e+00 : f32
    %4 = vector.broadcast %cst_3 : f32 to vector<2x16xf32>
    %c0_4 = arith.constant 0 : index
    %c0_5 = arith.constant 0 : index
    %5 = vector.load %arg2[%c0_4, %c0_5] : memref<1x16xf32, #tpu.memory_space<vmem>>, vector<1x16xf32>
    %c0_6 = arith.constant 0 : index
    %c0_7 = arith.constant 0 : index
    %6 = vector.load %arg3[%c0_6, %c0_7] : memref<1x16xf32, #tpu.memory_space<vmem>>, vector<1x16xf32>
    %c0_8 = arith.constant 0 : index
    %c0_9 = arith.constant 0 : index
    %c0_10 = arith.constant 0 : index
    %7 = vector.load %arg1[%c0_8, %c0_9, %c0_10] : memref<1x256x16xbf16, #tpu.memory_space<vmem>>, vector<1x16x16xbf16>
    %8 = vector.shape_cast %7 : vector<1x16x16xbf16> to vector<16x16xbf16>
    %9 = arith.extf %8 : vector<16x16xbf16> to vector<16x16xf32>
    %10 = vector.broadcast %5 : vector<1x16xf32> to vector<16x16xf32>
    %11 = arith.mulf %9, %10 : vector<16x16xf32>
    %12 = vector.broadcast %6 : vector<1x16xf32> to vector<16x16xf32>
    %13 = arith.addf %11, %12 : vector<16x16xf32>
    %cst_11 = arith.constant 0.000000e+00 : f32
    %14 = vector.broadcast %cst_11 : f32 to vector<16x16xf32>
    %15 = arith.maximumf %13, %14 : vector<16x16xf32>
    %c19 = arith.constant 19 : index
    %c0_12 = arith.constant 0 : index
    %16 = vector.load %arg6[%c19, %c0_12] : memref<328x16xf32, #tpu.memory_space<vmem>>, vector<16x16xf32>
    tpu.vector_store %arg6[%c19, %c0_12], %15 {strides = array<i32>} : memref<328x16xf32, #tpu.memory_space<vmem>>, vector<16x16xf32>,
    %c35 = arith.constant 35 : index
    %c0_13 = arith.constant 0 : index
    %17 = vector.load %arg6[%c35, %c0_13] : memref<328x16xf32, #tpu.memory_space<vmem>>, vector<2x16xf32>
    tpu.vector_store %arg6[%c35, %c0_13], %4 {strides = array<i32>} : memref<328x16xf32, #tpu.memory_space<vmem>>, vector<2x16xf32>,
    %c0_14 = arith.constant 0 : index
    %c16 = arith.constant 16 : index
    %c0_15 = arith.constant 0 : index
    %18 = vector.load %arg1[%c0_14, %c16, %c0_15] : memref<1x256x16xbf16, #tpu.memory_space<vmem>>, vector<1x16x16xbf16>
    %19 = vector.shape_cast %18 : vector<1x16x16xbf16> to vector<16x16xbf16>
    %20 = arith.extf %19 : vector<16x16xbf16> to vector<16x16xf32>
    %21 = vector.broadcast %5 : vector<1x16xf32> to vector<16x16xf32>
    %22 = arith.mulf %20, %21 : vector<16x16xf32>
    %23 = vector.broadcast %6 : vector<1x16xf32> to vector<16x16xf32>
    %24 = arith.addf %22, %23 : vector<16x16xf32>
    %cst_16 = arith.constant 0.000000e+00 : f32
    %25 = vector.broadcast %cst_16 : f32 to vector<16x16xf32>
    %26 = arith.maximumf %24, %25 : vector<16x16xf32>
    %c37 = arith.constant 37 : index
    %c0_17 = arith.constant 0 : index
    %27 = vector.load %arg6[%c37, %c0_17] : memref<328x16xf32, #tpu.memory_space<vmem>>, vector<16x16xf32>
    tpu.vector_store %arg6[%c37, %c0_17], %26 {strides = array<i32>} : memref<328x16xf32, #tpu.memory_space<vmem>>, vector<16x16xf32>,
    %c53 = arith.constant 53 : index
    %c0_18 = arith.constant 0 : index
    %28 = vector.load %arg6[%c53, %c0_18] : memref<328x16xf32, #tpu.memory_space<vmem>>, vector<2x16xf32>
    tpu.vector_store %arg6[%c53, %c0_18], %4 {strides = array<i32>} : memref<328x16xf32, #tpu.memory_space<vmem>>, vector<2x16xf32>,
    %c0_19 = arith.constant 0 : index
    %c32 = arith.constant 32 : index
    %c0_20 = arith.constant 0 : index
    %29 = vector.load %arg1[%c0_19, %c32, %c0_20] : memref<1x256x16xbf16, #tpu.memory_space<vmem>>, vector<1x16x16xbf16>
    %30 = vector.shape_cast %29 : vector<1x16x16xbf16> to vector<16x16xbf16>
    %31 = arith.extf %30 : vector<16x16xbf16> to vector<16x16xf32>
    %32 = vector.broadcast %5 : vector<1x16xf32> to vector<16x16xf32>
    %33 = arith.mulf %31, %32 : vector<16x16xf32>
    %34 = vector.broadcast %6 : vector<1x16xf32> to vector<16x16xf32>
    %35 = arith.addf %33, %34 : vector<16x16xf32>
    %cst_21 = arith.constant 0.000000e+00 : f32
    %36 = vector.broadcast %cst_21 : f32 to vector<16x16xf32>
    %37 = arith.maximumf %35, %36 : vector<16x16xf32>
    %c55 = arith.constant 55 : index
    %c0_22 = arith.constant 0 : index
    %38 = vector.load %arg6[%c55, %c0_22] : memref<328x16xf32, #tpu.memory_space<vmem>>, vector<16x16xf32>
    tpu.vector_store %arg6[%c55, %c0_22], %37 {strides = array<i32>} : memref<328x16xf32, #tpu.memory_space<vmem>>, vector<16x16xf32>,
    %c71 = arith.constant 71 : index
    %c0_23 = arith.constant 0 : index
    %39 = vector.load %arg6[%c71, %c0_23] : memref<328x16xf32, #tpu.memory_space<vmem>>, vector<2x16xf32>
    tpu.vector_store %arg6[%c71, %c0_23], %4 {strides = array<i32>} : memref<328x16xf32, #tpu.memory_space<vmem>>, vector<2x16xf32>,
    %c0_24 = arith.constant 0 : index
    %c48 = arith.constant 48 : index
    %c0_25 = arith.constant 0 : index
    %40 = vector.load %arg1[%c0_24, %c48, %c0_25] : memref<1x256x16xbf16, #tpu.memory_space<vmem>>, vector<1x16x16xbf16>
    %41 = vector.shape_cast %40 : vector<1x16x16xbf16> to vector<16x16xbf16>
    %42 = arith.extf %41 : vector<16x16xbf16> to vector<16x16xf32>
    %43 = vector.broadcast %5 : vector<1x16xf32> to vector<16x16xf32>
    %44 = arith.mulf %42, %43 : vector<16x16xf32>
    %45 = vector.broadcast %6 : vector<1x16xf32> to vector<16x16xf32>
    %46 = arith.addf %44, %45 : vector<16x16xf32>
    %cst_26 = arith.constant 0.000000e+00 : f32
    %47 = vector.broadcast %cst_26 : f32 to vector<16x16xf32>
    %48 = arith.maximumf %46, %47 : vector<16x16xf32>
    %c73 = arith.constant 73 : index
    %c0_27 = arith.constant 0 : index
    %49 = vector.load %arg6[%c73, %c0_27] : memref<328x16xf32, #tpu.memory_space<vmem>>, vector<16x16xf32>
    tpu.vector_store %arg6[%c73, %c0_27], %48 {strides = array<i32>} : memref<328x16xf32, #tpu.memory_space<vmem>>, vector<16x16xf32>,
    %c89 = arith.constant 89 : index
    %c0_28 = arith.constant 0 : index
    %50 = vector.load %arg6[%c89, %c0_28] : memref<328x16xf32, #tpu.memory_space<vmem>>, vector<2x16xf32>
    tpu.vector_store %arg6[%c89, %c0_28], %4 {strides = array<i32>} : memref<328x16xf32, #tpu.memory_space<vmem>>, vector<2x16xf32>,
    %c0_29 = arith.constant 0 : index
    %c64 = arith.constant 64 : index
    %c0_30 = arith.constant 0 : index
    %51 = vector.load %arg1[%c0_29, %c64, %c0_30] : memref<1x256x16xbf16, #tpu.memory_space<vmem>>, vector<1x16x16xbf16>
    %52 = vector.shape_cast %51 : vector<1x16x16xbf16> to vector<16x16xbf16>
    %53 = arith.extf %52 : vector<16x16xbf16> to vector<16x16xf32>
    %54 = vector.broadcast %5 : vector<1x16xf32> to vector<16x16xf32>
    %55 = arith.mulf %53, %54 : vector<16x16xf32>
    %56 = vector.broadcast %6 : vector<1x16xf32> to vector<16x16xf32>
    %57 = arith.addf %55, %56 : vector<16x16xf32>
    %cst_31 = arith.constant 0.000000e+00 : f32
    %58 = vector.broadcast %cst_31 : f32 to vector<16x16xf32>
    %59 = arith.maximumf %57, %58 : vector<16x16xf32>
    %c91 = arith.constant 91 : index
    %c0_32 = arith.constant 0 : index
    %60 = vector.load %arg6[%c91, %c0_32] : memref<328x16xf32, #tpu.memory_space<vmem>>, vector<16x16xf32>
    tpu.vector_store %arg6[%c91, %c0_32], %59 {strides = array<i32>} : memref<328x16xf32, #tpu.memory_space<vmem>>, vector<16x16xf32>,
    %c107 = arith.constant 107 : index
    %c0_33 = arith.constant 0 : index
    %61 = vector.load %arg6[%c107, %c0_33] : memref<328x16xf32, #tpu.memory_space<vmem>>, vector<2x16xf32>
    tpu.vector_store %arg6[%c107, %c0_33], %4 {strides = array<i32>} : memref<328x16xf32, #tpu.memory_space<vmem>>, vector<2x16xf32>,
    %c0_34 = arith.constant 0 : index
    %c80 = arith.constant 80 : index
    %c0_35 = arith.constant 0 : index
    %62 = vector.load %arg1[%c0_34, %c80, %c0_35] : memref<1x256x16xbf16, #tpu.memory_space<vmem>>, vector<1x16x16xbf16>
    %63 = vector.shape_cast %62 : vector<1x16x16xbf16> to vector<16x16xbf16>
    %64 = arith.extf %63 : vector<16x16xbf16> to vector<16x16xf32>
    %65 = vector.broadcast %5 : vector<1x16xf32> to vector<16x16xf32>
    %66 = arith.mulf %64, %65 : vector<16x16xf32>
    %67 = vector.broadcast %6 : vector<1x16xf32> to vector<16x16xf32>
    %68 = arith.addf %66, %67 : vector<16x16xf32>
    %cst_36 = arith.constant 0.000000e+00 : f32
    %69 = vector.broadcast %cst_36 : f32 to vector<16x16xf32>
    %70 = arith.maximumf %68, %69 : vector<16x16xf32>
    %c109 = arith.constant 109 : index
    %c0_37 = arith.constant 0 : index
    %71 = vector.load %arg6[%c109, %c0_37] : memref<328x16xf32, #tpu.memory_space<vmem>>, vector<16x16xf32>
    tpu.vector_store %arg6[%c109, %c0_37], %70 {strides = array<i32>} : memref<328x16xf32, #tpu.memory_space<vmem>>, vector<16x16xf32>,
    %c125 = arith.constant 125 : index
    %c0_38 = arith.constant 0 : index
    %72 = vector.load %arg6[%c125, %c0_38] : memref<328x16xf32, #tpu.memory_space<vmem>>, vector<2x16xf32>
    tpu.vector_store %arg6[%c125, %c0_38], %4 {strides = array<i32>} : memref<328x16xf32, #tpu.memory_space<vmem>>, vector<2x16xf32>,
    %c0_39 = arith.constant 0 : index
    %c96 = arith.constant 96 : index
    %c0_40 = arith.constant 0 : index
    %73 = vector.load %arg1[%c0_39, %c96, %c0_40] : memref<1x256x16xbf16, #tpu.memory_space<vmem>>, vector<1x16x16xbf16>
    %74 = vector.shape_cast %73 : vector<1x16x16xbf16> to vector<16x16xbf16>
    %75 = arith.extf %74 : vector<16x16xbf16> to vector<16x16xf32>
    %76 = vector.broadcast %5 : vector<1x16xf32> to vector<16x16xf32>
    %77 = arith.mulf %75, %76 : vector<16x16xf32>
    %78 = vector.broadcast %6 : vector<1x16xf32> to vector<16x16xf32>
    %79 = arith.addf %77, %78 : vector<16x16xf32>
    %cst_41 = arith.constant 0.000000e+00 : f32
    %80 = vector.broadcast %cst_41 : f32 to vector<16x16xf32>
    %81 = arith.maximumf %79, %80 : vector<16x16xf32>
    %c127 = arith.constant 127 : index
    %c0_42 = arith.constant 0 : index
    %82 = vector.load %arg6[%c127, %c0_42] : memref<328x16xf32, #tpu.memory_space<vmem>>, vector<16x16xf32>
    tpu.vector_store %arg6[%c127, %c0_42], %81 {strides = array<i32>} : memref<328x16xf32, #tpu.memory_space<vmem>>, vector<16x16xf32>,
    %c143 = arith.constant 143 : index
    %c0_43 = arith.constant 0 : index
    %83 = vector.load %arg6[%c143, %c0_43] : memref<328x16xf32, #tpu.memory_space<vmem>>, vector<2x16xf32>
    tpu.vector_store %arg6[%c143, %c0_43], %4 {strides = array<i32>} : memref<328x16xf32, #tpu.memory_space<vmem>>, vector<2x16xf32>,
    %c0_44 = arith.constant 0 : index
    %c112 = arith.constant 112 : index
    %c0_45 = arith.constant 0 : index
    %84 = vector.load %arg1[%c0_44, %c112, %c0_45] : memref<1x256x16xbf16, #tpu.memory_space<vmem>>, vector<1x16x16xbf16>
    %85 = vector.shape_cast %84 : vector<1x16x16xbf16> to vector<16x16xbf16>
    %86 = arith.extf %85 : vector<16x16xbf16> to vector<16x16xf32>
    %87 = vector.broadcast %5 : vector<1x16xf32> to vector<16x16xf32>
    %88 = arith.mulf %86, %87 : vector<16x16xf32>
    %89 = vector.broadcast %6 : vector<1x16xf32> to vector<16x16xf32>
    %90 = arith.addf %88, %89 : vector<16x16xf32>
    %cst_46 = arith.constant 0.000000e+00 : f32
    %91 = vector.broadcast %cst_46 : f32 to vector<16x16xf32>
    %92 = arith.maximumf %90, %91 : vector<16x16xf32>
    %c145 = arith.constant 145 : index
    %c0_47 = arith.constant 0 : index
    %93 = vector.load %arg6[%c145, %c0_47] : memref<328x16xf32, #tpu.memory_space<vmem>>, vector<16x16xf32>
    tpu.vector_store %arg6[%c145, %c0_47], %92 {strides = array<i32>} : memref<328x16xf32, #tpu.memory_space<vmem>>, vector<16x16xf32>,
    %c161 = arith.constant 161 : index
    %c0_48 = arith.constant 0 : index
    %94 = vector.load %arg6[%c161, %c0_48] : memref<328x16xf32, #tpu.memory_space<vmem>>, vector<2x16xf32>
    tpu.vector_store %arg6[%c161, %c0_48], %4 {strides = array<i32>} : memref<328x16xf32, #tpu.memory_space<vmem>>, vector<2x16xf32>,
    %c0_49 = arith.constant 0 : index
    %c128 = arith.constant 128 : index
    %c0_50 = arith.constant 0 : index
    %95 = vector.load %arg1[%c0_49, %c128, %c0_50] : memref<1x256x16xbf16, #tpu.memory_space<vmem>>, vector<1x16x16xbf16>
    %96 = vector.shape_cast %95 : vector<1x16x16xbf16> to vector<16x16xbf16>
    %97 = arith.extf %96 : vector<16x16xbf16> to vector<16x16xf32>
    %98 = vector.broadcast %5 : vector<1x16xf32> to vector<16x16xf32>
    %99 = arith.mulf %97, %98 : vector<16x16xf32>
    %100 = vector.broadcast %6 : vector<1x16xf32> to vector<16x16xf32>
    %101 = arith.addf %99, %100 : vector<16x16xf32>
    %cst_51 = arith.constant 0.000000e+00 : f32
    %102 = vector.broadcast %cst_51 : f32 to vector<16x16xf32>
    %103 = arith.maximumf %101, %102 : vector<16x16xf32>
    %c163 = arith.constant 163 : index
    %c0_52 = arith.constant 0 : index
    %104 = vector.load %arg6[%c163, %c0_52] : memref<328x16xf32, #tpu.memory_space<vmem>>, vector<16x16xf32>
    tpu.vector_store %arg6[%c163, %c0_52], %103 {strides = array<i32>} : memref<328x16xf32, #tpu.memory_space<vmem>>, vector<16x16xf32>,
    %c179 = arith.constant 179 : index
    %c0_53 = arith.constant 0 : index
    %105 = vector.load %arg6[%c179, %c0_53] : memref<328x16xf32, #tpu.memory_space<vmem>>, vector<2x16xf32>
    tpu.vector_store %arg6[%c179, %c0_53], %4 {strides = array<i32>} : memref<328x16xf32, #tpu.memory_space<vmem>>, vector<2x16xf32>,
    %c0_54 = arith.constant 0 : index
    %c144 = arith.constant 144 : index
    %c0_55 = arith.constant 0 : index
    %106 = vector.load %arg1[%c0_54, %c144, %c0_55] : memref<1x256x16xbf16, #tpu.memory_space<vmem>>, vector<1x16x16xbf16>
    %107 = vector.shape_cast %106 : vector<1x16x16xbf16> to vector<16x16xbf16>
    %108 = arith.extf %107 : vector<16x16xbf16> to vector<16x16xf32>
    %109 = vector.broadcast %5 : vector<1x16xf32> to vector<16x16xf32>
    %110 = arith.mulf %108, %109 : vector<16x16xf32>
    %111 = vector.broadcast %6 : vector<1x16xf32> to vector<16x16xf32>
    %112 = arith.addf %110, %111 : vector<16x16xf32>
    %cst_56 = arith.constant 0.000000e+00 : f32
    %113 = vector.broadcast %cst_56 : f32 to vector<16x16xf32>
    %114 = arith.maximumf %112, %113 : vector<16x16xf32>
    %c181 = arith.constant 181 : index
    %c0_57 = arith.constant 0 : index
    %115 = vector.load %arg6[%c181, %c0_57] : memref<328x16xf32, #tpu.memory_space<vmem>>, vector<16x16xf32>
    tpu.vector_store %arg6[%c181, %c0_57], %114 {strides = array<i32>} : memref<328x16xf32, #tpu.memory_space<vmem>>, vector<16x16xf32>,
    %c197 = arith.constant 197 : index
    %c0_58 = arith.constant 0 : index
    %116 = vector.load %arg6[%c197, %c0_58] : memref<328x16xf32, #tpu.memory_space<vmem>>, vector<2x16xf32>
    tpu.vector_store %arg6[%c197, %c0_58], %4 {strides = array<i32>} : memref<328x16xf32, #tpu.memory_space<vmem>>, vector<2x16xf32>,
    %c0_59 = arith.constant 0 : index
    %c160 = arith.constant 160 : index
    %c0_60 = arith.constant 0 : index
    %117 = vector.load %arg1[%c0_59, %c160, %c0_60] : memref<1x256x16xbf16, #tpu.memory_space<vmem>>, vector<1x16x16xbf16>
    %118 = vector.shape_cast %117 : vector<1x16x16xbf16> to vector<16x16xbf16>
    %119 = arith.extf %118 : vector<16x16xbf16> to vector<16x16xf32>
    %120 = vector.broadcast %5 : vector<1x16xf32> to vector<16x16xf32>
    %121 = arith.mulf %119, %120 : vector<16x16xf32>
    %122 = vector.broadcast %6 : vector<1x16xf32> to vector<16x16xf32>
    %123 = arith.addf %121, %122 : vector<16x16xf32>
    %cst_61 = arith.constant 0.000000e+00 : f32
    %124 = vector.broadcast %cst_61 : f32 to vector<16x16xf32>
    %125 = arith.maximumf %123, %124 : vector<16x16xf32>
    %c199 = arith.constant 199 : index
    %c0_62 = arith.constant 0 : index
    %126 = vector.load %arg6[%c199, %c0_62] : memref<328x16xf32, #tpu.memory_space<vmem>>, vector<16x16xf32>
    tpu.vector_store %arg6[%c199, %c0_62], %125 {strides = array<i32>} : memref<328x16xf32, #tpu.memory_space<vmem>>, vector<16x16xf32>,
    %c215 = arith.constant 215 : index
    %c0_63 = arith.constant 0 : index
    %127 = vector.load %arg6[%c215, %c0_63] : memref<328x16xf32, #tpu.memory_space<vmem>>, vector<2x16xf32>
    tpu.vector_store %arg6[%c215, %c0_63], %4 {strides = array<i32>} : memref<328x16xf32, #tpu.memory_space<vmem>>, vector<2x16xf32>,
    %c0_64 = arith.constant 0 : index
    %c176 = arith.constant 176 : index
    %c0_65 = arith.constant 0 : index
    %128 = vector.load %arg1[%c0_64, %c176, %c0_65] : memref<1x256x16xbf16, #tpu.memory_space<vmem>>, vector<1x16x16xbf16>
    %129 = vector.shape_cast %128 : vector<1x16x16xbf16> to vector<16x16xbf16>
    %130 = arith.extf %129 : vector<16x16xbf16> to vector<16x16xf32>
    %131 = vector.broadcast %5 : vector<1x16xf32> to vector<16x16xf32>
    %132 = arith.mulf %130, %131 : vector<16x16xf32>
    %133 = vector.broadcast %6 : vector<1x16xf32> to vector<16x16xf32>
    %134 = arith.addf %132, %133 : vector<16x16xf32>
    %cst_66 = arith.constant 0.000000e+00 : f32
    %135 = vector.broadcast %cst_66 : f32 to vector<16x16xf32>
    %136 = arith.maximumf %134, %135 : vector<16x16xf32>
    %c217 = arith.constant 217 : index
    %c0_67 = arith.constant 0 : index
    %137 = vector.load %arg6[%c217, %c0_67] : memref<328x16xf32, #tpu.memory_space<vmem>>, vector<16x16xf32>
    tpu.vector_store %arg6[%c217, %c0_67], %136 {strides = array<i32>} : memref<328x16xf32, #tpu.memory_space<vmem>>, vector<16x16xf32>,
    %c233 = arith.constant 233 : index
    %c0_68 = arith.constant 0 : index
    %138 = vector.load %arg6[%c233, %c0_68] : memref<328x16xf32, #tpu.memory_space<vmem>>, vector<2x16xf32>
    tpu.vector_store %arg6[%c233, %c0_68], %4 {strides = array<i32>} : memref<328x16xf32, #tpu.memory_space<vmem>>, vector<2x16xf32>,
    %c0_69 = arith.constant 0 : index
    %c192 = arith.constant 192 : index
    %c0_70 = arith.constant 0 : index
    %139 = vector.load %arg1[%c0_69, %c192, %c0_70] : memref<1x256x16xbf16, #tpu.memory_space<vmem>>, vector<1x16x16xbf16>
    %140 = vector.shape_cast %139 : vector<1x16x16xbf16> to vector<16x16xbf16>
    %141 = arith.extf %140 : vector<16x16xbf16> to vector<16x16xf32>
    %142 = vector.broadcast %5 : vector<1x16xf32> to vector<16x16xf32>
    %143 = arith.mulf %141, %142 : vector<16x16xf32>
    %144 = vector.broadcast %6 : vector<1x16xf32> to vector<16x16xf32>
    %145 = arith.addf %143, %144 : vector<16x16xf32>
    %cst_71 = arith.constant 0.000000e+00 : f32
    %146 = vector.broadcast %cst_71 : f32 to vector<16x16xf32>
    %147 = arith.maximumf %145, %146 : vector<16x16xf32>
    %c235 = arith.constant 235 : index
    %c0_72 = arith.constant 0 : index
    %148 = vector.load %arg6[%c235, %c0_72] : memref<328x16xf32, #tpu.memory_space<vmem>>, vector<16x16xf32>
    tpu.vector_store %arg6[%c235, %c0_72], %147 {strides = array<i32>} : memref<328x16xf32, #tpu.memory_space<vmem>>, vector<16x16xf32>,
    %c251 = arith.constant 251 : index
    %c0_73 = arith.constant 0 : index
    %149 = vector.load %arg6[%c251, %c0_73] : memref<328x16xf32, #tpu.memory_space<vmem>>, vector<2x16xf32>
    tpu.vector_store %arg6[%c251, %c0_73], %4 {strides = array<i32>} : memref<328x16xf32, #tpu.memory_space<vmem>>, vector<2x16xf32>,
    %c0_74 = arith.constant 0 : index
    %c208 = arith.constant 208 : index
    %c0_75 = arith.constant 0 : index
    %150 = vector.load %arg1[%c0_74, %c208, %c0_75] : memref<1x256x16xbf16, #tpu.memory_space<vmem>>, vector<1x16x16xbf16>
    %151 = vector.shape_cast %150 : vector<1x16x16xbf16> to vector<16x16xbf16>
    %152 = arith.extf %151 : vector<16x16xbf16> to vector<16x16xf32>
    %153 = vector.broadcast %5 : vector<1x16xf32> to vector<16x16xf32>
    %154 = arith.mulf %152, %153 : vector<16x16xf32>
    %155 = vector.broadcast %6 : vector<1x16xf32> to vector<16x16xf32>
    %156 = arith.addf %154, %155 : vector<16x16xf32>
    %cst_76 = arith.constant 0.000000e+00 : f32
    %157 = vector.broadcast %cst_76 : f32 to vector<16x16xf32>
    %158 = arith.maximumf %156, %157 : vector<16x16xf32>
    %c253 = arith.constant 253 : index
    %c0_77 = arith.constant 0 : index
    %159 = vector.load %arg6[%c253, %c0_77] : memref<328x16xf32, #tpu.memory_space<vmem>>, vector<16x16xf32>
    tpu.vector_store %arg6[%c253, %c0_77], %158 {strides = array<i32>} : memref<328x16xf32, #tpu.memory_space<vmem>>, vector<16x16xf32>,
    %c269 = arith.constant 269 : index
    %c0_78 = arith.constant 0 : index
    %160 = vector.load %arg6[%c269, %c0_78] : memref<328x16xf32, #tpu.memory_space<vmem>>, vector<2x16xf32>
    tpu.vector_store %arg6[%c269, %c0_78], %4 {strides = array<i32>} : memref<328x16xf32, #tpu.memory_space<vmem>>, vector<2x16xf32>,
    %c0_79 = arith.constant 0 : index
    %c224 = arith.constant 224 : index
    %c0_80 = arith.constant 0 : index
    %161 = vector.load %arg1[%c0_79, %c224, %c0_80] : memref<1x256x16xbf16, #tpu.memory_space<vmem>>, vector<1x16x16xbf16>
    %162 = vector.shape_cast %161 : vector<1x16x16xbf16> to vector<16x16xbf16>
    %163 = arith.extf %162 : vector<16x16xbf16> to vector<16x16xf32>
    %164 = vector.broadcast %5 : vector<1x16xf32> to vector<16x16xf32>
    %165 = arith.mulf %163, %164 : vector<16x16xf32>
    %166 = vector.broadcast %6 : vector<1x16xf32> to vector<16x16xf32>
    %167 = arith.addf %165, %166 : vector<16x16xf32>
    %cst_81 = arith.constant 0.000000e+00 : f32
    %168 = vector.broadcast %cst_81 : f32 to vector<16x16xf32>
    %169 = arith.maximumf %167, %168 : vector<16x16xf32>
    %c271 = arith.constant 271 : index
    %c0_82 = arith.constant 0 : index
    %170 = vector.load %arg6[%c271, %c0_82] : memref<328x16xf32, #tpu.memory_space<vmem>>, vector<16x16xf32>
    tpu.vector_store %arg6[%c271, %c0_82], %169 {strides = array<i32>} : memref<328x16xf32, #tpu.memory_space<vmem>>, vector<16x16xf32>,
    %c287 = arith.constant 287 : index
    %c0_83 = arith.constant 0 : index
    %171 = vector.load %arg6[%c287, %c0_83] : memref<328x16xf32, #tpu.memory_space<vmem>>, vector<2x16xf32>
    tpu.vector_store %arg6[%c287, %c0_83], %4 {strides = array<i32>} : memref<328x16xf32, #tpu.memory_space<vmem>>, vector<2x16xf32>,
    %c0_84 = arith.constant 0 : index
    %c240 = arith.constant 240 : index
    %c0_85 = arith.constant 0 : index
    %172 = vector.load %arg1[%c0_84, %c240, %c0_85] : memref<1x256x16xbf16, #tpu.memory_space<vmem>>, vector<1x16x16xbf16>
    %173 = vector.shape_cast %172 : vector<1x16x16xbf16> to vector<16x16xbf16>
    %174 = arith.extf %173 : vector<16x16xbf16> to vector<16x16xf32>
    %175 = vector.broadcast %5 : vector<1x16xf32> to vector<16x16xf32>
    %176 = arith.mulf %174, %175 : vector<16x16xf32>
    %177 = vector.broadcast %6 : vector<1x16xf32> to vector<16x16xf32>
    %178 = arith.addf %176, %177 : vector<16x16xf32>
    %cst_86 = arith.constant 0.000000e+00 : f32
    %179 = vector.broadcast %cst_86 : f32 to vector<16x16xf32>
    %180 = arith.maximumf %178, %179 : vector<16x16xf32>
    %c289 = arith.constant 289 : index
    %c0_87 = arith.constant 0 : index
    %181 = vector.load %arg6[%c289, %c0_87] : memref<328x16xf32, #tpu.memory_space<vmem>>, vector<16x16xf32>
    tpu.vector_store %arg6[%c289, %c0_87], %180 {strides = array<i32>} : memref<328x16xf32, #tpu.memory_space<vmem>>, vector<16x16xf32>,
    %c305 = arith.constant 305 : index
    %c0_88 = arith.constant 0 : index
    %182 = vector.load %arg6[%c305, %c0_88] : memref<328x16xf32, #tpu.memory_space<vmem>>, vector<2x16xf32>
    tpu.vector_store %arg6[%c305, %c0_88], %4 {strides = array<i32>} : memref<328x16xf32, #tpu.memory_space<vmem>>, vector<2x16xf32>,
    %c0_89 = arith.constant 0 : index
    %c0_90 = arith.constant 0 : index
    %183 = vector.load %arg6[%c0_89, %c0_90] : memref<328x16xf32, #tpu.memory_space<vmem>>, vector<256x16xf32>
    %184 = arith.truncf %183 : vector<256x16xf32> to vector<256x16xbf16>
    %c0_91 = arith.constant 0 : index
    %c0_92 = arith.constant 0 : index
    %c0_93 = arith.constant 0 : index
    %185 = vector.load %arg4[%c0_91, %c0_92, %c0_93] : memref<9x16x128xbf16, #tpu.memory_space<vmem>>, vector<1x16x128xbf16>
    %186 = vector.shape_cast %185 : vector<1x16x128xbf16> to vector<16x128xbf16>
    %cst_94 = arith.constant dense<0.000000e+00> : vector<256x128xf32>
    %187 = tpu.matmul %184, %186, %cst_94 {dimension_numbers = #tpu.dot_dimension_numbers<[1], [0], [0], [1], [0, 0, 1, 1], [], []>} : vector<256x16xbf16>, vector<16x128xbf16>, vector<256x128xf32> -> vector<256x128xf32>
    %c1 = arith.constant 1 : index
    %c0_95 = arith.constant 0 : index
    %188 = vector.load %arg6[%c1, %c0_95] : memref<328x16xf32, #tpu.memory_space<vmem>>, vector<256x16xf32>
    %189 = arith.truncf %188 : vector<256x16xf32> to vector<256x16xbf16>
    %c1_96 = arith.constant 1 : index
    %c0_97 = arith.constant 0 : index
    %c0_98 = arith.constant 0 : index
    %190 = vector.load %arg4[%c1_96, %c0_97, %c0_98] : memref<9x16x128xbf16, #tpu.memory_space<vmem>>, vector<1x16x128xbf16>
    %191 = vector.shape_cast %190 : vector<1x16x128xbf16> to vector<16x128xbf16>
    %cst_99 = arith.constant dense<0.000000e+00> : vector<256x128xf32>
    %192 = tpu.matmul %189, %191, %cst_99 {dimension_numbers = #tpu.dot_dimension_numbers<[1], [0], [0], [1], [0, 0, 1, 1], [], []>} : vector<256x16xbf16>, vector<16x128xbf16>, vector<256x128xf32> -> vector<256x128xf32>
    %193 = arith.addf %187, %192 : vector<256x128xf32>
    %c2 = arith.constant 2 : index
    %c0_100 = arith.constant 0 : index
    %194 = vector.load %arg6[%c2, %c0_100] : memref<328x16xf32, #tpu.memory_space<vmem>>, vector<256x16xf32>
    %195 = arith.truncf %194 : vector<256x16xf32> to vector<256x16xbf16>
    %c2_101 = arith.constant 2 : index
    %c0_102 = arith.constant 0 : index
    %c0_103 = arith.constant 0 : index
    %196 = vector.load %arg4[%c2_101, %c0_102, %c0_103] : memref<9x16x128xbf16, #tpu.memory_space<vmem>>, vector<1x16x128xbf16>
    %197 = vector.shape_cast %196 : vector<1x16x128xbf16> to vector<16x128xbf16>
    %cst_104 = arith.constant dense<0.000000e+00> : vector<256x128xf32>
    %198 = tpu.matmul %195, %197, %cst_104 {dimension_numbers = #tpu.dot_dimension_numbers<[1], [0], [0], [1], [0, 0, 1, 1], [], []>} : vector<256x16xbf16>, vector<16x128xbf16>, vector<256x128xf32> -> vector<256x128xf32>
    %199 = arith.addf %193, %198 : vector<256x128xf32>
    %c18 = arith.constant 18 : index
    %c0_105 = arith.constant 0 : index
    %200 = vector.load %arg6[%c18, %c0_105] : memref<328x16xf32, #tpu.memory_space<vmem>>, vector<256x16xf32>
    %201 = arith.truncf %200 : vector<256x16xf32> to vector<256x16xbf16>
    %c3 = arith.constant 3 : index
    %c0_106 = arith.constant 0 : index
    %c0_107 = arith.constant 0 : index
    %202 = vector.load %arg4[%c3, %c0_106, %c0_107] : memref<9x16x128xbf16, #tpu.memory_space<vmem>>, vector<1x16x128xbf16>
    %203 = vector.shape_cast %202 : vector<1x16x128xbf16> to vector<16x128xbf16>
    %cst_108 = arith.constant dense<0.000000e+00> : vector<256x128xf32>
    %204 = tpu.matmul %201, %203, %cst_108 {dimension_numbers = #tpu.dot_dimension_numbers<[1], [0], [0], [1], [0, 0, 1, 1], [], []>} : vector<256x16xbf16>, vector<16x128xbf16>, vector<256x128xf32> -> vector<256x128xf32>
    %205 = arith.addf %199, %204 : vector<256x128xf32>
    %c19_109 = arith.constant 19 : index
    %c0_110 = arith.constant 0 : index
    %206 = vector.load %arg6[%c19_109, %c0_110] : memref<328x16xf32, #tpu.memory_space<vmem>>, vector<256x16xf32>
    %207 = arith.truncf %206 : vector<256x16xf32> to vector<256x16xbf16>
    %c4 = arith.constant 4 : index
    %c0_111 = arith.constant 0 : index
    %c0_112 = arith.constant 0 : index
    %208 = vector.load %arg4[%c4, %c0_111, %c0_112] : memref<9x16x128xbf16, #tpu.memory_space<vmem>>, vector<1x16x128xbf16>
    %209 = vector.shape_cast %208 : vector<1x16x128xbf16> to vector<16x128xbf16>
    %cst_113 = arith.constant dense<0.000000e+00> : vector<256x128xf32>
    %210 = tpu.matmul %207, %209, %cst_113 {dimension_numbers = #tpu.dot_dimension_numbers<[1], [0], [0], [1], [0, 0, 1, 1], [], []>} : vector<256x16xbf16>, vector<16x128xbf16>, vector<256x128xf32> -> vector<256x128xf32>
    %211 = arith.addf %205, %210 : vector<256x128xf32>
    %c20 = arith.constant 20 : index
    %c0_114 = arith.constant 0 : index
    %212 = vector.load %arg6[%c20, %c0_114] : memref<328x16xf32, #tpu.memory_space<vmem>>, vector<256x16xf32>
    %213 = arith.truncf %212 : vector<256x16xf32> to vector<256x16xbf16>
    %c5 = arith.constant 5 : index
    %c0_115 = arith.constant 0 : index
    %c0_116 = arith.constant 0 : index
    %214 = vector.load %arg4[%c5, %c0_115, %c0_116] : memref<9x16x128xbf16, #tpu.memory_space<vmem>>, vector<1x16x128xbf16>
    %215 = vector.shape_cast %214 : vector<1x16x128xbf16> to vector<16x128xbf16>
    %cst_117 = arith.constant dense<0.000000e+00> : vector<256x128xf32>
    %216 = tpu.matmul %213, %215, %cst_117 {dimension_numbers = #tpu.dot_dimension_numbers<[1], [0], [0], [1], [0, 0, 1, 1], [], []>} : vector<256x16xbf16>, vector<16x128xbf16>, vector<256x128xf32> -> vector<256x128xf32>
    %217 = arith.addf %211, %216 : vector<256x128xf32>
    %c36 = arith.constant 36 : index
    %c0_118 = arith.constant 0 : index
    %218 = vector.load %arg6[%c36, %c0_118] : memref<328x16xf32, #tpu.memory_space<vmem>>, vector<256x16xf32>
    %219 = arith.truncf %218 : vector<256x16xf32> to vector<256x16xbf16>
    %c6 = arith.constant 6 : index
    %c0_119 = arith.constant 0 : index
    %c0_120 = arith.constant 0 : index
    %220 = vector.load %arg4[%c6, %c0_119, %c0_120] : memref<9x16x128xbf16, #tpu.memory_space<vmem>>, vector<1x16x128xbf16>
    %221 = vector.shape_cast %220 : vector<1x16x128xbf16> to vector<16x128xbf16>
    %cst_121 = arith.constant dense<0.000000e+00> : vector<256x128xf32>
    %222 = tpu.matmul %219, %221, %cst_121 {dimension_numbers = #tpu.dot_dimension_numbers<[1], [0], [0], [1], [0, 0, 1, 1], [], []>} : vector<256x16xbf16>, vector<16x128xbf16>, vector<256x128xf32> -> vector<256x128xf32>
    %223 = arith.addf %217, %222 : vector<256x128xf32>
    %c37_122 = arith.constant 37 : index
    %c0_123 = arith.constant 0 : index
    %224 = vector.load %arg6[%c37_122, %c0_123] : memref<328x16xf32, #tpu.memory_space<vmem>>, vector<256x16xf32>
    %225 = arith.truncf %224 : vector<256x16xf32> to vector<256x16xbf16>
    %c7 = arith.constant 7 : index
    %c0_124 = arith.constant 0 : index
    %c0_125 = arith.constant 0 : index
    %226 = vector.load %arg4[%c7, %c0_124, %c0_125] : memref<9x16x128xbf16, #tpu.memory_space<vmem>>, vector<1x16x128xbf16>
    %227 = vector.shape_cast %226 : vector<1x16x128xbf16> to vector<16x128xbf16>
    %cst_126 = arith.constant dense<0.000000e+00> : vector<256x128xf32>
    %228 = tpu.matmul %225, %227, %cst_126 {dimension_numbers = #tpu.dot_dimension_numbers<[1], [0], [0], [1], [0, 0, 1, 1], [], []>} : vector<256x16xbf16>, vector<16x128xbf16>, vector<256x128xf32> -> vector<256x128xf32>
    %229 = arith.addf %223, %228 : vector<256x128xf32>
    %c38 = arith.constant 38 : index
    %c0_127 = arith.constant 0 : index
    %230 = vector.load %arg6[%c38, %c0_127] : memref<328x16xf32, #tpu.memory_space<vmem>>, vector<256x16xf32>
    %231 = arith.truncf %230 : vector<256x16xf32> to vector<256x16xbf16>
    %c8 = arith.constant 8 : index
    %c0_128 = arith.constant 0 : index
    %c0_129 = arith.constant 0 : index
    %232 = vector.load %arg4[%c8, %c0_128, %c0_129] : memref<9x16x128xbf16, #tpu.memory_space<vmem>>, vector<1x16x128xbf16>
    %233 = vector.shape_cast %232 : vector<1x16x128xbf16> to vector<16x128xbf16>
    %cst_130 = arith.constant dense<0.000000e+00> : vector<256x128xf32>
    %234 = tpu.matmul %231, %233, %cst_130 {dimension_numbers = #tpu.dot_dimension_numbers<[1], [0], [0], [1], [0, 0, 1, 1], [], []>} : vector<256x16xbf16>, vector<16x128xbf16>, vector<256x128xf32> -> vector<256x128xf32>
    %235 = arith.addf %229, %234 : vector<256x128xf32>
    %c0_131 = arith.constant 0 : index
    %c0_132 = arith.constant 0 : index
    %c0_133 = arith.constant 0 : index
    %236 = vector.load %arg5[%c0_131, %c0_132, %c0_133] : memref<1x288x128xf32, #tpu.memory_space<vmem>>, vector<1x256x128xf32>
    %237 = vector.shape_cast %236 : vector<1x256x128xf32> to vector<256x128xf32>
    %238 = vector.shape_cast %235 : vector<256x128xf32> to vector<1x256x128xf32>
    tpu.vector_store %arg5[%c0_131, %c0_132, %c0_133], %238 {strides = array<i32>} : memref<1x288x128xf32, #tpu.memory_space<vmem>>, vector<1x256x128xf32>,
    %c256 = arith.constant 256 : index
    %c0_134 = arith.constant 0 : index
    %239 = vector.load %arg6[%c256, %c0_134] : memref<328x16xf32, #tpu.memory_space<vmem>>, vector<32x16xf32>
    %240 = arith.truncf %239 : vector<32x16xf32> to vector<32x16xbf16>
    %c0_135 = arith.constant 0 : index
    %c0_136 = arith.constant 0 : index
    %c0_137 = arith.constant 0 : index
    %241 = vector.load %arg4[%c0_135, %c0_136, %c0_137] : memref<9x16x128xbf16, #tpu.memory_space<vmem>>, vector<1x16x128xbf16>
    %242 = vector.shape_cast %241 : vector<1x16x128xbf16> to vector<16x128xbf16>
    %cst_138 = arith.constant dense<0.000000e+00> : vector<32x128xf32>
    %243 = tpu.matmul %240, %242, %cst_138 {dimension_numbers = #tpu.dot_dimension_numbers<[1], [0], [0], [1], [0, 0, 1, 1], [], []>} : vector<32x16xbf16>, vector<16x128xbf16>, vector<32x128xf32> -> vector<32x128xf32>
    %c257 = arith.constant 257 : index
    %c0_139 = arith.constant 0 : index
    %244 = vector.load %arg6[%c257, %c0_139] : memref<328x16xf32, #tpu.memory_space<vmem>>, vector<32x16xf32>
    %245 = arith.truncf %244 : vector<32x16xf32> to vector<32x16xbf16>
    %c1_140 = arith.constant 1 : index
    %c0_141 = arith.constant 0 : index
    %c0_142 = arith.constant 0 : index
    %246 = vector.load %arg4[%c1_140, %c0_141, %c0_142] : memref<9x16x128xbf16, #tpu.memory_space<vmem>>, vector<1x16x128xbf16>
    %247 = vector.shape_cast %246 : vector<1x16x128xbf16> to vector<16x128xbf16>
    %cst_143 = arith.constant dense<0.000000e+00> : vector<32x128xf32>
    %248 = tpu.matmul %245, %247, %cst_143 {dimension_numbers = #tpu.dot_dimension_numbers<[1], [0], [0], [1], [0, 0, 1, 1], [], []>} : vector<32x16xbf16>, vector<16x128xbf16>, vector<32x128xf32> -> vector<32x128xf32>
    %249 = arith.addf %243, %248 : vector<32x128xf32>
    %c258 = arith.constant 258 : index
    %c0_144 = arith.constant 0 : index
    %250 = vector.load %arg6[%c258, %c0_144] : memref<328x16xf32, #tpu.memory_space<vmem>>, vector<32x16xf32>
    %251 = arith.truncf %250 : vector<32x16xf32> to vector<32x16xbf16>
    %c2_145 = arith.constant 2 : index
    %c0_146 = arith.constant 0 : index
    %c0_147 = arith.constant 0 : index
    %252 = vector.load %arg4[%c2_145, %c0_146, %c0_147] : memref<9x16x128xbf16, #tpu.memory_space<vmem>>, vector<1x16x128xbf16>
    %253 = vector.shape_cast %252 : vector<1x16x128xbf16> to vector<16x128xbf16>
    %cst_148 = arith.constant dense<0.000000e+00> : vector<32x128xf32>
    %254 = tpu.matmul %251, %253, %cst_148 {dimension_numbers = #tpu.dot_dimension_numbers<[1], [0], [0], [1], [0, 0, 1, 1], [], []>} : vector<32x16xbf16>, vector<16x128xbf16>, vector<32x128xf32> -> vector<32x128xf32>
    %255 = arith.addf %249, %254 : vector<32x128xf32>
    %c274 = arith.constant 274 : index
    %c0_149 = arith.constant 0 : index
    %256 = vector.load %arg6[%c274, %c0_149] : memref<328x16xf32, #tpu.memory_space<vmem>>, vector<32x16xf32>
    %257 = arith.truncf %256 : vector<32x16xf32> to vector<32x16xbf16>
    %c3_150 = arith.constant 3 : index
    %c0_151 = arith.constant 0 : index
    %c0_152 = arith.constant 0 : index
    %258 = vector.load %arg4[%c3_150, %c0_151, %c0_152] : memref<9x16x128xbf16, #tpu.memory_space<vmem>>, vector<1x16x128xbf16>
    %259 = vector.shape_cast %258 : vector<1x16x128xbf16> to vector<16x128xbf16>
    %cst_153 = arith.constant dense<0.000000e+00> : vector<32x128xf32>
    %260 = tpu.matmul %257, %259, %cst_153 {dimension_numbers = #tpu.dot_dimension_numbers<[1], [0], [0], [1], [0, 0, 1, 1], [], []>} : vector<32x16xbf16>, vector<16x128xbf16>, vector<32x128xf32> -> vector<32x128xf32>
    %261 = arith.addf %255, %260 : vector<32x128xf32>
    %c275 = arith.constant 275 : index
    %c0_154 = arith.constant 0 : index
    %262 = vector.load %arg6[%c275, %c0_154] : memref<328x16xf32, #tpu.memory_space<vmem>>, vector<32x16xf32>
    %263 = arith.truncf %262 : vector<32x16xf32> to vector<32x16xbf16>
    %c4_155 = arith.constant 4 : index
    %c0_156 = arith.constant 0 : index
    %c0_157 = arith.constant 0 : index
    %264 = vector.load %arg4[%c4_155, %c0_156, %c0_157] : memref<9x16x128xbf16, #tpu.memory_space<vmem>>, vector<1x16x128xbf16>
    %265 = vector.shape_cast %264 : vector<1x16x128xbf16> to vector<16x128xbf16>
    %cst_158 = arith.constant dense<0.000000e+00> : vector<32x128xf32>
    %266 = tpu.matmul %263, %265, %cst_158 {dimension_numbers = #tpu.dot_dimension_numbers<[1], [0], [0], [1], [0, 0, 1, 1], [], []>} : vector<32x16xbf16>, vector<16x128xbf16>, vector<32x128xf32> -> vector<32x128xf32>
    %267 = arith.addf %261, %266 : vector<32x128xf32>
    %c276 = arith.constant 276 : index
    %c0_159 = arith.constant 0 : index
    %268 = vector.load %arg6[%c276, %c0_159] : memref<328x16xf32, #tpu.memory_space<vmem>>, vector<32x16xf32>
    %269 = arith.truncf %268 : vector<32x16xf32> to vector<32x16xbf16>
    %c5_160 = arith.constant 5 : index
    %c0_161 = arith.constant 0 : index
    %c0_162 = arith.constant 0 : index
    %270 = vector.load %arg4[%c5_160, %c0_161, %c0_162] : memref<9x16x128xbf16, #tpu.memory_space<vmem>>, vector<1x16x128xbf16>
    %271 = vector.shape_cast %270 : vector<1x16x128xbf16> to vector<16x128xbf16>
    %cst_163 = arith.constant dense<0.000000e+00> : vector<32x128xf32>
    %272 = tpu.matmul %269, %271, %cst_163 {dimension_numbers = #tpu.dot_dimension_numbers<[1], [0], [0], [1], [0, 0, 1, 1], [], []>} : vector<32x16xbf16>, vector<16x128xbf16>, vector<32x128xf32> -> vector<32x128xf32>
    %273 = arith.addf %267, %272 : vector<32x128xf32>
    %c292 = arith.constant 292 : index
    %c0_164 = arith.constant 0 : index
    %274 = vector.load %arg6[%c292, %c0_164] : memref<328x16xf32, #tpu.memory_space<vmem>>, vector<32x16xf32>
    %275 = arith.truncf %274 : vector<32x16xf32> to vector<32x16xbf16>
    %c6_165 = arith.constant 6 : index
    %c0_166 = arith.constant 0 : index
    %c0_167 = arith.constant 0 : index
    %276 = vector.load %arg4[%c6_165, %c0_166, %c0_167] : memref<9x16x128xbf16, #tpu.memory_space<vmem>>, vector<1x16x128xbf16>
    %277 = vector.shape_cast %276 : vector<1x16x128xbf16> to vector<16x128xbf16>
    %cst_168 = arith.constant dense<0.000000e+00> : vector<32x128xf32>
    %278 = tpu.matmul %275, %277, %cst_168 {dimension_numbers = #tpu.dot_dimension_numbers<[1], [0], [0], [1], [0, 0, 1, 1], [], []>} : vector<32x16xbf16>, vector<16x128xbf16>, vector<32x128xf32> -> vector<32x128xf32>
    %279 = arith.addf %273, %278 : vector<32x128xf32>
    %c293 = arith.constant 293 : index
    %c0_169 = arith.constant 0 : index
    %280 = vector.load %arg6[%c293, %c0_169] : memref<328x16xf32, #tpu.memory_space<vmem>>, vector<32x16xf32>
    %281 = arith.truncf %280 : vector<32x16xf32> to vector<32x16xbf16>
    %c7_170 = arith.constant 7 : index
    %c0_171 = arith.constant 0 : index
    %c0_172 = arith.constant 0 : index
    %282 = vector.load %arg4[%c7_170, %c0_171, %c0_172] : memref<9x16x128xbf16, #tpu.memory_space<vmem>>, vector<1x16x128xbf16>
    %283 = vector.shape_cast %282 : vector<1x16x128xbf16> to vector<16x128xbf16>
    %cst_173 = arith.constant dense<0.000000e+00> : vector<32x128xf32>
    %284 = tpu.matmul %281, %283, %cst_173 {dimension_numbers = #tpu.dot_dimension_numbers<[1], [0], [0], [1], [0, 0, 1, 1], [], []>} : vector<32x16xbf16>, vector<16x128xbf16>, vector<32x128xf32> -> vector<32x128xf32>
    %285 = arith.addf %279, %284 : vector<32x128xf32>
    %c294 = arith.constant 294 : index
    %c0_174 = arith.constant 0 : index
    %286 = vector.load %arg6[%c294, %c0_174] : memref<328x16xf32, #tpu.memory_space<vmem>>, vector<32x16xf32>
    %287 = arith.truncf %286 : vector<32x16xf32> to vector<32x16xbf16>
    %c8_175 = arith.constant 8 : index
    %c0_176 = arith.constant 0 : index
    %c0_177 = arith.constant 0 : index
    %288 = vector.load %arg4[%c8_175, %c0_176, %c0_177] : memref<9x16x128xbf16, #tpu.memory_space<vmem>>, vector<1x16x128xbf16>
    %289 = vector.shape_cast %288 : vector<1x16x128xbf16> to vector<16x128xbf16>
    %cst_178 = arith.constant dense<0.000000e+00> : vector<32x128xf32>
    %290 = tpu.matmul %287, %289, %cst_178 {dimension_numbers = #tpu.dot_dimension_numbers<[1], [0], [0], [1], [0, 0, 1, 1], [], []>} : vector<32x16xbf16>, vector<16x128xbf16>, vector<32x128xf32> -> vector<32x128xf32>
    %291 = arith.addf %285, %290 : vector<32x128xf32>
    %c0_179 = arith.constant 0 : index
    %c256_180 = arith.constant 256 : index
    %c0_181 = arith.constant 0 : index
    %292 = vector.load %arg5[%c0_179, %c256_180, %c0_181] : memref<1x288x128xf32, #tpu.memory_space<vmem>>, vector<1x32x128xf32>
    %293 = vector.shape_cast %292 : vector<1x32x128xf32> to vector<32x128xf32>
    %294 = vector.shape_cast %291 : vector<32x128xf32> to vector<1x32x128xf32>
    tpu.vector_store %arg5[%c0_179, %c256_180, %c0_181], %294 {strides = array<i32>} : memref<1x288x128xf32, #tpu.memory_space<vmem>>, vector<1x32x128xf32>,
    return
  }
  func.func @transform_0(%arg0: i32) -> (i32, i32, i32) {
    %c0_i32 = arith.constant 0 : i32
    %c0_i32_0 = arith.constant 0 : i32
    %c0_i32_1 = arith.constant 0 : i32
    return %arg0, %c0_i32, %c0_i32_0 : i32, i32, i32
  }
  func.func @transform_1(%arg0: i32) -> (i32, i32) {
    %c0_i32 = arith.constant 0 : i32
    %c0_i32_0 = arith.constant 0 : i32
    %c0_i32_1 = arith.constant 0 : i32
    return %c0_i32, %c0_i32_0 : i32, i32
  }
  func.func @transform_2(%arg0: i32) -> (i32, i32) {
    %c0_i32 = arith.constant 0 : i32
    %c0_i32_0 = arith.constant 0 : i32
    %c0_i32_1 = arith.constant 0 : i32
    return %c0_i32, %c0_i32_0 : i32, i32
  }
  func.func @transform_3(%arg0: i32) -> (i32, i32, i32) {
    %c0_i32 = arith.constant 0 : i32
    %c0_i32_0 = arith.constant 0 : i32
    %c0_i32_1 = arith.constant 0 : i32
    %c0_i32_2 = arith.constant 0 : i32
    return %c0_i32, %c0_i32_0, %c0_i32_1 : i32, i32, i32
  }
  func.func @transform_4(%arg0: i32) -> (i32, i32, i32) {
    %c0_i32 = arith.constant 0 : i32
    %c0_i32_0 = arith.constant 0 : i32
    %c0_i32_1 = arith.constant 0 : i32
    return %arg0, %c0_i32, %c0_i32_0 : i32, i32, i32
  }
}

</mosaic_0001>

<bundles_post_ra>
// kernel: bottleneck_forward.2
= control target key start
LH: loop header
LB: loop body
LE: loop exit
PB: predicated region body
PF: predicated region fallthrough
CT: control target
= control target key end

     0   :  { %vm420_vm0 = vcmask 1043456   ;;  %vm323_vm1 = vcmask 64512   ;;  %vm969_vm2 = vcmask 125952   ;;  %vm1034_vm3 = vcmask 130048   ;;  %s2713_s3 = inlined_call_operand.vmem [shape: bf16[8,16], index: 3, kind: input, shape index: {}]   ;;  %s2714_s0 = inlined_call_operand.vmem [shape: f32[512,8], index: 0, kind: input, shape index: {}]   ;;  %s2715_s1 = inlined_call_operand.vmem [shape: f32[1,8], index: 1, kind: input, shape index: {}]   ;;  %s2716_s2 = inlined_call_operand.vmem [shape: f32[1,8], index: 2, kind: input, shape index: {}]   ;;  %s2717_s4 = inlined_call_operand.vmem [shape: bf16[512,16], index: 4, kind: output, shape index: {0}]   ;;  %s2718_s5 = inlined_call_operand.vmem [shape: f32[8,16], index: 5, kind: output, shape index: {1}]  }
   0x1   :  { %v322_v0 = vld [vmem:[%s2713_s3] sm:$0xf]  ;;  %v21_v2 = vld [vmem:[%s2714_s0 + $0x8] sm:$0xff]  ;;  %v22_v6 = vld [vmem:[%s2714_s0 + $0x10] sm:$0xff]  ;;  %vm1365_vm4 = vcmask 1040384   ;;  %vm1367_vm5 = vcmask 1041408  }
   0x2   :  { %v20_v1 = vld [vmem:[%s2714_s0] sm:$0xff]  ;;  %1641 = vmatprep.subr.msk.bf16.mxu0 %vm420_vm0, %v322_v0  ;;  %v422_v3 = vsel %vm420_vm0, %v322_v0, 0  ;;  %1642 = vmatprep.subr.msk.bf16.mxu1 %vm420_vm0, %v322_v0  ;;  %v23_v9 = vld [vmem:[%s2714_s0 + $0x18] sm:$0xff]  ;;  %v25_v12 = vld [vmem:[%s2714_s0 + $0x28] sm:$0xff] }
   0x3   :  { %v1685_v4 = vld [vmem:[%s2715_s1] ss:$0 sm:$0xff]  ;;  %1574 = vmatpush3.bf16.msra.mxu0 %v422_v3  ;;  %1640 = vmatpush3.bf16.msra.mxu1 %v422_v3  ;;  %v26_v16 = vld [vmem:[%s2714_s0 + $0x30] sm:$0xff]  ;;  %v27_v17 = vld [vmem:[%s2714_s0 + $0x38] sm:$0xff] }
   0x4   :  { %v1690_v5 = vld [vmem:[%s2716_s2] ss:$0 sm:$0xff]  ;;  %v91_v7 = vmul.f32 %v1685_v4, %v20_v1  ;;  %v92_v8 = vmul.f32 %v1685_v4, %v21_v2  ;;  %v93_v10 = vmul.f32 %v1685_v4, %v22_v6  ;;  %v94_v13 = vmul.f32 %v1685_v4, %v23_v9  ;;  %v29_v27 = vld [vmem:[%s2714_s0 + $0x48] sm:$0xff]  ;;  %v30_v32 = vld [vmem:[%s2714_s0 + $0x50] sm:$0xff] }
   0x5   :  { %v24_v11 = vld [vmem:[%s2714_s0 + $0x20] sm:$0xff]  ;;  %v96_v15 = vmul.f32 %v1685_v4, %v25_v12  ;;  %v97_v21 = vmul.f32 %v1685_v4, %v26_v16  ;;  %v98_v25 = vmul.f32 %v1685_v4, %v27_v17  ;;  %v31_v37 = vld [vmem:[%s2714_s0 + $0x58] sm:$0xff]  ;;  %v100_v41 = vmul.f32 %v1685_v4, %v29_v27  ;;  %v33_v42 = vld [vmem:[%s2714_s0 + $0x68] sm:$0xff] }
   0x6   :  { %v95_v14 = vmul.f32 %v1685_v4, %v24_v11  ;;  %v162_v18 = vadd.f32 %v1690_v5, %v91_v7  ;;  %v163_v19 = vadd.f32 %v1690_v5, %v92_v8  ;;  %v164_v20 = vadd.f32 %v1690_v5, %v93_v10  ;;  %v28_v26 = vld [vmem:[%s2714_s0 + $0x40] sm:$0xff]  ;;  %v34_v46 = vld [vmem:[%s2714_s0 + $0x70] sm:$0xff]  ;;  %v35_v55 = vld [vmem:[%s2714_s0 + $0x78] sm:$0xff] }
   0x7   :  { %v165_v22 = vadd.f32 %v1690_v5, %v94_v13  ;;  %v167_v24 = vadd.f32 %v1690_v5, %v96_v15  ;;  %v168_v31 = vadd.f32 %v1690_v5, %v97_v21  ;;  %v169_v36 = vadd.f32 %v1690_v5, %v98_v25  ;;  %v32_v38 = vld [vmem:[%s2714_s0 + $0x60] sm:$0xff]  ;;  %v37_v60 = vld [vmem:[%s2714_s0 + $0x88] sm:$0xff]  ;;  %v38_v0 = vld [vmem:[%s2714_s0 + $0x90] sm:$0xff] }
   0x8   :  { %v166_v23 = vadd.f32 %v1690_v5, %v95_v14  ;;  %v226_v28 = vmax.f32 %v162_v18, 0.0  ;;  %v227_v29 = vmax.f32 %v163_v19, 0.0  ;;  %v228_v30 = vmax.f32 %v164_v20, 0.0  ;;  %v36_v56 = vld [vmem:[%s2714_s0 + $0x80] sm:$0xff]  ;;  %v39_v1 = vld [vmem:[%s2714_s0 + $0x98] sm:$0xff]  ;;  %v41_v10 = vld [vmem:[%s2714_s0 + $0xa8] sm:$0xff] }
   0x9   :  { %v229_v33 = vmax.f32 %v165_v22, 0.0  ;;  %v231_v35 = vmax.f32 %v167_v24, 0.0  ;;  %v99_v40 = vmul.f32 %v1685_v4, %v28_v26  ;;  %v101_v45 = vmul.f32 %v1685_v4, %v30_v32  ;;  %v40_v6 = vld [vmem:[%s2714_s0 + $0xa0] sm:$0xff]  ;;  %v42_v15 = vld [vmem:[%s2714_s0 + $0xb0] sm:$0xff]  ;;  %v43_v20 = vld [vmem:[%s2714_s0 + $0xb8] sm:$0xff] }
   0xa   :  { %v230_v34 = vmax.f32 %v166_v23, 0.0  ;;  %v290_v39 = vpack.c.bf16 %v227_v29, %v226_v28  ;;  %v171_v48 = vadd.f32 %v1690_v5, %v100_v41  ;;  %v102_v49 = vmul.f32 %v1685_v4, %v31_v37  ;;  %v44_v25 = vld [vmem:[%s2714_s0 + $0xc0] sm:$0xff]  ;;  %v45_v29 = vld [vmem:[%s2714_s0 + $0xc8] sm:$0xff] }
   0xb   :  { %v291_v43 = vpack.c.bf16 %v229_v33, %v228_v30  ;;  %v170_v47 = vadd.f32 %v1690_v5, %v99_v40  ;;  %v103_v50 = vmul.f32 %v1685_v4, %v32_v38  ;;  %v232_v51 = vmax.f32 %v168_v31, 0.0  ;;  %v46_v33 = vld [vmem:[%s2714_s0 + $0xd0] sm:$0xff] }
   0xc   :  { %v292_v44 = vpack.c.bf16 %v231_v35, %v230_v34  ;;  %1575 = vmatprep.mubr.msk.bf16.mxu0 %vm323_vm1, %v290_v39  ;;  %v233_v52 = vmax.f32 %v169_v36, 0.0  ;;  %v172_v53 = vadd.f32 %v1690_v5, %v101_v45  ;;  %v104_v54 = vmul.f32 %v1685_v4, %v33_v42  ;;  %v47_v42 = vld [vmem:[%s2714_s0 + $0xd8] sm:$0xff] }
   0xd   :  { %1576 = vmatmul.mubr.msk.bf16.vlgmr.msra.gmra.mrb[0].mxu0 %vm323_vm1, %v291_v43  ;;  %v234_v57 = vmax.f32 %v170_v47, 0.0  ;;  %v235_v58 = vmax.f32 %v171_v48, 0.0  ;;  %v105_v59 = vmul.f32 %v1685_v4, %v34_v46  ;;  %v173_v61 = vadd.f32 %v1690_v5, %v102_v49  ;;  %v48_v47 = vld [vmem:[%s2714_s0 + $0xe0] sm:$0xff] }
   0xe   :  { %1579 = vmatprep.mubr.msk.bf16.mxu0 %vm323_vm1, %v292_v44  ;;  %v174_v62 = vadd.f32 %v1690_v5, %v103_v50  ;;  %v175_v63 = vadd.f32 %v1690_v5, %v104_v54  ;;  %v106_v2 = vmul.f32 %v1685_v4, %v35_v55  ;;  %v107_v3 = vmul.f32 %v1685_v4, %v36_v56  ;;  %v52_v54 = vld [vmem:[%s2714_s0 + $0x100] sm:$0xff]  ;;  %v49_v56 = vld [vmem:[%s2714_s0 + $0xe8] sm:$0xff] }
   0xf   :  { %v293_v7 = vpack.c.bf16 %v233_v52, %v232_v51  ;;  %v236_v8 = vmax.f32 %v172_v53, 0.0  ;;  %v108_v9 = vmul.f32 %v1685_v4, %v37_v60  ;;  %v294_v11 = vpack.c.bf16 %v235_v58, %v234_v57  ;;  %v53_v58 = vld [vmem:[%s2714_s0 + $0x108] sm:$0xff] }
  0x10   :  { %v176_v12 = vadd.f32 %v1690_v5, %v105_v59  ;;  %v109_v13 = vmul.f32 %v1685_v4, %v38_v0  ;;  %v110_v14 = vmul.f32 %v1685_v4, %v39_v1  ;;  %v237_v16 = vmax.f32 %v173_v61, 0.0  ;;  %v55_v0 = vld [vmem:[%s2714_s0 + $0x118] sm:$0xff] }
  0x11   :  { %v238_v17 = vmax.f32 %v174_v62, 0.0  ;;  %v239_v18 = vmax.f32 %v175_v63, 0.0  ;;  %v111_v19 = vmul.f32 %v1685_v4, %v40_v6  ;;  %v177_v21 = vadd.f32 %v1690_v5, %v106_v2  ;;  %v54_v63 = vld [vmem:[%s2714_s0 + $0x110] sm:$0xff] }
  0x12   :  { %v178_v22 = vadd.f32 %v1690_v5, %v107_v3  ;;  %v179_v23 = vadd.f32 %v1690_v5, %v108_v9  ;;  %v112_v24 = vmul.f32 %v1685_v4, %v41_v10  ;;  %v180_v26 = vadd.f32 %v1690_v5, %v109_v13  ;;  %v50_v6 = vld [vmem:[%s2714_s0 + $0xf0] sm:$0xff]  ;;  %v57_v13 = vld [vmem:[%s2714_s0 + $0x128] sm:$0xff] }
  0x13   :  { %v181_v27 = vadd.f32 %v1690_v5, %v110_v14  ;;  %v113_v28 = vmul.f32 %v1685_v4, %v42_v15  ;;  %v182_v30 = vadd.f32 %v1690_v5, %v111_v19  ;;  %v114_v32 = vmul.f32 %v1685_v4, %v43_v20 }
  0x14   :  { %v183_v31 = vadd.f32 %v1690_v5, %v112_v24  ;;  %v295_v34 = vpack.c.bf16 %v237_v16, %v236_v8  ;;  %v296_v35 = vpack.c.bf16 %v239_v18, %v238_v17  ;;  %v240_v36 = vmax.f32 %v176_v12, 0.0  ;;  %v56_v8 = vld [vmem:[%s2714_s0 + $0x120] sm:$0xff]  ;;  %v58_v18 = vld [vmem:[%s2714_s0 + $0x130] sm:$0xff] }
  0x15   :  { %1580 = vmatmul.mubr.msk.bf16.gmra.mrb[4].mxu0 %vm323_vm1, %v293_v7  ;;  %v115_v37 = vmul.f32 %v1685_v4, %v44_v25  ;;  %v241_v38 = vmax.f32 %v177_v21, 0.0  ;;  %v242_v39 = vmax.f32 %v178_v22, 0.0  ;;  %v243_v40 = vmax.f32 %v179_v23, 0.0  ;;  %v59_v23 = vld [vmem:[%s2714_s0 + $0x138] sm:$0xff] }
  0x16   :  { %1583 = vmatprep.mubr.msk.bf16.mxu0 %vm323_vm1, %v294_v11  ;;  %v116_v41 = vmul.f32 %v1685_v4, %v45_v29  ;;  %v244_v43 = vmax.f32 %v180_v26, 0.0  ;;  %v245_v44 = vmax.f32 %v181_v27, 0.0  ;;  %v1824_v45 = vadd.f32 %v1690_v5, %v113_v28  ;;  %v60_v28 = vld [vmem:[%s2714_s0 + $0x140] sm:$0xff] }
  0x17   :  { %v117_v46 = vmul.f32 %v1685_v4, %v46_v33  ;;  %v246_v48 = vmax.f32 %v182_v30, 0.0  ;;  %v247_v49 = vmax.f32 %v183_v31, 0.0  ;;  %v1831_v50 = vadd.f32 %v1690_v5, %v114_v32  ;;  %v61_v33 = vld [vmem:[%s2714_s0 + $0x148] sm:$0xff] }
  0x18   :  { %v1834_v51 = vadd.f32 %v1690_v5, %v115_v37  ;;  %v1837_v52 = vadd.f32 %v1690_v5, %v116_v41  ;;  %v118_v53 = vmul.f32 %v1685_v4, %v47_v42  ;;  %v297_v55 = vpack.c.bf16 %v241_v38, %v240_v36  ;;  %v62_v38 = vld [vmem:[%s2714_s0 + $0x150] sm:$0xff] }
  0x19   :  { %v119_v57 = vmul.f32 %v1685_v4, %v48_v47  ;;  %v298_v59 = vpack.c.bf16 %v243_v40, %v242_v39  ;;  %v1851_v60 = vpack.c.bf16 %v245_v44, %v244_v43  ;;  %v248_v61 = vmax.f32 %v1824_v45, 0.0  ;;  %v63_v39 = vld [vmem:[%s2714_s0 + $0x158] sm:$0xff]  ;;  %v64_v44 = vld [vmem:[%s2714_s0 + $0x160] sm:$0xff] }
  0x1a   :  { %v1855_v62 = vadd.f32 %v1690_v5, %v117_v46  ;;  %v1864_v1 = vpack.c.bf16 %v247_v49, %v246_v48  ;;  %v249_v2 = vmax.f32 %v1831_v50, 0.0  ;;  %v250_v3 = vmax.f32 %v1834_v51, 0.0  ;;  %v75_v45 = vld [vmem:[%s2714_s0 + $0x1b8] sm:$0xff] }
  0x1b   :  { %v123_v7 = vmul.f32 %v1685_v4, %v52_v54  ;;  %v251_v9 = vmax.f32 %v1837_v52, 0.0  ;;  %v1877_v10 = vadd.f32 %v1690_v5, %v118_v53  ;;  %v120_v11 = vmul.f32 %v1685_v4, %v49_v56  ;;  %v65_v53 = vld [vmem:[%s2714_s0 + $0x168] sm:$0xff] }
  0x1c   :  { %v124_v12 = vmul.f32 %v1685_v4, %v53_v58  ;;  %v1885_v14 = vadd.f32 %v1690_v5, %v119_v57  ;;  %v125_v16 = vmul.f32 %v1685_v4, %v54_v63  ;;  %v126_v17 = vmul.f32 %v1685_v4, %v55_v0  ;;  %v66_v58 = vld [vmem:[%s2714_s0 + $0x170] sm:$0xff] }
  0x1d   :  { %1584 = vmatmul.mubr.msk.bf16.gmra.mrb[8].mxu0 %vm323_vm1, %v295_v34  ;;  %v194_v15 = vadd.f32 %v1690_v5, %v123_v7  ;;  %v252_v19 = vmax.f32 %v1855_v62, 0.0  ;;  %v121_v20 = vmul.f32 %v1685_v4, %v50_v6  ;;  %v127_v22 = vmul.f32 %v1685_v4, %v56_v8  ;;  %v67_v8 = vld [vmem:[%s2714_s0 + $0x178] sm:$0xff]  ;;  %v72_v62 = vld [vmem:[%s2714_s0 + $0x1a0] sm:$0xff] }
  0x1e   :  { %1587 = vmatprep.mubr.msk.bf16.mxu0 %vm323_vm1, %v296_v35  ;;  %v195_v21 = vadd.f32 %v1690_v5, %v124_v12  ;;  %v196_v25 = vadd.f32 %v1690_v5, %v125_v16  ;;  %v197_v26 = vadd.f32 %v1690_v5, %v126_v17  ;;  %v128_v27 = vmul.f32 %v1685_v4, %v57_v13  ;;  %v68_v16 = vld [vmem:[%s2714_s0 + $0x180] sm:$0xff] }
  0x1f   :  { %v258_v24 = vmax.f32 %v194_v15, 0.0  ;;  %v1907_v29 = vadd.f32 %v1690_v5, %v120_v11  ;;  %v198_v31 = vadd.f32 %v1690_v5, %v127_v22  ;;  %v129_v32 = vmul.f32 %v1685_v4, %v58_v18 }
  0x20   :  { %v259_v30 = vmax.f32 %v195_v21, 0.0  ;;  %v260_v34 = vmax.f32 %v196_v25, 0.0  ;;  %v261_v35 = vmax.f32 %v197_v26, 0.0  ;;  %v199_v36 = vadd.f32 %v1690_v5, %v128_v27  ;;  %v69_v27 = vld [vmem:[%s2714_s0 + $0x188] sm:$0xff] }
  0x21   :  { %v130_v37 = vmul.f32 %v1685_v4, %v59_v23  ;;  %v262_v41 = vmax.f32 %v198_v31, 0.0  ;;  %v200_v42 = vadd.f32 %v1690_v5, %v129_v32  ;;  %v131_v43 = vmul.f32 %v1685_v4, %v60_v28 }
  0x22   :  { %v306_v40 = vpack.c.bf16 %v259_v30, %v258_v24  ;;  %v307_v46 = vpack.c.bf16 %v261_v35, %v260_v34  ;;  %v263_v47 = vmax.f32 %v199_v36, 0.0  ;;  %v132_v49 = vmul.f32 %v1685_v4, %v61_v33  ;;  %v70_v36 = vld [vmem:[%s2714_s0 + $0x190] sm:$0xff] }
  0x23   :  { %v201_v48 = vadd.f32 %v1690_v5, %v130_v37  ;;  %v264_v54 = vmax.f32 %v200_v42, 0.0  ;;  %v133_v56 = vmul.f32 %v1685_v4, %v62_v38  ;;  %v134_v57 = vmul.f32 %v1685_v4, %v63_v39 }
  0x24   :  { %1607 = vmatprep.mubr.msk.bf16.mxu1 %vm323_vm1, %v306_v40  ;;  %v308_v63 = vpack.c.bf16 %v263_v47, %v262_v41  ;;  %v203_v6 = vadd.f32 %v1690_v5, %v132_v49  ;;  %v135_v7 = vmul.f32 %v1685_v4, %v64_v44  ;;  %v136_v15 = vmul.f32 %v1685_v4, %v65_v53  ;;  %v71_v40 = vld [vmem:[%s2714_s0 + $0x198] sm:$0xff]  ;;  %v73_v41 = vld [vmem:[%s2714_s0 + $0x1a8] sm:$0xff]  ;;  %v78_v49 = vld [vmem:[%s2714_s0 + $0x1d0] sm:$0xff] }
  0x25   :  { %1588 = vmatmul.mubr.msk.bf16.gmra.mrb[12].mxu0 %vm323_vm1, %v297_v55  ;;  %v202_v55 = vadd.f32 %v1690_v5, %v131_v43  ;;  %1608 = vmatmul.mubr.msk.bf16.vlgmr.msra.gmra.mrb[0].mxu1 %vm323_vm1, %v307_v46  ;;  %v265_v0 = vmax.f32 %v201_v48, 0.0  ;;  %v204_v12 = vadd.f32 %v1690_v5, %v133_v56  ;;  %v205_v13 = vadd.f32 %v1690_v5, %v134_v57  ;;  %v77_v43 = vld [vmem:[%s2714_s0 + $0x1c8] sm:$0xff]  ;;  %v79_v53 = vld [vmem:[%s2714_s0 + $0x1d8] sm:$0xff] }
  0x26   :  { %1591 = vmatprep.mubr.msk.bf16.mxu0 %vm323_vm1, %v298_v59  ;;  %v51_v59 = vld [vmem:[%s2714_s0 + $0xf8] sm:$0xff]  ;;  %v253_v17 = vmax.f32 %v1877_v10, 0.0  ;;  %1611 = vmatprep.mubr.msk.bf16.mxu1 %vm323_vm1, %v308_v63  ;;  %v267_v18 = vmax.f32 %v203_v6, 0.0  ;;  %v206_v21 = vadd.f32 %v1690_v5, %v135_v7  ;;  %v137_v22 = vmul.f32 %v1685_v4, %v66_v58  ;;  %v80_v58 = vld [vmem:[%s2714_s0 + $0x1e0] sm:$0xff]  ;;  %v81_v7 = vld [vmem:[%s2714_s0 + $0x1e8] sm:$0xff] }
  0x27   :  { %v266_v11 = vmax.f32 %v202_v55, 0.0  ;;  %v254_v23 = vmax.f32 %v1885_v14, 0.0  ;;  %v122_v24 = vmul.f32 %v1685_v4, %v51_v59  ;;  %v207_v25 = vadd.f32 %v1690_v5, %v136_v15  ;;  %v82_v15 = vld [vmem:[%s2714_s0 + $0x1f0] sm:$0xff] }
  0x28   :  { %v138_v26 = vmul.f32 %v1685_v4, %v67_v8  ;;  %v255_v10 = vmax.f32 %v1907_v29, 0.0  ;;  %v1969_v28 = vadd.f32 %v1690_v5, %v121_v20  ;;  %v309_v30 = vpack.c.bf16 %v265_v0, %v264_v54 }
  0x29   :  { %v139_v31 = vmul.f32 %v1685_v4, %v68_v16  ;;  %v310_v14 = vpack.c.bf16 %v267_v18, %v266_v11  ;;  %v268_v32 = vmax.f32 %v204_v12, 0.0  ;;  %v269_v33 = vmax.f32 %v205_v13, 0.0 }
  0x2a   :  { %v1975_v34 = vadd.f32 %v1690_v5, %v137_v22  ;;  %v270_v35 = vmax.f32 %v206_v21, 0.0  ;;  %v271_v29 = vmax.f32 %v207_v25, 0.0  ;;  %v140_v20 = vmul.f32 %v1685_v4, %v69_v27  ;;  %v83_v22 = vld [vmem:[%s2714_s0 + $0x1f8] sm:$0xff] }
  0x2b   :  { %v301_v37 = vpack.c.bf16 %v249_v2, %v248_v61  ;;  %v1996_v38 = vpack.c.bf16 %v253_v17, %v252_v19  ;;  %v1999_v39 = vadd.f32 %v1690_v5, %v138_v26  ;;  %v2007_v50 = vpack.c.bf16 %v255_v10, %v254_v23  ;;  %v76_v2 = vld [vmem:[%s2714_s0 + $0x1c0] sm:$0xff] }
  0x2c   :  { %v2010_v51 = vadd.f32 %v1690_v5, %v122_v24  ;;  %v256_v52 = vmax.f32 %v1969_v28, 0.0  ;;  %v2015_v61 = vadd.f32 %v1690_v5, %v139_v31  ;;  %v141_v19 = vmul.f32 %v1685_v4, %v70_v36 }
  0x2d   :  { %1592 = vmatmul.mubr.msk.bf16.gmra.mrb[16].mxu0 %vm323_vm1, %v1851_v60  ;;  %v74_v60 = vld [vmem:[%s2714_s0 + $0x1b0] sm:$0xff]  ;;  %1612 = vmatmul.mubr.msk.bf16.gmra.mrb[4].mxu1 %vm323_vm1, %v309_v30  ;;  %v312_v44 = vpack.c.bf16 %v271_v29, %v270_v35  ;;  %v211_v46 = vadd.f32 %v1690_v5, %v140_v20  ;;  %v142_v47 = vmul.f32 %v1685_v4, %v71_v40  ;;  %v273_v54 = vmax.f32 %v1999_v39, 0.0 }
  0x2e   :  { %1595 = vmatprep.mubr.msk.bf16.mxu0 %vm323_vm1, %v1864_v1  ;;  %v302_v1 = vpack.c.bf16 %v251_v9, %v250_v3  ;;  %1615 = vmatprep.mubr.msk.bf16.mxu1 %vm323_vm1, %v310_v14  ;;  %v311_v3 = vpack.c.bf16 %v269_v33, %v268_v32  ;;  %v272_v9 = vmax.f32 %v1975_v34, 0.0  ;;  %v145_v42 = vmul.f32 %v1685_v4, %v74_v60 }
  0x2f   :  { %v146_v48 = vmul.f32 %v1685_v4, %v75_v45  ;;  %v143_v55 = vmul.f32 %v1685_v4, %v72_v62  ;;  %v147_v57 = vmul.f32 %v1685_v4, %v76_v2  ;;  %v274_v59 = vmax.f32 %v2015_v61, 0.0 }
  0x30   :  { %v216_v56 = vadd.f32 %v1690_v5, %v145_v42  ;;  %v144_v63 = vmul.f32 %v1685_v4, %v73_v41  ;;  %v148_v6 = vmul.f32 %v1685_v4, %v77_v43  ;;  %v149_v12 = vmul.f32 %v1685_v4, %v78_v49 }
  0x31   :  { %v217_v0 = vadd.f32 %v1690_v5, %v146_v48  ;;  %v218_v11 = vadd.f32 %v1690_v5, %v147_v57  ;;  %v150_v13 = vmul.f32 %v1685_v4, %v79_v53  ;;  %v275_v16 = vmax.f32 %v211_v46, 0.0 }
  0x32   :  { %v280_v8 = vmax.f32 %v216_v56, 0.0  ;;  %v219_v18 = vadd.f32 %v1690_v5, %v148_v6  ;;  %v151_v21 = vmul.f32 %v1685_v4, %v80_v58  ;;  %v220_v24 = vadd.f32 %v1690_v5, %v149_v12 }
  0x33   :  { %v281_v17 = vmax.f32 %v217_v0, 0.0  ;;  %v282_v23 = vmax.f32 %v218_v11, 0.0  ;;  %v221_v25 = vadd.f32 %v1690_v5, %v150_v13  ;;  %v152_v26 = vmul.f32 %v1685_v4, %v81_v7 }
  0x34   :  { %v283_v10 = vmax.f32 %v219_v18, 0.0  ;;  %v222_v30 = vadd.f32 %v1690_v5, %v151_v21  ;;  %v153_v31 = vmul.f32 %v1685_v4, %v82_v15  ;;  %v284_v14 = vmax.f32 %v220_v24, 0.0 }
  0x35   :  { %1596 = vmatmul.mubr.msk.bf16.gmra.mrb[20].mxu0 %vm323_vm1, %v301_v37  ;;  %1616 = vmatmul.mubr.msk.bf16.gmra.mrb[8].mxu1 %vm323_vm1, %v311_v3  ;;  %v317_v27 = vpack.c.bf16 %v281_v17, %v280_v8  ;;  %v285_v32 = vmax.f32 %v221_v25, 0.0  ;;  %v223_v33 = vadd.f32 %v1690_v5, %v152_v26  ;;  %v154_v34 = vmul.f32 %v1685_v4, %v83_v22 }
  0x36   :  { %1599 = vmatprep.mubr.msk.bf16.mxu0 %vm323_vm1, %v302_v1  ;;  %1619 = vmatprep.mubr.msk.bf16.mxu1 %vm323_vm1, %v312_v44  ;;  %v257_v35 = vmax.f32 %v2010_v51, 0.0  ;;  %v318_v29 = vpack.c.bf16 %v283_v10, %v282_v23  ;;  %v286_v20 = vmax.f32 %v222_v30, 0.0  ;;  %v224_v36 = vadd.f32 %v1690_v5, %v153_v31 }
  0x37   :  { %v212_v60 = vadd.f32 %v1690_v5, %v141_v19  ;;  %v319_v37 = vpack.c.bf16 %v285_v32, %v284_v14  ;;  %v287_v1 = vmax.f32 %v223_v33, 0.0  ;;  %v225_v39 = vadd.f32 %v1690_v5, %v154_v34 }
  0x38   :  { %v313_v40 = vpack.c.bf16 %v273_v54, %v272_v9  ;;  %v213_v45 = vadd.f32 %v1690_v5, %v142_v47  ;;  %v214_v61 = vadd.f32 %v1690_v5, %v143_v55  ;;  %v288_v62 = vmax.f32 %v224_v36, 0.0 }
  0x39   :  { %v314_v4 = vpack.c.bf16 %v275_v16, %v274_v59  ;;  %v215_v51 = vadd.f32 %v1690_v5, %v144_v63  ;;  %v320_v2 = vpack.c.bf16 %v287_v1, %v286_v20  ;;  %v289_v3 = vmax.f32 %v225_v39, 0.0 }
  0x3a   :  { %v276_v9 = vmax.f32 %v212_v60, 0.0  ;;  %v277_v41 = vmax.f32 %v213_v45, 0.0  ;;  %v305_v42 = vpack.c.bf16 %v257_v35, %v256_v52  ;;  %v278_v43 = vmax.f32 %v214_v61, 0.0 }
  0x3b   :  { %v321_v19 = vpack.c.bf16 %v289_v3, %v288_v62 }
  0x3c   :  { %v315_v44 = vpack.c.bf16 %v277_v41, %v276_v9 }
  0x3d   :  { %1600 = vmatmul.mubr.msk.bf16.gmra.mrb[24].mxu0 %vm323_vm1, %v1996_v38  ;;  %1620 = vmatmul.mubr.msk.bf16.gmra.mrb[12].mxu1 %vm323_vm1, %v313_v40  ;;  %v279_v38 = vmax.f32 %v215_v51, 0.0 }
  0x3e   :  { %1603 = vmatprep.mubr.msk.bf16.mxu0 %vm323_vm1, %v2007_v50  ;;  %1623 = vmatprep.mubr.msk.bf16.mxu1 %vm323_vm1, %v314_v4 }
  0x3f   :  { %v316_v5 = vpack.c.bf16 %v279_v38, %v278_v43 }
  0x45   :  { %1604 = vmatmul.mubr.msk.bf16.gmra.mrb[28].mxu0 %vm323_vm1, %v305_v42  ;;  %1624 = vmatmul.mubr.msk.bf16.gmra.mrb[16].mxu1 %vm323_vm1, %v315_v44 }
  0x46   :  { %1627 = vmatprep.mubr.msk.bf16.mxu1 %vm323_vm1, %v316_v5 }
  0x4d   :  { %1628 = vmatmul.mubr.msk.bf16.gmra.mrb[20].mxu1 %vm323_vm1, %v317_v27 }
  0x4e   :  { %1631 = vmatprep.mubr.msk.bf16.mxu1 %vm323_vm1, %v318_v29 }
  0x55   :  { %1632 = vmatmul.mubr.msk.bf16.gmra.mrb[24].mxu1 %vm323_vm1, %v319_v37 }
  0x56   :  { %1635 = vmatprep.mubr.msk.bf16.mxu1 %vm323_vm1, %v320_v2 }
  0x5d   :  { %1636 = vmatmul.mubr.msk.bf16.gmra.mrb[28].mxu1 %vm323_vm1, %v321_v19 }
  0xe0   :  { %v1577_v28 = vpop.f32.mrb[0].mxu0 }
  0xe1   :  { %v1478_v50 = vpack.c.bf16 %v1577_v28, %v1577_v28  ;;  %v458_v52 = vpop.f32.mrb[1].mxu0  ;;  %v1170_v49 = vmul.f32 %v1577_v28, %v1577_v28  ;;  %v1038_v0 = vsel %vm1034_vm3, %v1577_v28, 0.0 }
  0xe2   :  { %v1476_v46 = vpack.c.bf16 %v458_v52, %v458_v52  ;;  %v1168_v47 = vmul.f32 %v458_v52, %v458_v52  ;;  %v1578_v48 = vpop.f32.mrb[2].mxu0  ;;  %v1035_v55 = vsel %vm1034_vm3, %v458_v52, 0.0 }
  0xe3   :  { %972 = vst.msk [vmem:[%s2717_s4 + $0x8] sm:$0xf] %vm969_vm2, %v1478_v50  ;;  %v1479_v53 = vpack.c.bf16 %v1578_v48, %v1578_v48  ;;  %v461_v54 = vpop.f32.mrb[3].mxu0  ;;  %v1171_v59 = vmul.f32 %v1578_v48, %v1578_v48  ;;  %v1235_v12 = vsel %vm1034_vm3, %v1170_v49, 0.0  ;;  %v1040_v15 = vsel %vm1034_vm3, %v1578_v48, 0.0 }
  0xe4   :  { %970 = vst.msk [vmem:[%s2717_s4] sm:$0xf] %vm969_vm2, %v1476_v46  ;;  %v1477_v56 = vpack.c.bf16 %v461_v54, %v461_v54  ;;  %v1036_v57 = vsel %vm1034_vm3, %v461_v54, 0.0  ;;  %v1169_v58 = vmul.f32 %v461_v54, %v461_v54  ;;  %v1232_v6 = vsel %vm1034_vm3, %v1168_v47, 0.0 }
  0xe5   :  { %973 = vst.msk [vmem:[%s2717_s4 + $0xc] sm:$0xf] %vm969_vm2, %v1479_v53  ;;  %v1037_v63 = vadd.f32 %v1036_v57, %v1035_v55  ;;  %v1237_v16 = vsel %vm1034_vm3, %v1171_v59, 0.0 }
  0xe6   :  { %971 = vst.msk [vmem:[%s2717_s4 + $0x4] sm:$0xf] %vm969_vm2, %v1477_v56  ;;  %v1233_v7 = vsel %vm1034_vm3, %v1169_v58, 0.0 }
  0xe7   :  { %v1039_v8 = vadd.f32 %v1038_v0, %v1037_v63  ;;  %v1234_v11 = vadd.f32 %v1233_v7, %v1232_v6 }
  0xe8   :  { %v1581_v13 = vpop.f32.mrb[4].mxu0 }
  0xe9   :  { %v1236_v17 = vadd.f32 %v1235_v12, %v1234_v11  ;;  %v1482_v18 = vpack.c.bf16 %v1581_v13, %v1581_v13  ;;  %v474_v21 = vpop.f32.mrb[5].mxu0  ;;  %v1041_v23 = vadd.f32 %v1040_v15, %v1039_v8  ;;  %v1174_v33 = vmul.f32 %v1581_v13, %v1581_v13 }
  0xea   :  { %v1480_v22 = vpack.c.bf16 %v474_v21, %v474_v21  ;;  %v1042_v24 = vsel %vm1034_vm3, %v474_v21, 0.0  ;;  %v1172_v25 = vmul.f32 %v474_v21, %v474_v21  ;;  %v1582_v26 = vpop.f32.mrb[6].mxu0  ;;  %v1046_v36 = vsel %vm1034_vm3, %v1581_v13, 0.0 }
  0xeb   :  { %976 = vst.msk [vmem:[%s2717_s4 + $0x18] sm:$0xf] %vm969_vm2, %v1482_v18  ;;  %v1238_v27 = vadd.f32 %v1237_v16, %v1236_v17  ;;  %v1483_v10 = vpack.c.bf16 %v1582_v26, %v1582_v26  ;;  %v477_v30 = vpop.f32.mrb[7].mxu0  ;;  %v1043_v31 = vadd.f32 %v1042_v24, %v1041_v23  ;;  %v1175_v60 = vmul.f32 %v1582_v26, %v1582_v26 }
  0xec   :  { %974 = vst.msk [vmem:[%s2717_s4 + $0x10] sm:$0xf] %vm969_vm2, %v1480_v22  ;;  %v1239_v14 = vsel %vm1034_vm3, %v1172_v25, 0.0  ;;  %v1481_v32 = vpack.c.bf16 %v477_v30, %v477_v30  ;;  %v1044_v35 = vsel %vm1034_vm3, %v477_v30, 0.0  ;;  %v1173_v29 = vmul.f32 %v477_v30, %v477_v30 }
  0xed   :  { %v1240_v34 = vadd.f32 %v1239_v14, %v1238_v27  ;;  %977 = vst.msk [vmem:[%s2717_s4 + $0x1c] sm:$0xf] %vm969_vm2, %v1483_v10  ;;  %v1045_v20 = vadd.f32 %v1044_v35, %v1043_v31  ;;  %v1243_v45 = vsel %vm1034_vm3, %v1174_v33, 0.0  ;;  %v1048_v61 = vsel %vm1034_vm3, %v1582_v26, 0.0 }
  0xee   :  { %975 = vst.msk [vmem:[%s2717_s4 + $0x14] sm:$0xf] %vm969_vm2, %v1481_v32  ;;  %v1241_v37 = vsel %vm1034_vm3, %v1173_v29, 0.0  ;;  %v1245_v41 = vsel %vm1034_vm3, %v1175_v60, 0.0 }
  0xef   :  { %v1047_v1 = vadd.f32 %v1046_v36, %v1045_v20  ;;  %v1242_v39 = vadd.f32 %v1241_v37, %v1240_v34 }
  0xf0   :  { %v1585_v40 = vpop.f32.mrb[8].mxu0 }
  0xf1   :  { %v1486_v62 = vpack.c.bf16 %v1585_v40, %v1585_v40  ;;  %v490_v4 = vpop.f32.mrb[9].mxu0  ;;  %v1244_v51 = vadd.f32 %v1243_v45, %v1242_v39  ;;  %v1049_v3 = vadd.f32 %v1048_v61, %v1047_v1  ;;  %v1178_v50 = vmul.f32 %v1585_v40, %v1585_v40 }
  0xf2   :  { %v1484_v2 = vpack.c.bf16 %v490_v4, %v490_v4  ;;  %v1050_v19 = vsel %vm1034_vm3, %v490_v4, 0.0  ;;  %v1586_v9 = vpop.f32.mrb[10].mxu0  ;;  %v1176_v42 = vmul.f32 %v490_v4, %v490_v4  ;;  %v1054_v53 = vsel %vm1034_vm3, %v1585_v40, 0.0 }
  0xf3   :  { %980 = vst.msk [vmem:[%s2717_s4 + $0x28] sm:$0xf] %vm969_vm2, %v1486_v62  ;;  %v1487_v43 = vpack.c.bf16 %v1586_v9, %v1586_v9  ;;  %v493_v38 = vpop.f32.mrb[11].mxu0  ;;  %v1051_v44 = vadd.f32 %v1050_v19, %v1049_v3  ;;  %v1246_v5 = vadd.f32 %v1245_v41, %v1244_v51  ;;  %v1179_v54 = vmul.f32 %v1586_v9, %v1586_v9 }
  0xf4   :  { %978 = vst.msk [vmem:[%s2717_s4 + $0x20] sm:$0xf] %vm969_vm2, %v1484_v2  ;;  %v1485_v28 = vpack.c.bf16 %v493_v38, %v493_v38  ;;  %v1247_v52 = vsel %vm1034_vm3, %v1176_v42, 0.0  ;;  %v1052_v46 = vsel %vm1034_vm3, %v493_v38, 0.0  ;;  %v1177_v47 = vmul.f32 %v493_v38, %v493_v38 }
  0xf5   :  { %981 = vst.msk [vmem:[%s2717_s4 + $0x2c] sm:$0xf] %vm969_vm2, %v1487_v43  ;;  %v1248_v48 = vadd.f32 %v1247_v52, %v1246_v5  ;;  %v1053_v49 = vadd.f32 %v1052_v46, %v1051_v44  ;;  %v1251_v59 = vsel %vm1034_vm3, %v1178_v50, 0.0  ;;  %v1056_v63 = vsel %vm1034_vm3, %v1586_v9, 0.0 }
  0xf6   :  { %979 = vst.msk [vmem:[%s2717_s4 + $0x24] sm:$0xf] %vm969_vm2, %v1485_v28  ;;  %v1249_v55 = vsel %vm1034_vm3, %v1177_v47, 0.0  ;;  %v1253_v15 = vsel %vm1034_vm3, %v1179_v54, 0.0 }
  0xf7   :  { %v1055_v56 = vadd.f32 %v1054_v53, %v1053_v49  ;;  %v1250_v57 = vadd.f32 %v1249_v55, %v1248_v48 }
  0xf8   :  { %v1589_v58 = vpop.f32.mrb[12].mxu0  ;;  %v2178_v21 = vpop.f32.mrb[0].mxu1 }
  0xf9   :  { %v1490_v0 = vpack.c.bf16 %v1589_v58, %v1589_v58  ;;  %v506_v6 = vpop.f32.mrb[13].mxu0  ;;  %v1252_v7 = vadd.f32 %v1251_v59, %v1250_v57  ;;  %v1057_v11 = vadd.f32 %v1056_v63, %v1055_v56  ;;  %v1182_v22 = vmul.f32 %v1589_v58, %v1589_v58  ;;  %v2184_v26 = vpop.f32.mrb[1].mxu1 }
  0xfa   :  { %v1488_v8 = vpack.c.bf16 %v506_v6, %v506_v6  ;;  %v1058_v12 = vsel %vm1034_vm3, %v506_v6, 0.0  ;;  %v1590_v13 = vpop.f32.mrb[14].mxu0  ;;  %v1180_v16 = vmul.f32 %v506_v6, %v506_v6  ;;  %v1510_v31 = vpack.c.bf16 %v2178_v21, %v2178_v21  ;;  %v2194_v14 = vpop.f32.mrb[2].mxu1 }
  0xfb   :  { %984 = vst.msk [vmem:[%s2717_s4 + $0x38] sm:$0xf] %vm969_vm2, %v1490_v0  ;;  %v1491_v17 = vpack.c.bf16 %v1590_v13, %v1590_v13  ;;  %v509_v18 = vpop.f32.mrb[15].mxu0  ;;  %v1059_v23 = vadd.f32 %v1058_v12, %v1057_v11  ;;  %v1254_v24 = vadd.f32 %v1253_v15, %v1252_v7  ;;  %v2200_v34 = vpop.f32.mrb[3].mxu1  ;;  %v1062_v35 = vsel %vm1034_vm3, %v1589_v58, 0.0 }
  0xfc   :  { %982 = vst.msk [vmem:[%s2717_s4 + $0x30] sm:$0xf] %vm969_vm2, %v1488_v8  ;;  %v1489_v25 = vpack.c.bf16 %v509_v18, %v509_v18  ;;  %v1255_v27 = vsel %vm1034_vm3, %v1180_v16, 0.0  ;;  %v1060_v10 = vsel %vm1034_vm3, %v509_v18, 0.0  ;;  %v1181_v30 = vmul.f32 %v509_v18, %v509_v18  ;;  %1004 = vst.msk [vmem:[%s2717_s4 + $0x88] sm:$0xf] %vm969_vm2, %v1510_v31 }
  0xfd   :  { %985 = vst.msk [vmem:[%s2717_s4 + $0x3c] sm:$0xf] %vm969_vm2, %v1491_v17  ;;  %v1256_v32 = vadd.f32 %v1255_v27, %v1254_v24  ;;  %v1061_v33 = vadd.f32 %v1060_v10, %v1059_v23  ;;  %v1183_v29 = vmul.f32 %v1590_v13, %v1590_v13  ;;  %v1508_v36 = vpack.c.bf16 %v2184_v26, %v2184_v26 }
  0xfe   :  { %983 = vst.msk [vmem:[%s2717_s4 + $0x34] sm:$0xf] %vm969_vm2, %v1489_v25  ;;  %v1257_v20 = vsel %vm1034_vm3, %v1181_v30, 0.0  ;;  %v1511_v39 = vpack.c.bf16 %v2194_v14, %v2194_v14  ;;  %v1259_v40 = vsel %vm1034_vm3, %v1182_v22, 0.0  ;;  %v1064_v45 = vsel %vm1034_vm3, %v1590_v13, 0.0 }
  0xff   :  { %v1063_v60 = vadd.f32 %v1062_v35, %v1061_v33  ;;  %v1258_v37 = vadd.f32 %v1257_v20, %v1256_v32  ;;  %1002 = vst.msk [vmem:[%s2717_s4 + $0x80] sm:$0xf] %vm969_vm2, %v1508_v36  ;;  %v1261_v9 = vsel %vm1034_vm3, %v1183_v29, 0.0  ;;  %v1509_v59 = vpack.c.bf16 %v2200_v34, %v2200_v34 }
 0x100   :  { %v1593_v1 = vpop.f32.mrb[16].mxu0  ;;  %1005 = vst.msk [vmem:[%s2717_s4 + $0x8c] sm:$0xf] %vm969_vm2, %v1511_v39  ;;  %v2228_v38 = vpop.f32.mrb[4].mxu1 }
 0x101   :  { %v1494_v61 = vpack.c.bf16 %v1593_v1, %v1593_v1  ;;  %v522_v62 = vpop.f32.mrb[17].mxu0  ;;  %v1260_v4 = vadd.f32 %v1259_v40, %v1258_v37  ;;  %v1065_v2 = vadd.f32 %v1064_v45, %v1063_v60  ;;  %v2234_v50 = vpop.f32.mrb[5].mxu1  ;;  %v1186_v52 = vmul.f32 %v1593_v1, %v1593_v1  ;;  %1003 = vst.msk [vmem:[%s2717_s4 + $0x84] sm:$0xf] %vm969_vm2, %v1509_v59 }
 0x102   :  { %v1492_v51 = vpack.c.bf16 %v522_v62, %v522_v62  ;;  %v1066_v3 = vsel %vm1034_vm3, %v522_v62, 0.0  ;;  %v1594_v19 = vpop.f32.mrb[18].mxu0  ;;  %v1184_v41 = vmul.f32 %v522_v62, %v522_v62  ;;  %v2242_v49 = vpop.f32.mrb[6].mxu1  ;;  %v1070_v56 = vsel %vm1034_vm3, %v1593_v1, 0.0 }
 0x103   :  { %988 = vst.msk [vmem:[%s2717_s4 + $0x48] sm:$0xf] %vm969_vm2, %v1494_v61  ;;  %v1495_v42 = vpack.c.bf16 %v1594_v19, %v1594_v19  ;;  %v525_v43 = vpop.f32.mrb[19].mxu0  ;;  %v1067_v44 = vadd.f32 %v1066_v3, %v1065_v2  ;;  %v1262_v5 = vadd.f32 %v1261_v9, %v1260_v4  ;;  %v2248_v55 = vpop.f32.mrb[7].mxu1  ;;  %v1187_v57 = vmul.f32 %v1594_v19, %v1594_v19 }
 0x104   :  { %986 = vst.msk [vmem:[%s2717_s4 + $0x40] sm:$0xf] %vm969_vm2, %v1492_v51  ;;  %v1493_v28 = vpack.c.bf16 %v525_v43, %v525_v43  ;;  %v1263_v46 = vsel %vm1034_vm3, %v1184_v41, 0.0  ;;  %v1068_v47 = vsel %vm1034_vm3, %v525_v43, 0.0  ;;  %v1185_v48 = vmul.f32 %v525_v43, %v525_v43 }
 0x105   :  { %989 = vst.msk [vmem:[%s2717_s4 + $0x4c] sm:$0xf] %vm969_vm2, %v1495_v42  ;;  %v1264_v53 = vadd.f32 %v1263_v46, %v1262_v5  ;;  %v1069_v54 = vadd.f32 %v1068_v47, %v1067_v44  ;;  %v1514_v7 = vpack.c.bf16 %v2228_v38, %v2228_v38  ;;  %v1267_v8 = vsel %vm1034_vm3, %v1186_v52, 0.0 }
 0x106   :  { %987 = vst.msk [vmem:[%s2717_s4 + $0x44] sm:$0xf] %vm969_vm2, %v1493_v28  ;;  %v1265_v58 = vsel %vm1034_vm3, %v1185_v48, 0.0  ;;  %v1072_v11 = vsel %vm1034_vm3, %v1594_v19, 0.0  ;;  %v1269_v23 = vsel %vm1034_vm3, %v1187_v57, 0.0  ;;  %v1512_v62 = vpack.c.bf16 %v2234_v50, %v2234_v50 }
 0x107   :  { %v1071_v63 = vadd.f32 %v1070_v56, %v1069_v54  ;;  %v1266_v0 = vadd.f32 %v1265_v58, %v1264_v53  ;;  %1008 = vst.msk [vmem:[%s2717_s4 + $0x98] sm:$0xf] %vm969_vm2, %v1514_v7  ;;  %v1515_v3 = vpack.c.bf16 %v2242_v49, %v2242_v49 }
 0x108   :  { %v1597_v6 = vpop.f32.mrb[20].mxu0  ;;  %v2272_v10 = vpop.f32.mrb[8].mxu1  ;;  %1006 = vst.msk [vmem:[%s2717_s4 + $0x90] sm:$0xf] %vm969_vm2, %v1512_v62 }
 0x109   :  { %v1498_v12 = vpack.c.bf16 %v1597_v6, %v1597_v6  ;;  %v538_v13 = vpop.f32.mrb[21].mxu0  ;;  %v1268_v15 = vadd.f32 %v1267_v8, %v1266_v0  ;;  %v1073_v17 = vadd.f32 %v1072_v11, %v1071_v63  ;;  %v2278_v33 = vpop.f32.mrb[9].mxu1  ;;  %v1190_v35 = vmul.f32 %v1597_v6, %v1597_v6  ;;  %1009 = vst.msk [vmem:[%s2717_s4 + $0x9c] sm:$0xf] %vm969_vm2, %v1515_v3 }
 0x10a   :  { %v1496_v16 = vpack.c.bf16 %v538_v13, %v538_v13  ;;  %v1074_v18 = vsel %vm1034_vm3, %v538_v13, 0.0  ;;  %v1598_v22 = vpop.f32.mrb[22].mxu0  ;;  %v1188_v24 = vmul.f32 %v538_v13, %v538_v13  ;;  %v2286_v60 = vpop.f32.mrb[10].mxu1  ;;  %v1078_v40 = vsel %vm1034_vm3, %v1597_v6, 0.0 }
 0x10b   :  { %992 = vst.msk [vmem:[%s2717_s4 + $0x58] sm:$0xf] %vm969_vm2, %v1498_v12  ;;  %v1499_v25 = vpack.c.bf16 %v1598_v22, %v1598_v22  ;;  %v541_v27 = vpop.f32.mrb[23].mxu0  ;;  %v1075_v30 = vadd.f32 %v1074_v18, %v1073_v17  ;;  %v1270_v31 = vadd.f32 %v1269_v23, %v1268_v15  ;;  %v2292_v39 = vpop.f32.mrb[11].mxu1  ;;  %v1191_v45 = vmul.f32 %v1598_v22, %v1598_v22 }
 0x10c   :  { %990 = vst.msk [vmem:[%s2717_s4 + $0x50] sm:$0xf] %vm969_vm2, %v1496_v16  ;;  %v1497_v32 = vpack.c.bf16 %v541_v27, %v541_v27  ;;  %v1271_v29 = vsel %vm1034_vm3, %v1188_v24, 0.0  ;;  %v1076_v20 = vsel %vm1034_vm3, %v541_v27, 0.0  ;;  %v1189_v36 = vmul.f32 %v541_v27, %v541_v27 }
 0x10d   :  { %993 = vst.msk [vmem:[%s2717_s4 + $0x5c] sm:$0xf] %vm969_vm2, %v1499_v25  ;;  %v1272_v37 = vadd.f32 %v1271_v29, %v1270_v31  ;;  %v1077_v1 = vadd.f32 %v1076_v20, %v1075_v30  ;;  %v1275_v19 = vsel %vm1034_vm3, %v1190_v35, 0.0  ;;  %v1080_v9 = vsel %vm1034_vm3, %v1598_v22, 0.0 }
 0x10e   :  { %991 = vst.msk [vmem:[%s2717_s4 + $0x54] sm:$0xf] %vm969_vm2, %v1497_v32  ;;  %v1273_v61 = vsel %vm1034_vm3, %v1189_v36, 0.0  ;;  %v1277_v46 = vsel %vm1034_vm3, %v1191_v45, 0.0  ;;  %v1513_v18 = vpack.c.bf16 %v2248_v55, %v2248_v55  ;;  %v1518_v25 = vpack.c.bf16 %v2272_v10, %v2272_v10 }
 0x10f   :  { %v1079_v4 = vadd.f32 %v1078_v40, %v1077_v1  ;;  %v1274_v51 = vadd.f32 %v1273_v61, %v1272_v37 }
 0x110   :  { %v1601_v2 = vpop.f32.mrb[24].mxu0  ;;  %v2316_v54 = vpop.f32.mrb[12].mxu1  ;;  %1007 = vst.msk [vmem:[%s2717_s4 + $0x94] sm:$0xf] %vm969_vm2, %v1513_v18  ;;  %1012 = vst.msk [vmem:[%s2717_s4 + $0xa8] sm:$0xf] %vm969_vm2, %v1518_v25 }
 0x111   :  { %v1502_v41 = vpack.c.bf16 %v1601_v2, %v1601_v2  ;;  %v554_v42 = vpop.f32.mrb[25].mxu0  ;;  %v1276_v43 = vadd.f32 %v1275_v19, %v1274_v51  ;;  %v1081_v5 = vadd.f32 %v1080_v9, %v1079_v4  ;;  %v2322_v59 = vpop.f32.mrb[13].mxu1  ;;  %v1194_v63 = vmul.f32 %v1601_v2, %v1601_v2 }
 0x112   :  { %v1500_v44 = vpack.c.bf16 %v554_v42, %v554_v42  ;;  %v1082_v28 = vsel %vm1034_vm3, %v554_v42, 0.0  ;;  %v1602_v52 = vpop.f32.mrb[26].mxu0  ;;  %v1192_v47 = vmul.f32 %v554_v42, %v554_v42  ;;  %v2330_v8 = vpop.f32.mrb[14].mxu1  ;;  %v1086_v15 = vsel %vm1034_vm3, %v1601_v2, 0.0 }
 0x113   :  { %996 = vst.msk [vmem:[%s2717_s4 + $0x68] sm:$0xf] %vm969_vm2, %v1502_v41  ;;  %v1503_v48 = vpack.c.bf16 %v1602_v52, %v1602_v52  ;;  %v557_v53 = vpop.f32.mrb[27].mxu0  ;;  %v1083_v56 = vadd.f32 %v1082_v28, %v1081_v5  ;;  %v1278_v57 = vadd.f32 %v1277_v46, %v1276_v43  ;;  %v2336_v13 = vpop.f32.mrb[15].mxu1  ;;  %v1195_v16 = vmul.f32 %v1602_v52, %v1602_v52 }
 0x114   :  { %994 = vst.msk [vmem:[%s2717_s4 + $0x60] sm:$0xf] %vm969_vm2, %v1500_v44  ;;  %v1501_v58 = vpack.c.bf16 %v557_v53, %v557_v53  ;;  %v1279_v0 = vsel %vm1034_vm3, %v1192_v47, 0.0  ;;  %v1084_v6 = vsel %vm1034_vm3, %v557_v53, 0.0  ;;  %v1193_v7 = vmul.f32 %v557_v53, %v557_v53 }
 0x115   :  { %997 = vst.msk [vmem:[%s2717_s4 + $0x6c] sm:$0xf] %vm969_vm2, %v1503_v48  ;;  %v1280_v11 = vadd.f32 %v1279_v0, %v1278_v57  ;;  %v1085_v12 = vadd.f32 %v1084_v6, %v1083_v56  ;;  %v1283_v27 = vsel %vm1034_vm3, %v1194_v63, 0.0  ;;  %v1088_v30 = vsel %vm1034_vm3, %v1602_v52, 0.0 }
 0x116   :  { %995 = vst.msk [vmem:[%s2717_s4 + $0x64] sm:$0xf] %vm969_vm2, %v1501_v58  ;;  %v1281_v17 = vsel %vm1034_vm3, %v1193_v7, 0.0  ;;  %v1285_v1 = vsel %vm1034_vm3, %v1195_v16, 0.0  ;;  %v1200_v28 = vmul.f32 %v2184_v26, %v2184_v26  ;;  %v1516_v53 = vpack.c.bf16 %v2278_v33, %v2278_v33 }
 0x117   :  { %v1087_v22 = vadd.f32 %v1086_v15, %v1085_v12  ;;  %v1282_v23 = vadd.f32 %v1281_v17, %v1280_v11  ;;  %v1519_v58 = vpack.c.bf16 %v2286_v60, %v2286_v60  ;;  %v1098_v6 = vsel %vm1034_vm3, %v2184_v26, 0.0 }
 0x118   :  { %v1605_v24 = vpop.f32.mrb[28].mxu0  ;;  %v2360_v62 = vpop.f32.mrb[16].mxu1  ;;  %1010 = vst.msk [vmem:[%s2717_s4 + $0xa0] sm:$0xf] %vm969_vm2, %v1516_v53  ;;  %v1517_v7 = vpack.c.bf16 %v2292_v39, %v2292_v39  ;;  %v1295_v16 = vsel %vm1034_vm3, %v1200_v28, 0.0  ;;  %v1201_v26 = vmul.f32 %v2200_v34, %v2200_v34  ;;  %v1522_v17 = vpack.c.bf16 %v2316_v54, %v2316_v54 }
 0x119   :  { %v1506_v31 = vpack.c.bf16 %v1605_v24, %v1605_v24  ;;  %v570_v32 = vpop.f32.mrb[29].mxu0  ;;  %v1284_v35 = vadd.f32 %v1283_v27, %v1282_v23  ;;  %v1089_v20 = vadd.f32 %v1088_v30, %v1087_v22  ;;  %v2366_v3 = vpop.f32.mrb[17].mxu1  ;;  %v1198_v19 = vmul.f32 %v1605_v24, %v1605_v24  ;;  %1013 = vst.msk [vmem:[%s2717_s4 + $0xac] sm:$0xf] %vm969_vm2, %v1519_v58 }
 0x11a   :  { %v1504_v29 = vpack.c.bf16 %v570_v32, %v570_v32  ;;  %v1090_v36 = vsel %vm1034_vm3, %v570_v32, 0.0  ;;  %v1606_v37 = vpop.f32.mrb[30].mxu0  ;;  %v1196_v40 = vmul.f32 %v570_v32, %v570_v32  ;;  %v2374_v43 = vpop.f32.mrb[18].mxu1  ;;  %v1094_v46 = vsel %vm1034_vm3, %v1605_v24, 0.0  ;;  %1011 = vst.msk [vmem:[%s2717_s4 + $0xa4] sm:$0xf] %vm969_vm2, %v1517_v7 }
 0x11b   :  { %1000 = vst.msk [vmem:[%s2717_s4 + $0x78] sm:$0xf] %vm969_vm2, %v1506_v31  ;;  %v1507_v45 = vpack.c.bf16 %v1606_v37, %v1606_v37  ;;  %v573_v61 = vpop.f32.mrb[31].mxu0  ;;  %v1091_v4 = vadd.f32 %v1090_v36, %v1089_v20  ;;  %v1286_v51 = vadd.f32 %v1285_v1, %v1284_v35  ;;  %v2382_v52 = vpop.f32.mrb[19].mxu1  ;;  %v1199_v47 = vmul.f32 %v1606_v37, %v1606_v37 }
 0x11c   :  { %998 = vst.msk [vmem:[%s2717_s4 + $0x70] sm:$0xf] %vm969_vm2, %v1504_v29  ;;  %v1505_v2 = vpack.c.bf16 %v573_v61, %v573_v61  ;;  %v1287_v9 = vsel %vm1034_vm3, %v1196_v40, 0.0  ;;  %v1092_v41 = vsel %vm1034_vm3, %v573_v61, 0.0  ;;  %v1197_v42 = vmul.f32 %v573_v61, %v573_v61  ;;  %1016 = vst.msk [vmem:[%s2717_s4 + $0xb8] sm:$0xf] %vm969_vm2, %v1522_v17 }
 0x11d   :  { %1001 = vst.msk [vmem:[%s2717_s4 + $0x7c] sm:$0xf] %vm969_vm2, %v1507_v45  ;;  %v1288_v44 = vadd.f32 %v1287_v9, %v1286_v51  ;;  %v1093_v5 = vadd.f32 %v1092_v41, %v1091_v4  ;;  %v1291_v63 = vsel %vm1034_vm3, %v1198_v19, 0.0  ;;  %v1096_v0 = vsel %vm1034_vm3, %v1606_v37, 0.0 }
 0x11e   :  { %999 = vst.msk [vmem:[%s2717_s4 + $0x74] sm:$0xf] %vm969_vm2, %v1505_v2  ;;  %v1289_v48 = vsel %vm1034_vm3, %v1197_v42, 0.0  ;;  %v1293_v15 = vsel %vm1034_vm3, %v1199_v47, 0.0  ;;  %v1520_v24 = vpack.c.bf16 %v2322_v59, %v2322_v59  ;;  %v1202_v27 = vmul.f32 %v2178_v21, %v2178_v21 }
 0x11f   :  { %v1095_v56 = vadd.f32 %v1094_v46, %v1093_v5  ;;  %v1290_v57 = vadd.f32 %v1289_v48, %v1288_v44  ;;  %v1100_v30 = vsel %vm1034_vm3, %v2200_v34, 0.0  ;;  %v1523_v31 = vpack.c.bf16 %v2330_v8, %v2330_v8 }
 0x120   :  { %v2414_v18 = vpop.f32.mrb[20].mxu1  ;;  %v1102_v35 = vsel %vm1034_vm3, %v2178_v21, 0.0  ;;  %1014 = vst.msk [vmem:[%s2717_s4 + $0xb0] sm:$0xf] %vm969_vm2, %v1520_v24  ;;  %v1203_v36 = vmul.f32 %v2194_v14, %v2194_v14  ;;  %v1297_v37 = vsel %vm1034_vm3, %v1201_v26, 0.0  ;;  %v1204_v1 = vmul.f32 %v2234_v50, %v2234_v50 }
 0x121   :  { %v1292_v11 = vadd.f32 %v1291_v63, %v1290_v57  ;;  %v1097_v12 = vadd.f32 %v1096_v0, %v1095_v56  ;;  %v2418_v25 = vpop.f32.mrb[21].mxu1  ;;  %1017 = vst.msk [vmem:[%s2717_s4 + $0xbc] sm:$0xf] %vm969_vm2, %v1523_v31  ;;  %v1521_v21 = vpack.c.bf16 %v2336_v13, %v2336_v13  ;;  %v1526_v61 = vpack.c.bf16 %v2360_v62, %v2360_v62 }
 0x122   :  { %v2430_v32 = vpop.f32.mrb[22].mxu1  ;;  %v1299_v4 = vsel %vm1034_vm3, %v1202_v27, 0.0  ;;  %v1104_v51 = vsel %vm1034_vm3, %v2194_v14, 0.0  ;;  %v1106_v2 = vsel %vm1034_vm3, %v2234_v50, 0.0  ;;  %v1524_v19 = vpack.c.bf16 %v2366_v3, %v2366_v3 }
 0x123   :  { %v1099_v22 = vadd.f32 %v1098_v6, %v1097_v12  ;;  %v1294_v23 = vadd.f32 %v1293_v15, %v1292_v11  ;;  %v2438_v34 = vpop.f32.mrb[23].mxu1  ;;  %1015 = vst.msk [vmem:[%s2717_s4 + $0xb4] sm:$0xf] %vm969_vm2, %v1521_v21  ;;  %1020 = vst.msk [vmem:[%s2717_s4 + $0xc8] sm:$0xf] %vm969_vm2, %v1526_v61  ;;  %v1301_v14 = vsel %vm1034_vm3, %v1203_v36, 0.0  ;;  %v1205_v50 = vmul.f32 %v2248_v55, %v2248_v55 }
 0x124   :  { %v1303_v42 = vsel %vm1034_vm3, %v1204_v1, 0.0  ;;  %1018 = vst.msk [vmem:[%s2717_s4 + $0xc0] sm:$0xf] %vm969_vm2, %v1524_v19  ;;  %v1527_v44 = vpack.c.bf16 %v2374_v43, %v2374_v43  ;;  %v1525_v47 = vpack.c.bf16 %v2382_v52, %v2382_v52  ;;  %v1206_v53 = vmul.f32 %v2228_v38, %v2228_v38 }
 0x125   :  { %v1296_v29 = vadd.f32 %v1295_v16, %v1294_v23  ;;  %v1101_v20 = vadd.f32 %v1100_v30, %v1099_v22  ;;  %v1108_v56 = vsel %vm1034_vm3, %v2248_v55, 0.0  ;;  %v1530_v57 = vpack.c.bf16 %v2414_v18, %v2414_v18 }
 0x126   :  { %1021 = vst.msk [vmem:[%s2717_s4 + $0xcc] sm:$0xf] %vm969_vm2, %v1527_v44  ;;  %v1110_v63 = vsel %vm1034_vm3, %v2228_v38, 0.0  ;;  %1019 = vst.msk [vmem:[%s2717_s4 + $0xc4] sm:$0xf] %vm969_vm2, %v1525_v47  ;;  %v1207_v7 = vmul.f32 %v2242_v49, %v2242_v49  ;;  %v1305_v11 = vsel %vm1034_vm3, %v1205_v50, 0.0  ;;  %v1208_v12 = vmul.f32 %v2278_v33, %v2278_v33 }
 0x127   :  { %v1103_v40 = vadd.f32 %v1102_v35, %v1101_v20  ;;  %v1298_v45 = vadd.f32 %v1297_v37, %v1296_v29  ;;  %1024 = vst.msk [vmem:[%s2717_s4 + $0xd8] sm:$0xf] %vm969_vm2, %v1530_v57  ;;  %v1528_v38 = vpack.c.bf16 %v2418_v25, %v2418_v25  ;;  %v1531_v26 = vpack.c.bf16 %v2430_v32, %v2430_v32 }
 0x128   :  { %v2478_v5 = vpop.f32.mrb[24].mxu1  ;;  %v1307_v17 = vsel %vm1034_vm3, %v1206_v53, 0.0  ;;  %v1112_v22 = vsel %vm1034_vm3, %v2242_v49, 0.0  ;;  %v1114_v23 = vsel %vm1034_vm3, %v2278_v33, 0.0  ;;  %v1529_v24 = vpack.c.bf16 %v2438_v34, %v2438_v34 }
 0x129   :  { %v1300_v9 = vadd.f32 %v1299_v4, %v1298_v45  ;;  %v1105_v41 = vadd.f32 %v1104_v51, %v1103_v40  ;;  %v2482_v48 = vpop.f32.mrb[25].mxu1  ;;  %1022 = vst.msk [vmem:[%s2717_s4 + $0xd0] sm:$0xf] %vm969_vm2, %v1528_v38  ;;  %1025 = vst.msk [vmem:[%s2717_s4 + $0xdc] sm:$0xf] %vm969_vm2, %v1531_v26  ;;  %v1309_v49 = vsel %vm1034_vm3, %v1207_v7, 0.0  ;;  %v1209_v33 = vmul.f32 %v2292_v39, %v2292_v39 }
 0x12a   :  { %v2494_v58 = vpop.f32.mrb[26].mxu1  ;;  %v1311_v31 = vsel %vm1034_vm3, %v1208_v12, 0.0  ;;  %1023 = vst.msk [vmem:[%s2717_s4 + $0xd4] sm:$0xf] %vm969_vm2, %v1529_v24  ;;  %v1534_v35 = vpack.c.bf16 %v2478_v5, %v2478_v5  ;;  %v1532_v37 = vpack.c.bf16 %v2482_v48, %v2482_v48  ;;  %v1210_v21 = vmul.f32 %v2272_v10, %v2272_v10 }
 0x12b   :  { %v1107_v28 = vadd.f32 %v1106_v2, %v1105_v41  ;;  %v1302_v46 = vadd.f32 %v1301_v14, %v1300_v9  ;;  %v2502_v55 = vpop.f32.mrb[27].mxu1  ;;  %v1116_v40 = vsel %vm1034_vm3, %v2292_v39, 0.0  ;;  %v1535_v45 = vpack.c.bf16 %v2494_v58, %v2494_v58 }
 0x12c   :  { %1028 = vst.msk [vmem:[%s2717_s4 + $0xe8] sm:$0xf] %vm969_vm2, %v1534_v35  ;;  %v1118_v4 = vsel %vm1034_vm3, %v2272_v10, 0.0  ;;  %1026 = vst.msk [vmem:[%s2717_s4 + $0xe0] sm:$0xf] %vm969_vm2, %v1532_v37  ;;  %v1211_v19 = vmul.f32 %v2286_v60, %v2286_v60  ;;  %v1313_v9 = vsel %vm1034_vm3, %v1209_v33, 0.0  ;;  %v1212_v41 = vmul.f32 %v2322_v59, %v2322_v59 }
 0x12d   :  { %v1304_v0 = vadd.f32 %v1303_v42, %v1302_v46  ;;  %v1109_v6 = vadd.f32 %v1108_v56, %v1107_v28  ;;  %1029 = vst.msk [vmem:[%s2717_s4 + $0xec] sm:$0xf] %vm969_vm2, %v1535_v45  ;;  %v1533_v10 = vpack.c.bf16 %v2502_v55, %v2502_v55  ;;  %v1315_v44 = vsel %vm1034_vm3, %v1210_v21, 0.0 }
 0x12e   :  { %v1120_v28 = vsel %vm1034_vm3, %v2286_v60, 0.0  ;;  %v1122_v46 = vsel %vm1034_vm3, %v2322_v59, 0.0  ;;  %v1317_v60 = vsel %vm1034_vm3, %v1211_v19, 0.0  ;;  %v1319_v57 = vsel %vm1034_vm3, %v1212_v41, 0.0 }
 0x12f   :  { %v1111_v15 = vadd.f32 %v1110_v63, %v1109_v6  ;;  %v1306_v16 = vadd.f32 %v1305_v11, %v1304_v0  ;;  %1027 = vst.msk [vmem:[%s2717_s4 + $0xe4] sm:$0xf] %vm969_vm2, %v1533_v10  ;;  %v1213_v59 = vmul.f32 %v2336_v13, %v2336_v13  ;;  %v1214_v11 = vmul.f32 %v2316_v54, %v2316_v54 }
 0x130   :  { %v2542_v29 = vpop.f32.mrb[28].mxu1  ;;  %v1124_v12 = vsel %vm1034_vm3, %v2336_v13, 0.0  ;;  %v1215_v26 = vmul.f32 %v2330_v8, %v2330_v8  ;;  %v1217_v35 = vmul.f32 %v2382_v52, %v2382_v52  ;;  %v1218_v37 = vmul.f32 %v2360_v62, %v2360_v62 }
 0x131   :  { %v1308_v27 = vadd.f32 %v1307_v17, %v1306_v16  ;;  %v1113_v30 = vadd.f32 %v1112_v22, %v1111_v15  ;;  %v2546_v1 = vpop.f32.mrb[29].mxu1  ;;  %v1538_v50 = vpack.c.bf16 %v2542_v29, %v2542_v29  ;;  %v1126_v16 = vsel %vm1034_vm3, %v2316_v54, 0.0 }
 0x132   :  { %v2558_v61 = vpop.f32.mrb[30].mxu1  ;;  %v1536_v47 = vpack.c.bf16 %v2546_v1, %v2546_v1  ;;  %v1321_v13 = vsel %vm1034_vm3, %v1213_v59, 0.0  ;;  %v1216_v17 = vmul.f32 %v2366_v3, %v2366_v3  ;;  %v1323_v24 = vsel %vm1034_vm3, %v1214_v11, 0.0 }
 0x133   :  { %v1115_v20 = vadd.f32 %v1114_v23, %v1113_v30  ;;  %v1310_v36 = vadd.f32 %v1309_v49, %v1308_v27  ;;  %v2566_v39 = vpop.f32.mrb[31].mxu1  ;;  %1032 = vst.msk [vmem:[%s2717_s4 + $0xf8] sm:$0xf] %vm969_vm2, %v1538_v50  ;;  %v1539_v63 = vpack.c.bf16 %v2558_v61, %v2558_v61  ;;  %v1128_v27 = vsel %vm1034_vm3, %v2330_v8, 0.0 }
 0x134   :  { %1030 = vst.msk [vmem:[%s2717_s4 + $0xf0] sm:$0xf] %vm969_vm2, %v1536_v47  ;;  %v1537_v7 = vpack.c.bf16 %v2566_v39, %v2566_v39  ;;  %v1130_v30 = vsel %vm1034_vm3, %v2366_v3, 0.0  ;;  %v1327_v33 = vsel %vm1034_vm3, %v1216_v17, 0.0  ;;  %v1132_v8 = vsel %vm1034_vm3, %v2382_v52, 0.0 }
 0x135   :  { %v1312_v51 = vadd.f32 %v1311_v31, %v1310_v36  ;;  %v1117_v2 = vadd.f32 %v1116_v40, %v1115_v20  ;;  %1033 = vst.msk [vmem:[%s2717_s4 + $0xfc] sm:$0xf] %vm969_vm2, %v1539_v63  ;;  %v1325_v31 = vsel %vm1034_vm3, %v1215_v26, 0.0  ;;  %v1134_v3 = vsel %vm1034_vm3, %v2360_v62, 0.0 }
 0x136   :  { %1031 = vst.msk [vmem:[%s2717_s4 + $0xf4] sm:$0xf] %vm969_vm2, %v1537_v7  ;;  %v1219_v45 = vmul.f32 %v2374_v43, %v2374_v43  ;;  %v1136_v52 = vsel %vm1034_vm3, %v2374_v43, 0.0  ;;  %v1138_v41 = vsel %vm1034_vm3, %v2418_v25, 0.0  ;;  %v1221_v50 = vmul.f32 %v2438_v34, %v2438_v34 }
 0x137   :  { %v1119_v14 = vadd.f32 %v1118_v4, %v1117_v2  ;;  %v1314_v42 = vadd.f32 %v1313_v9, %v1312_v51  ;;  %v1329_v4 = vsel %vm1034_vm3, %v1217_v35, 0.0  ;;  %v1220_v51 = vmul.f32 %v2418_v25, %v2418_v25 }
 0x138   :  { %v1331_v9 = vsel %vm1034_vm3, %v1218_v37, 0.0  ;;  %v1140_v43 = vsel %vm1034_vm3, %v2438_v34, 0.0  ;;  %v1142_v25 = vsel %vm1034_vm3, %v2414_v18, 0.0  ;;  %v1144_v34 = vsel %vm1034_vm3, %v2430_v32, 0.0 }
 0x139   :  { %v1316_v53 = vadd.f32 %v1315_v44, %v1314_v42  ;;  %v1121_v56 = vadd.f32 %v1120_v28, %v1119_v14  ;;  %v1333_v14 = vsel %vm1034_vm3, %v1219_v45, 0.0  ;;  %v1335_v42 = vsel %vm1034_vm3, %v1220_v51, 0.0 }
 0x13a   :  { %v1226_v26 = vmul.f32 %v2478_v5, %v2478_v5 }
 0x13b   :  { %v1123_v0 = vadd.f32 %v1122_v46, %v1121_v56  ;;  %v1318_v6 = vadd.f32 %v1317_v60, %v1316_v53  ;;  %v1222_v46 = vmul.f32 %v2414_v18, %v2414_v18  ;;  %v1223_v56 = vmul.f32 %v2430_v32, %v2430_v32 }
 0x13c   :  { %v1337_v60 = vsel %vm1034_vm3, %v1221_v50, 0.0  ;;  %v1148_v32 = vsel %vm1034_vm3, %v2502_v55, 0.0 }
 0x13d   :  { %v1320_v38 = vadd.f32 %v1319_v57, %v1318_v6  ;;  %v1125_v15 = vadd.f32 %v1124_v12, %v1123_v0  ;;  %v1224_v57 = vmul.f32 %v2482_v48, %v2482_v48  ;;  %v1339_v0 = vsel %vm1034_vm3, %v1222_v46, 0.0 }
 0x13e   :  { %v1146_v6 = vsel %vm1034_vm3, %v2482_v48, 0.0  ;;  %v1341_v11 = vsel %vm1034_vm3, %v1223_v56, 0.0  ;;  %v1150_v48 = vsel %vm1034_vm3, %v2478_v5, 0.0 }
 0x13f   :  { %v1127_v22 = vadd.f32 %v1126_v16, %v1125_v15  ;;  %v1322_v23 = vadd.f32 %v1321_v13, %v1320_v38  ;;  %v1343_v12 = vsel %vm1034_vm3, %v1224_v57, 0.0  ;;  %v1225_v38 = vmul.f32 %v2502_v55, %v2502_v55 }
 0x140   :  { %v1152_v55 = vsel %vm1034_vm3, %v2494_v58, 0.0 }
 0x141   :  { %v1324_v49 = vadd.f32 %v1323_v24, %v1322_v23  ;;  %v1129_v54 = vadd.f32 %v1128_v27, %v1127_v22  ;;  %v1227_v22 = vmul.f32 %v2494_v58, %v2494_v58  ;;  %v1345_v23 = vsel %vm1034_vm3, %v1225_v38, 0.0 }
 0x142   :  { %v1228_v24 = vmul.f32 %v2546_v1, %v2546_v1  ;;  %v1156_v58 = vsel %vm1034_vm3, %v2566_v39, 0.0 }
 0x143   :  { %v1131_v20 = vadd.f32 %v1130_v30, %v1129_v54  ;;  %v1326_v36 = vadd.f32 %v1325_v31, %v1324_v49  ;;  %v1347_v49 = vsel %vm1034_vm3, %v1226_v26, 0.0  ;;  %v1154_v54 = vsel %vm1034_vm3, %v2546_v1, 0.0 }
 0x144   :  { %v1351_v35 = vsel %vm1034_vm3, %v1228_v24, 0.0  ;;  %v1158_v1 = vsel %vm1034_vm3, %v2542_v29, 0.0 }
 0x145   :  { %v1328_v21 = vadd.f32 %v1327_v33, %v1326_v36  ;;  %v1133_v40 = vadd.f32 %v1132_v8, %v1131_v20  ;;  %v1349_v33 = vsel %vm1034_vm3, %v1227_v22, 0.0  ;;  %v1229_v20 = vmul.f32 %v2566_v39, %v2566_v39 }
 0x146   :  { %v1230_v8 = vmul.f32 %v2542_v29, %v2542_v29 }
 0x147   :  { %v1135_v2 = vadd.f32 %v1134_v3, %v1133_v40  ;;  %v1330_v19 = vadd.f32 %v1329_v4, %v1328_v21  ;;  %v1231_v3 = vmul.f32 %v2558_v61, %v2558_v61  ;;  %v1353_v45 = vsel %vm1034_vm3, %v1229_v20, 0.0 }
 0x149   :  { %v1332_v10 = vadd.f32 %v1331_v9, %v1330_v19  ;;  %v1137_v62 = vadd.f32 %v1136_v52, %v1135_v2  ;;  %v1355_v2 = vsel %vm1034_vm3, %v1230_v8, 0.0  ;;  %v1160_v19 = vsel %vm1034_vm3, %v2558_v61, 0.0 }
 0x14a   :  { %v1357_v39 = vsel %vm1034_vm3, %v1231_v3, 0.0 }
 0x14b   :  { %v1139_v44 = vadd.f32 %v1138_v41, %v1137_v62  ;;  %v1334_v28 = vadd.f32 %v1333_v14, %v1332_v10 }
 0x14d   :  { %v1336_v47 = vadd.f32 %v1335_v42, %v1334_v28  ;;  %v1141_v53 = vadd.f32 %v1140_v43, %v1139_v44 }
 0x14f   :  { %v1143_v59 = vadd.f32 %v1142_v25, %v1141_v53  ;;  %v1338_v63 = vadd.f32 %v1337_v60, %v1336_v47 }
 0x151   :  { %v1340_v7 = vadd.f32 %v1339_v0, %v1338_v63  ;;  %v1145_v18 = vadd.f32 %v1144_v34, %v1143_v59 }
 0x153   :  { %v1147_v15 = vadd.f32 %v1146_v6, %v1145_v18  ;;  %v1342_v16 = vadd.f32 %v1341_v11, %v1340_v7 }
 0x155   :  { %v1344_v13 = vadd.f32 %v1343_v12, %v1342_v16  ;;  %v1149_v17 = vadd.f32 %v1148_v32, %v1147_v15 }
 0x157   :  { %v1151_v27 = vadd.f32 %v1150_v48, %v1149_v17  ;;  %v1346_v30 = vadd.f32 %v1345_v23, %v1344_v13 }
 0x159   :  { %v1348_v31 = vadd.f32 %v1347_v49, %v1346_v30  ;;  %v1153_v5 = vadd.f32 %v1152_v55, %v1151_v27 }
 0x15b   :  { %v1155_v36 = vadd.f32 %v1154_v54, %v1153_v5  ;;  %v1350_v37 = vadd.f32 %v1349_v33, %v1348_v31 }
 0x15d   :  { %v1352_v21 = vadd.f32 %v1351_v35, %v1350_v37  ;;  %v1157_v40 = vadd.f32 %v1156_v58, %v1155_v36 }
 0x15f   :  { %v1159_v4 = vadd.f32 %v1158_v1, %v1157_v40  ;;  %v1354_v51 = vadd.f32 %v1353_v45, %v1352_v21 }
 0x161   :  { %v1161_v9 = vadd.f32 %v1160_v19, %v1159_v4  ;;  %v1356_v52 = vadd.f32 %v1355_v2, %v1354_v51 }
 0x163   :  { %v1162_v41 = vrot.slane %v1161_v9, 4  ;;  %v1358_v10 = vadd.f32 %v1357_v39, %v1356_v52 }
 0x165   :  { %v1163_v62 = vadd.f32 %v1162_v41, %v1161_v9  ;;  %v1359_v29 = vrot.slane %v1358_v10, 4 }
 0x167   :  { %v1164_v14 = vrot.slane %v1163_v62, 2  ;;  %v1360_v42 = vadd.f32 %v1359_v29, %v1358_v10 }
 0x169   :  { %v1165_v50 = vadd.f32 %v1164_v14, %v1163_v62  ;;  %v1361_v44 = vrot.slane %v1360_v42, 2 }
 0x16b   :  { %v1166_v28 = vrot.slane %v1165_v50, 1  ;;  %v1362_v46 = vadd.f32 %v1361_v44, %v1360_v42 }
 0x16d   :  { %v1363_v43 = vrot.slane %v1362_v46, 1  ;;  %v1167_v47 = vadd.f32 %v1166_v28, %v1165_v50 }
 0x16f   :  { %v1364_v53 = vadd.f32 %v1363_v43, %v1362_v46 }
 0x171   :  { %v1366_v61 = vsel %vm1365_vm4, %v1167_v47, %v1364_v53 }
 0x172   :  { %v1368_v25 = vsel %vm1367_vm5, %v1366_v61, 0.0 }
 0x173   :  { %1369 = vst.msk [vmem:[%s2718_s5] sm:$0xff] %vm1034_vm3, %v1368_v25 }

// kernel: bottleneck_forward.3
= control target key start
LH: loop header
LB: loop body
LE: loop exit
PB: predicated region body
PF: predicated region fallthrough
CT: control target
= control target key end

     0   :  { %s4983_s15 = smov 0   ;;  %s5663_s0 = inlined_call_operand.vmem [shape: bf16[2,256,16], index: 0, kind: input, shape index: {}]   ;;  %s5664_s1 = inlined_call_operand.vmem [shape: f32[1,16], index: 1, kind: input, shape index: {}]   ;;  %s5665_s2 = inlined_call_operand.vmem [shape: f32[1,16], index: 2, kind: input, shape index: {}]   ;;  %s5666_s3 = inlined_call_operand.vmem [shape: bf16[9,16,128], index: 3, kind: input, shape index: {}]   ;;  %s5667_s4 = inlined_call_operand.vmem [shape: f32[2,288,128], index: 4, kind: output, shape index: {}]  }
   0x1 LB: > { %s3788_s16 = sadd.s32 4294967295, %s4955_s15   ;;  %p3792_p0 = scmp.ge.s32.totalorder %s4955_s15, 1  ;;  %s4955_s15 = sphi %s4983_s15, %s14_s15  }
   0x2   : > { %p162_p1 = scmp.lt.s32.totalorder %s4955_s15, 3 }
   0x4   : > { %p163_p2 = pnand %p3792_p0, %p162_p1 }
   0x5   : > { %v4930_v0 = vld [vmem:[%s5666_s3 + $0x8] sm:$0xff] (!%p163_p2)   ;;  %vm199_vm0 = vcmask (!%p163_p2), 130048   ;;  %v4931_v1 = vld [vmem:[%s5666_s3 + $0x20] sm:$0xff] (!%p163_p2)   ;;  %v4957_v2 = vmov (!%p163_p2), 0.0   ;;  %vm202_vm1 = vcmask (!%p163_p2), 124928   ;;  %p5013_p3 = scmp.lt.s32.totalorder (!%p163_p2), %s3788_s16, 1 }
   0x6   : > { %166 = sbr.rel (%p163_p2) target bundleno = 603 (0x25b), region = 36  ;;  %4272 = vmatprep.subr.bf16.mxu1 (!%p163_p2), %v4930_v0  ;;  %200 = vst.msk [vmem:[#allocation2] sm:$0xff] (!%p163_p2), %vm199_vm0, %v4957_v2  ;;  %201 = vst.msk [vmem:[#allocation2 + $0x8] sm:$0xff] (!%p163_p2), %vm199_vm0, %v4957_v2  ;;  %v5008_v3 = vld [vmem:[%s5666_s3] sm:$0xff] (!%p163_p2)   ;;  %4408 = vmatprep.subr.bf16.mxu0 (!%p163_p2), %v4931_v1  ;;  %vm234_vm2 = vcmask (!%p163_p2), 123904   ;;  %v5053_v4 = vld [vmem:[%s5666_s3 + $0x28] sm:$0xff] (!%p163_p2)  }
   0x7   : > { %204 = vst.msk [vmem:[#allocation2 + $0x133] sm:$0xff] (!%p163_p2), %vm199_vm0, %v4957_v2  ;;  %205 = vst.msk [vmem:[#allocation2 + $0x13b] sm:$0xff] (!%p163_p2), %vm199_vm0, %v4957_v2  ;;  %4273 = vmatpush3.bf16.msra.mxu1 (!%p163_p2), %v4930_v0  ;;  %4409 = vmatpush3.bf16.msra.mxu0 (!%p163_p2), %v4931_v1  ;;  %v5066_v5 = vld [vmem:[%s5664_s1] ss:$0 sm:$0xff] (!%p163_p2)  ;;  %vm206_vm3 = vcmask (!%p163_p2), 126976  }
   0x8   : > { %203 = vst.msk [vmem:[#allocation2 + $0x10] sm:$0x7] (!%p163_p2), %vm202_vm1, %v4957_v2  ;;  %4306 = vmatprep.subr.bf16.mxu1 (!%p163_p2), %v5008_v3  ;;  %4442 = vmatprep.subr.bf16.mxu0 (!%p163_p2), %v5053_v4  ;;  %v5080_v17 = vld [vmem:[%s5665_s2] ss:$0 sm:$0xff] (!%p163_p2) }
   0x9   : > { %235 = vst.msk [vmem:[#allocation2 + $0x23] sm:$0x3] (!%p163_p2), %vm234_vm2, %v4957_v2  ;;  %248 = vst.msk [vmem:[#allocation2 + $0x35] sm:$0x3] (!%p163_p2), %vm234_vm2, %v4957_v2 }
   0xa   : > { %261 = vst.msk [vmem:[#allocation2 + $0x47] sm:$0x3] (!%p163_p2), %vm234_vm2, %v4957_v2  ;;  %274 = vst.msk [vmem:[#allocation2 + $0x59] sm:$0x3] (!%p163_p2), %vm234_vm2, %v4957_v2 }
   0xb   : > { %287 = vst.msk [vmem:[#allocation2 + $0x6b] sm:$0x3] (!%p163_p2), %vm234_vm2, %v4957_v2  ;;  %300 = vst.msk [vmem:[#allocation2 + $0x7d] sm:$0x3] (!%p163_p2), %vm234_vm2, %v4957_v2 }
   0xc   : > { %313 = vst.msk [vmem:[#allocation2 + $0x8f] sm:$0x3] (!%p163_p2), %vm234_vm2, %v4957_v2  ;;  %326 = vst.msk [vmem:[#allocation2 + $0xa1] sm:$0x3] (!%p163_p2), %vm234_vm2, %v4957_v2 }
   0xd   : > { %339 = vst.msk [vmem:[#allocation2 + $0xb3] sm:$0x3] %vm234_vm2, %v4957_v2  ;;  %352 = vst.msk [vmem:[#allocation2 + $0xc5] sm:$0x3] %vm234_vm2, %v4957_v2  ;;  %s5670_s16 = smov (!%p5013_p3, %s3788_s16), 1  ;;  %v481_v6 = vld [vmem:[#allocation2 + $0x1] sm:$0xff] }
   0xe   : > { %365 = vst.msk [vmem:[#allocation2 + $0xd7] sm:$0x3] %vm234_vm2, %v4957_v2  ;;  %378 = vst.msk [vmem:[#allocation2 + $0xe9] sm:$0x3] %vm234_vm2, %v4957_v2  ;;  %s4012_s26 = sshll.u32 %s5670_s16, 7  ;;  %s4920_s14 = smul.u32 288, %s5670_s16 }
   0xf   : > { %391 = vst.msk [vmem:[#allocation2 + $0xfb] sm:$0x3] %vm234_vm2, %v4957_v2  ;;  %404 = vst.msk [vmem:[#allocation2 + $0x10d] sm:$0x3] %vm234_vm2, %v4957_v2  ;;  %s5071_s5 = scalar_lea.vmem %s5663_s0, %s4012_s26  ;;  %v482_v9 = vld [vmem:[#allocation2 + $0x9] sm:$0xff] }
  0x10   : > { %417 = vst.msk [vmem:[#allocation2 + $0x11f] sm:$0x3] %vm234_vm2, %v4957_v2  ;;  %430 = vst.msk [vmem:[#allocation2 + $0x131] sm:$0x3] %vm234_vm2, %v4957_v2  ;;  %v4014_v7 = vld [vmem:[%s5071_s5] sm:$0xff]   ;;  %v4077_v8 = vld [vmem:[%s5071_s5 + $0x8] sm:$0xff]   ;;  %v513_v16 = vpack.c.bf16 %v482_v9, %v481_v6  ;;  %s5605_s19 = scalar_lea.vmem %s5667_s4, %s4920_s14 }
  0x11   : > { %v4015_v10 = vunpack.c.l.bf16 %v4014_v7  ;;  %v4016_v11 = vunpack.c.h.bf16 %v4014_v7  ;;  %v4019_v12 = vunpack.c.l.bf16 %v4077_v8  ;;  %v4020_v13 = vunpack.c.h.bf16 %v4077_v8  ;;  %v4078_v14 = vld [vmem:[%s5071_s5 + $0x10] sm:$0xff]   ;;  %v4079_v15 = vld [vmem:[%s5071_s5 + $0x18] sm:$0xff]   ;;  %v4080_v33 = vld [vmem:[%s5071_s5 + $0x20] sm:$0xff]   ;;  %207 = vst.msk [vmem:[#allocation2 + $0x143] sm:$0x1f] %vm206_vm3, %v4957_v2 }
  0x12   : > { %v4023_v18 = vunpack.c.l.bf16 %v4078_v14  ;;  %v4024_v19 = vunpack.c.h.bf16 %v4078_v14  ;;  %v4027_v20 = vunpack.c.l.bf16 %v4079_v15  ;;  %4274 = vmatprep.mubr.msk.bf16.mxu1 %vm199_vm0, %v513_v16  ;;  %v4028_v27 = vunpack.c.h.bf16 %v4079_v15  ;;  %v4081_v34 = vld [vmem:[%s5071_s5 + $0x28] sm:$0xff]   ;;  %v4082_v35 = vld [vmem:[%s5071_s5 + $0x30] sm:$0xff]   ;;  %v4083_v40 = vld [vmem:[%s5071_s5 + $0x38] sm:$0xff]  }
  0x13   : > { %v220_v21 = vmul.f32 %v4015_v10, %v5066_v5  ;;  %v221_v22 = vmul.f32 %v4016_v11, %v5066_v5  ;;  %v240_v23 = vmul.f32 %v4019_v12, %v5066_v5  ;;  %v241_v24 = vmul.f32 %v4020_v13, %v5066_v5  ;;  %v4084_v9 = vld [vmem:[%s5071_s5 + $0x40] sm:$0xff]   ;;  %v4085_v10 = vld [vmem:[%s5071_s5 + $0x48] sm:$0xff]  }
  0x14   : > { %v253_v25 = vmul.f32 %v4023_v18, %v5066_v5  ;;  %v254_v26 = vmul.f32 %v4024_v19, %v5066_v5  ;;  %v266_v28 = vmul.f32 %v4027_v20, %v5066_v5  ;;  %v267_v38 = vmul.f32 %v4028_v27, %v5066_v5  ;;  %v5129_v20 = vld [vmem:[%s5071_s5 + $0x50] sm:$0xff]  }
  0x15   : > { %v228_v29 = vadd.f32 %v5080_v17, %v220_v21  ;;  %v229_v30 = vadd.f32 %v5080_v17, %v221_v22  ;;  %v242_v31 = vadd.f32 %v5080_v17, %v240_v23  ;;  %v243_v32 = vadd.f32 %v5080_v17, %v241_v24 }
  0x16   : > { %v255_v36 = vadd.f32 %v5080_v17, %v253_v25  ;;  %v256_v37 = vadd.f32 %v5080_v17, %v254_v26  ;;  %v268_v39 = vadd.f32 %v5080_v17, %v266_v28  ;;  %v269_v47 = vadd.f32 %v5080_v17, %v267_v38 }
  0x17   : > { %v230_v41 = vmax.f32 %v228_v29, 0.0  ;;  %v231_v42 = vmax.f32 %v229_v30, 0.0  ;;  %v244_v43 = vmax.f32 %v242_v31, 0.0  ;;  %v245_v44 = vmax.f32 %v243_v32, 0.0 }
  0x18   : > { %v257_v45 = vmax.f32 %v255_v36, 0.0  ;;  %v258_v46 = vmax.f32 %v256_v37, 0.0  ;;  %v270_v48 = vmax.f32 %v268_v39, 0.0  ;;  %v4031_v49 = vunpack.c.l.bf16 %v4080_v33  ;;  %v5142_v36 = vld [vmem:[%s5666_s3 + $0x10] sm:$0xff]  }
  0x19   : > { %232 = vst.msk [vmem:[#allocation2 + $0x13] sm:$0xff] %vm199_vm0, %v230_v41  ;;  %233 = vst.msk [vmem:[#allocation2 + $0x1b] sm:$0xff] %vm199_vm0, %v231_v42  ;;  %v4032_v50 = vunpack.c.h.bf16 %v4080_v33  ;;  %v4035_v51 = vunpack.c.l.bf16 %v4081_v34  ;;  %v4036_v52 = vunpack.c.h.bf16 %v4081_v34  ;;  %v271_v53 = vmax.f32 %v269_v47, 0.0  ;;  %v5147_v37 = vld [vmem:[%s5666_s3 + $0x30] sm:$0xff]  }
  0x1a   : > { %246 = vst.msk [vmem:[#allocation2 + $0x25] sm:$0xff] %vm199_vm0, %v244_v43  ;;  %247 = vst.msk [vmem:[#allocation2 + $0x2d] sm:$0xff] %vm199_vm0, %v245_v44  ;;  %v4039_v54 = vunpack.c.l.bf16 %v4082_v35  ;;  %v4040_v55 = vunpack.c.h.bf16 %v4082_v35  ;;  %v4043_v56 = vunpack.c.l.bf16 %v4083_v40  ;;  %v279_v57 = vmul.f32 %v4031_v49, %v5066_v5  ;;  %v5137_v35 = vld [vmem:[%s5071_s5 + $0x58] sm:$0xff]  }
  0x1b   : > { %259 = vst.msk [vmem:[#allocation2 + $0x37] sm:$0xff] %vm199_vm0, %v257_v45  ;;  %260 = vst.msk [vmem:[#allocation2 + $0x3f] sm:$0xff] %vm199_vm0, %v258_v46  ;;  %v280_v58 = vmul.f32 %v4032_v50, %v5066_v5  ;;  %v292_v59 = vmul.f32 %v4035_v51, %v5066_v5  ;;  %v293_v60 = vmul.f32 %v4036_v52, %v5066_v5  ;;  %v4044_v0 = vunpack.c.h.bf16 %v4083_v40 }
  0x1c   : > { %272 = vst.msk [vmem:[#allocation2 + $0x49] sm:$0xff] %vm199_vm0, %v270_v48  ;;  %273 = vst.msk [vmem:[#allocation2 + $0x51] sm:$0xff] %vm199_vm0, %v271_v53  ;;  %v305_v61 = vmul.f32 %v4039_v54, %v5066_v5  ;;  %v306_v62 = vmul.f32 %v4040_v55, %v5066_v5  ;;  %v318_v63 = vmul.f32 %v4043_v56, %v5066_v5  ;;  %v4047_v32 = vunpack.c.l.bf16 %v4084_v9 }
  0x1d   : > { %v281_v1 = vadd.f32 %v5080_v17, %v279_v57  ;;  %v282_v6 = vadd.f32 %v5080_v17, %v280_v58  ;;  %v294_v7 = vadd.f32 %v5080_v17, %v292_v59  ;;  %v295_v8 = vadd.f32 %v5080_v17, %v293_v60 }
  0x1e   : > { %v307_v11 = vadd.f32 %v5080_v17, %v305_v61  ;;  %v308_v12 = vadd.f32 %v5080_v17, %v306_v62  ;;  %v320_v13 = vadd.f32 %v5080_v17, %v318_v63  ;;  %v319_v14 = vmul.f32 %v4044_v0, %v5066_v5 }
  0x1f   : > { %v283_v15 = vmax.f32 %v281_v1, 0.0  ;;  %v284_v16 = vmax.f32 %v282_v6, 0.0  ;;  %v296_v18 = vmax.f32 %v294_v7, 0.0  ;;  %v297_v19 = vmax.f32 %v295_v8, 0.0 }
  0x20   : > { %v483_v21 = vld [vmem:[#allocation2 + $0x11] sm:$0xff]  ;;  %v484_v22 = vld [vmem:[#allocation2 + $0x19] sm:$0xff]  ;;  %v309_v24 = vmax.f32 %v307_v11, 0.0  ;;  %v310_v25 = vmax.f32 %v308_v12, 0.0  ;;  %v322_v26 = vmax.f32 %v320_v13, 0.0  ;;  %v321_v27 = vadd.f32 %v5080_v17, %v319_v14 }
  0x21   : > { %v1558_v23 = vld [vmem:[#allocation2 + $0x13] sm:$0xff]  ;;  %v514_v28 = vpack.c.bf16 %v484_v22, %v483_v21  ;;  %v1559_v29 = vld [vmem:[#allocation2 + $0x1b] sm:$0xff]  ;;  %v1560_v30 = vld [vmem:[#allocation2 + $0x23] sm:$0xff]  ;;  %285 = vst.msk [vmem:[#allocation2 + $0x5b] sm:$0xff] %vm199_vm0, %v283_v15  ;;  %v4048_v33 = vunpack.c.h.bf16 %v4084_v9  ;;  %v4051_v34 = vunpack.c.l.bf16 %v4085_v10  ;;  %v4052_v44 = vunpack.c.h.bf16 %v4085_v10 }
  0x22   : > { %v1561_v31 = vld [vmem:[#allocation2 + $0x2b] sm:$0xff]  ;;  %286 = vst.msk [vmem:[#allocation2 + $0x63] sm:$0xff] %vm199_vm0, %v284_v16  ;;  %298 = vst.msk [vmem:[#allocation2 + $0x6d] sm:$0xff] %vm199_vm0, %v296_v18  ;;  %v1590_v38 = vpack.c.bf16 %v1559_v29, %v1558_v23  ;;  %v485_v40 = vld [vmem:[#allocation2 + $0x21] sm:$0xff]  ;;  %v323_v43 = vmax.f32 %v321_v27, 0.0  ;;  %v331_v49 = vmul.f32 %v4047_v32, %v5066_v5  ;;  %v4055_v55 = vunpack.c.l.bf16 %v5129_v20 }
  0x23   : > { %299 = vst.msk [vmem:[#allocation2 + $0x75] sm:$0xff] %vm199_vm0, %v297_v19  ;;  %v1591_v39 = vpack.c.bf16 %v1561_v31, %v1560_v30  ;;  %v486_v41 = vld [vmem:[#allocation2 + $0x29] sm:$0xff]  ;;  %v487_v42 = vld [vmem:[#allocation2 + $0x31] sm:$0xff]  ;;  %311 = vst.msk [vmem:[#allocation2 + $0x7f] sm:$0xff] %vm199_vm0, %v309_v24  ;;  %4275 = vmatmul.mubr.msk.bf16.vlgmr.msra.gmra.mrb[0].mxu1 %vm199_vm0, %v514_v28  ;;  %v332_v50 = vmul.f32 %v4048_v33, %v5066_v5  ;;  %v344_v51 = vmul.f32 %v4051_v34, %v5066_v5 }
  0x24   : > { %312 = vst.msk [vmem:[#allocation2 + $0x87] sm:$0xff] %vm199_vm0, %v310_v25  ;;  %324 = vst.msk [vmem:[#allocation2 + $0x91] sm:$0xff] %vm199_vm0, %v322_v26  ;;  %v515_v45 = vpack.c.bf16 %v486_v41, %v485_v40  ;;  %v488_v46 = vld [vmem:[#allocation2 + $0x39] sm:$0xff]  ;;  %4307 = vmatpush3.bf16.msra.mxu1 %v5008_v3  ;;  %4410 = vmatprep.mubr.msk.bf16.mxu0 %vm199_vm0, %v1590_v38  ;;  %v489_v53 = vld [vmem:[#allocation2 + $0x41] sm:$0xff]  ;;  %v345_v54 = vmul.f32 %v4052_v44, %v5066_v5  ;;  %v4056_v59 = vunpack.c.h.bf16 %v5129_v20 }
  0x25   : > { %v1562_v47 = vld [vmem:[#allocation2 + $0x33] sm:$0xff]  ;;  %v1563_v48 = vld [vmem:[#allocation2 + $0x3b] sm:$0xff]  ;;  %325 = vst.msk [vmem:[#allocation2 + $0x99] sm:$0xff] %vm199_vm0, %v323_v43  ;;  %4411 = vmatmul.mubr.msk.bf16.vlgmr.msra.gmra.mrb[0].mxu0 %vm199_vm0, %v1591_v39  ;;  %v516_v56 = vpack.c.bf16 %v488_v46, %v487_v42  ;;  %v490_v57 = vld [vmem:[#allocation2 + $0x49] sm:$0xff]  ;;  %v333_v58 = vadd.f32 %v5080_v17, %v331_v49  ;;  %v334_v3 = vadd.f32 %v5080_v17, %v332_v50  ;;  %v4059_v1 = vunpack.c.l.bf16 %v5137_v35 }
  0x26   : > { %v1592_v52 = vpack.c.bf16 %v1563_v48, %v1562_v47  ;;  %4278 = vmatprep.mubr.msk.bf16.mxu1 %vm199_vm0, %v515_v45  ;;  %v1564_v60 = vld [vmem:[#allocation2 + $0x43] sm:$0xff]  ;;  %v1565_v61 = vld [vmem:[#allocation2 + $0x4b] sm:$0xff]  ;;  %v517_v62 = vpack.c.bf16 %v490_v57, %v489_v53  ;;  %4443 = vmatpush3.bf16.msra.mxu0 %v5053_v4  ;;  %v346_v63 = vadd.f32 %v5080_v17, %v344_v51  ;;  %v1566_v6 = vld [vmem:[#allocation2 + $0x53] sm:$0xff]  ;;  %v4060_v14 = vunpack.c.h.bf16 %v5137_v35 }
  0x27   : > { %v347_v0 = vadd.f32 %v5080_v17, %v345_v54  ;;  %v335_v7 = vmax.f32 %v333_v58, 0.0  ;;  %v336_v8 = vmax.f32 %v334_v3, 0.0  ;;  %v357_v9 = vmul.f32 %v4055_v55, %v5066_v5  ;;  %4340 = vmatprep.subr.bf16.mxu1 %v5142_v36  ;;  %4476 = vmatprep.subr.bf16.mxu0 %v5147_v37  ;;  %v4088_v15 = vld [vmem:[%s5071_s5 + $0x60] sm:$0xff]   ;;  %v4089_v23 = vld [vmem:[%s5071_s5 + $0x68] sm:$0xff]   ;;  %v491_v24 = vld [vmem:[#allocation2 + $0x51] sm:$0xff] }
  0x28   : > { %4414 = vmatprep.mubr.msk.bf16.mxu0 %vm199_vm0, %v1592_v52  ;;  %v358_v10 = vmul.f32 %v4056_v59, %v5066_v5  ;;  %v1567_v11 = vld [vmem:[#allocation2 + $0x5b] sm:$0xff]  ;;  %v348_v4 = vmax.f32 %v346_v63, 0.0  ;;  %v370_v13 = vmul.f32 %v4059_v1, %v5066_v5  ;;  %v1593_v16 = vpack.c.bf16 %v1565_v61, %v1564_v60  ;;  %v5191_v31 = vld [vmem:[%s5071_s5 + $0x70] sm:$0xff]  }
  0x29   : > { %v349_v12 = vmax.f32 %v347_v0, 0.0  ;;  %337 = vst.msk [vmem:[#allocation2 + $0xa3] sm:$0xff] %vm199_vm0, %v335_v7  ;;  %338 = vst.msk [vmem:[#allocation2 + $0xab] sm:$0xff] %vm199_vm0, %v336_v8  ;;  %v359_v18 = vadd.f32 %v5080_v17, %v357_v9  ;;  %v1594_v20 = vpack.c.bf16 %v1567_v11, %v1566_v6  ;;  %v371_v22 = vmul.f32 %v4060_v14, %v5066_v5  ;;  %v492_v25 = vld [vmem:[#allocation2 + $0x59] sm:$0xff]  ;;  %v493_v32 = vld [vmem:[#allocation2 + $0x61] sm:$0xff] }
  0x2a   : > { %v360_v19 = vadd.f32 %v5080_v17, %v358_v10  ;;  %350 = vst.msk [vmem:[#allocation2 + $0xb5] sm:$0xff] %vm199_vm0, %v348_v4  ;;  %v372_v21 = vadd.f32 %v5080_v17, %v370_v13  ;;  %v4063_v28 = vunpack.c.l.bf16 %v4088_v15  ;;  %v494_v33 = vld [vmem:[#allocation2 + $0x69] sm:$0xff]  ;;  %v4064_v35 = vunpack.c.h.bf16 %v4088_v15  ;;  %v1570_v44 = vld [vmem:[#allocation2 + $0x73] sm:$0xff]  ;;  %v1571_v45 = vld [vmem:[#allocation2 + $0x7b] sm:$0xff] }
  0x2b   : > { %351 = vst.msk [vmem:[#allocation2 + $0xbd] sm:$0xff] %vm199_vm0, %v349_v12  ;;  %4279 = vmatmul.mubr.msk.bf16.gmra.mrb[4].mxu1 %vm199_vm0, %v516_v56  ;;  %v361_v26 = vmax.f32 %v359_v18, 0.0  ;;  %v373_v30 = vadd.f32 %v5080_v17, %v371_v22  ;;  %v4067_v38 = vunpack.c.l.bf16 %v4089_v23  ;;  %v518_v39 = vpack.c.bf16 %v492_v25, %v491_v24  ;;  %v1568_v40 = vld [vmem:[#allocation2 + $0x63] sm:$0xff]  ;;  %v1569_v41 = vld [vmem:[#allocation2 + $0x6b] sm:$0xff]  ;;  %v496_v61 = vld [vmem:[#allocation2 + $0x79] sm:$0xff] }
  0x2c   : > { %v362_v27 = vmax.f32 %v360_v19, 0.0  ;;  %4282 = vmatprep.mubr.msk.bf16.mxu1 %vm199_vm0, %v517_v62  ;;  %v374_v29 = vmax.f32 %v372_v21, 0.0  ;;  %v383_v34 = vmul.f32 %v4063_v28, %v5066_v5  ;;  %v4068_v43 = vunpack.c.h.bf16 %v4089_v23  ;;  %v495_v60 = vld [vmem:[#allocation2 + $0x71] sm:$0xff]  ;;  %v497_v0 = vld [vmem:[#allocation2 + $0x81] sm:$0xff]  ;;  %v498_v1 = vld [vmem:[#allocation2 + $0x89] sm:$0xff] }
  0x2d   : > { %4415 = vmatmul.mubr.msk.bf16.gmra.mrb[4].mxu0 %vm199_vm0, %v1593_v16  ;;  %363 = vst.msk [vmem:[#allocation2 + $0xc7] sm:$0xff] %vm199_vm0, %v361_v26  ;;  %v375_v42 = vmax.f32 %v373_v30, 0.0  ;;  %v384_v47 = vmul.f32 %v4064_v35, %v5066_v5  ;;  %v396_v48 = vmul.f32 %v4067_v38, %v5066_v5  ;;  %v4071_v49 = vunpack.c.l.bf16 %v5191_v31  ;;  %v1572_v6 = vld [vmem:[#allocation2 + $0x83] sm:$0xff]  ;;  %v1573_v7 = vld [vmem:[#allocation2 + $0x8b] sm:$0xff]  ;;  %v1574_v10 = vld [vmem:[#allocation2 + $0x93] sm:$0xff] }
  0x2e   : > { %364 = vst.msk [vmem:[#allocation2 + $0xcf] sm:$0xff] %vm199_vm0, %v362_v27  ;;  %4418 = vmatprep.mubr.msk.bf16.mxu0 %vm199_vm0, %v1594_v20  ;;  %376 = vst.msk [vmem:[#allocation2 + $0xd9] sm:$0xff] %vm199_vm0, %v374_v29  ;;  %v385_v46 = vadd.f32 %v5080_v17, %v383_v34  ;;  %v519_v50 = vpack.c.bf16 %v494_v33, %v493_v32  ;;  %v397_v51 = vmul.f32 %v4068_v43, %v5066_v5  ;;  %v1575_v11 = vld [vmem:[#allocation2 + $0x9b] sm:$0xff]  ;;  %v499_v14 = vld [vmem:[#allocation2 + $0x91] sm:$0xff] }
  0x2f   : > { %377 = vst.msk [vmem:[#allocation2 + $0xe1] sm:$0xff] %vm199_vm0, %v375_v42  ;;  %v1595_v52 = vpack.c.bf16 %v1569_v41, %v1568_v40  ;;  %v386_v54 = vadd.f32 %v5080_v17, %v384_v47  ;;  %v398_v55 = vadd.f32 %v5080_v17, %v396_v48  ;;  %v1596_v56 = vpack.c.bf16 %v1571_v45, %v1570_v44  ;;  %v500_v15 = vld [vmem:[#allocation2 + $0x99] sm:$0xff]  ;;  %v2461_v2 = vld [vmem:[#allocation2 + $0x6d] sm:$0xff] }
  0x30   : > { %v387_v53 = vmax.f32 %v385_v46, 0.0  ;;  %v399_v57 = vadd.f32 %v5080_v17, %v397_v51  ;;  %v409_v58 = vmul.f32 %v4071_v49, %v5066_v5  ;;  %v520_v9 = vpack.c.bf16 %v496_v61, %v495_v60  ;;  %v501_v16 = vld [vmem:[#allocation2 + $0xa1] sm:$0xff]  ;;  %v502_v18 = vld [vmem:[#allocation2 + $0xa9] sm:$0xff] }
  0x31   : > { %v388_v3 = vmax.f32 %v386_v54, 0.0  ;;  %v400_v59 = vmax.f32 %v398_v55, 0.0  ;;  %v521_v4 = vpack.c.bf16 %v498_v1, %v497_v0  ;;  %v1597_v12 = vpack.c.bf16 %v1573_v7, %v1572_v6  ;;  %v1576_v19 = vld [vmem:[#allocation2 + $0xa3] sm:$0xff]  ;;  %v1577_v20 = vld [vmem:[#allocation2 + $0xab] sm:$0xff]  ;;  %v1578_v22 = vld [vmem:[#allocation2 + $0xb3] sm:$0xff] }
  0x32   : > { %389 = vst.msk [vmem:[#allocation2 + $0xeb] sm:$0xff] %vm199_vm0, %v387_v53  ;;  %v401_v62 = vmax.f32 %v399_v57, 0.0  ;;  %v411_v63 = vadd.f32 %v5080_v17, %v409_v58  ;;  %v1598_v13 = vpack.c.bf16 %v1575_v11, %v1574_v10  ;;  %v522_v21 = vpack.c.bf16 %v500_v15, %v499_v14  ;;  %v1579_v23 = vld [vmem:[#allocation2 + $0xbb] sm:$0xff]  ;;  %v503_v27 = vld [vmem:[#allocation2 + $0xb1] sm:$0xff]  ;;  %v432_v61 = vld [vmem:[#allocation2 + $0x8] sm:$0xff] }
  0x33   : > { %4283 = vmatmul.mubr.msk.bf16.gmra.mrb[8].mxu1 %vm199_vm0, %v518_v39  ;;  %390 = vst.msk [vmem:[#allocation2 + $0xf3] sm:$0xff] %vm199_vm0, %v388_v3  ;;  %402 = vst.msk [vmem:[#allocation2 + $0xfd] sm:$0xff] %vm199_vm0, %v400_v59  ;;  %v523_v24 = vpack.c.bf16 %v502_v18, %v501_v16  ;;  %v1599_v25 = vpack.c.bf16 %v1577_v20, %v1576_v19  ;;  %v1600_v26 = vpack.c.bf16 %v1579_v23, %v1578_v22  ;;  %v504_v28 = vld [vmem:[#allocation2 + $0xb9] sm:$0xff]  ;;  %v436_v14 = vld [vmem:[#allocation2 + $0x28] sm:$0xff] }
  0x34   : > { %4286 = vmatprep.mubr.msk.bf16.mxu1 %vm199_vm0, %v519_v50  ;;  %403 = vst.msk [vmem:[#allocation2 + $0x105] sm:$0xff] %vm199_vm0, %v401_v62  ;;  %v413_v8 = vmax.f32 %v411_v63, 0.0  ;;  %v505_v29 = vld [vmem:[#allocation2 + $0xc1] sm:$0xff]  ;;  %v524_v34 = vpack.c.bf16 %v504_v28, %v503_v27  ;;  %v4072_v42 = vunpack.c.h.bf16 %v5191_v31  ;;  %v5235_v57 = vld [vmem:[%s5071_s5 + $0x78] sm:$0xff]   ;;  %v1859_v16 = vld [vmem:[#allocation2 + $0x2c] sm:$0xff] }
  0x35   : > { %4419 = vmatmul.mubr.msk.bf16.gmra.mrb[8].mxu0 %vm199_vm0, %v1595_v52  ;;  %v506_v30 = vld [vmem:[#allocation2 + $0xc9] sm:$0xff]  ;;  %v1582_v35 = vld [vmem:[#allocation2 + $0xd3] sm:$0xff]  ;;  %v4075_v58 = vunpack.c.l.bf16 %v5235_v57  ;;  %v431_v60 = vld [vmem:[#allocation2] sm:$0xff] }
  0x36   : > { %4422 = vmatprep.mubr.msk.bf16.mxu0 %vm199_vm0, %v1596_v56  ;;  %415 = vst.msk [vmem:[#allocation2 + $0x10f] sm:$0xff] %vm199_vm0, %v413_v8  ;;  %v1580_v32 = vld [vmem:[#allocation2 + $0xc3] sm:$0xff]  ;;  %v1581_v33 = vld [vmem:[#allocation2 + $0xcb] sm:$0xff]  ;;  %v1583_v38 = vld [vmem:[#allocation2 + $0xdb] sm:$0xff]  ;;  %v525_v39 = vpack.c.bf16 %v506_v30, %v505_v29  ;;  %v410_v47 = vmul.f32 %v4072_v42, %v5066_v5 }
  0x37   : > { %v1601_v40 = vpack.c.bf16 %v1581_v33, %v1580_v32  ;;  %v1602_v41 = vpack.c.bf16 %v1583_v38, %v1582_v35  ;;  %v507_v43 = vld [vmem:[#allocation2 + $0xd1] sm:$0xff]  ;;  %v508_v44 = vld [vmem:[#allocation2 + $0xd9] sm:$0xff]  ;;  %v509_v45 = vld [vmem:[#allocation2 + $0xe1] sm:$0xff]  ;;  %v422_v62 = vmul.f32 %v4075_v58, %v5066_v5 }
  0x38   : > { %v1584_v48 = vld [vmem:[#allocation2 + $0xe3] sm:$0xff]  ;;  %v526_v50 = vpack.c.bf16 %v508_v44, %v507_v43  ;;  %v412_v31 = vadd.f32 %v5080_v17, %v410_v47  ;;  %v1856_v6 = vld [vmem:[#allocation2 + $0x14] sm:$0xff]  ;;  %v1863_v32 = vld [vmem:[#allocation2 + $0x4c] sm:$0xff] }
  0x39   : > { %v510_v46 = vld [vmem:[#allocation2 + $0xe9] sm:$0xff]  ;;  %v1857_v7 = vld [vmem:[#allocation2 + $0x1c] sm:$0xff]  ;;  %v424_v8 = vadd.f32 %v5080_v17, %v422_v62  ;;  %v1860_v19 = vld [vmem:[#allocation2 + $0x34] sm:$0xff] }
  0x3a   : > { %v1585_v49 = vld [vmem:[#allocation2 + $0xeb] sm:$0xff]  ;;  %v1586_v51 = vld [vmem:[#allocation2 + $0xf3] sm:$0xff]  ;;  %v1587_v52 = vld [vmem:[#allocation2 + $0xfb] sm:$0xff]  ;;  %v527_v53 = vpack.c.bf16 %v510_v46, %v509_v45  ;;  %v414_v55 = vmax.f32 %v412_v31, 0.0 }
  0x3b   : > { %4287 = vmatmul.mubr.msk.bf16.gmra.mrb[12].mxu1 %vm199_vm0, %v520_v9  ;;  %v1603_v54 = vpack.c.bf16 %v1585_v49, %v1584_v48  ;;  %v1604_v56 = vpack.c.bf16 %v1587_v52, %v1586_v51  ;;  %v511_v3 = vld [vmem:[#allocation2 + $0xf1] sm:$0xff]  ;;  %v512_v59 = vld [vmem:[#allocation2 + $0xf9] sm:$0xff]  ;;  %v1588_v63 = vld [vmem:[#allocation2 + $0x103] sm:$0xff]  ;;  %v463_v9 = vpack.c.bf16 %v432_v61, %v431_v60  ;;  %v426_v11 = vmax.f32 %v424_v8, 0.0 }
  0x3c   : > { %4290 = vmatprep.mubr.msk.bf16.mxu1 %vm199_vm0, %v521_v4  ;;  %416 = vst.msk [vmem:[#allocation2 + $0x117] sm:$0xff] %vm199_vm0, %v414_v55  ;;  %v528_v1 = vpack.c.bf16 %v512_v59, %v511_v3  ;;  %v1888_v4 = vpack.c.bf16 %v1857_v7, %v1856_v6  ;;  %v433_v5 = vld [vmem:[#allocation2 + $0x10] sm:$0xff]  ;;  %v1858_v15 = vld [vmem:[#allocation2 + $0x24] sm:$0xff]  ;;  %v1861_v20 = vld [vmem:[#allocation2 + $0x3c] sm:$0xff] }
  0x3d   : > { %4423 = vmatmul.mubr.msk.bf16.gmra.mrb[12].mxu0 %vm199_vm0, %v1597_v12  ;;  %v1589_v0 = vld [vmem:[#allocation2 + $0x10b] sm:$0xff]  ;;  %428 = vst.msk [vmem:[#allocation2 + $0x121] sm:$0xff] %vm199_vm0, %v426_v11  ;;  %v434_v12 = vld [vmem:[#allocation2 + $0x18] sm:$0xff]  ;;  %v5250_v22 = vpack.c.bf16 %v1859_v16, %v1858_v15  ;;  %v439_v28 = vld [vmem:[#allocation2 + $0x40] sm:$0xff] }
  0x3e   : > { %4426 = vmatprep.mubr.msk.bf16.mxu0 %vm199_vm0, %v1598_v13  ;;  %v1605_v10 = vpack.c.bf16 %v1589_v0, %v1588_v63  ;;  %v435_v13 = vld [vmem:[#allocation2 + $0x20] sm:$0xff]  ;;  %v464_v18 = vpack.c.bf16 %v434_v12, %v433_v5  ;;  %v5255_v23 = vld [vmem:[%s5666_s3 + $0x18] sm:$0xff]   ;;  %v440_v29 = vld [vmem:[#allocation2 + $0x48] sm:$0xff] }
  0x3f   : > { %v438_v27 = vld [vmem:[#allocation2 + $0x38] sm:$0xff]  ;;  %v1862_v30 = vld [vmem:[#allocation2 + $0x44] sm:$0xff]  ;;  %v467_v35 = vpack.c.bf16 %v440_v29, %v439_v28  ;;  %v1867_v44 = vld [vmem:[#allocation2 + $0x6c] sm:$0xff] }
  0x40   : > { %v5274_v38 = vpack.c.bf16 %v1863_v32, %v1862_v30  ;;  %v444_v42 = vld [vmem:[#allocation2 + $0x68] sm:$0xff]  ;;  %v1868_v46 = vld [vmem:[#allocation2 + $0x74] sm:$0xff]  ;;  %v1869_v47 = vld [vmem:[#allocation2 + $0x7c] sm:$0xff] }
  0x41   : > { %v1866_v43 = vld [vmem:[#allocation2 + $0x64] sm:$0xff]  ;;  %v445_v51 = vld [vmem:[#allocation2 + $0x70] sm:$0xff]  ;;  %v446_v52 = vld [vmem:[#allocation2 + $0x78] sm:$0xff] }
  0x42   : > { %v5284_v49 = vpack.c.bf16 %v1867_v44, %v1866_v43  ;;  %v447_v31 = vld [vmem:[#allocation2 + $0x80] sm:$0xff]  ;;  %v1871_v55 = vld [vmem:[#allocation2 + $0x8c] sm:$0xff]  ;;  %v1872_v58 = vld [vmem:[#allocation2 + $0x94] sm:$0xff] }
  0x43   : > { %4291 = vmatmul.mubr.msk.bf16.gmra.mrb[16].mxu1 %vm199_vm0, %v522_v21  ;;  %v465_v21 = vpack.c.bf16 %v436_v14, %v435_v13  ;;  %v1873_v3 = vld [vmem:[#allocation2 + $0x9c] sm:$0xff]  ;;  %v449_v62 = vld [vmem:[#allocation2 + $0x90] sm:$0xff]  ;;  %v1874_v6 = vld [vmem:[#allocation2 + $0xa4] sm:$0xff] }
  0x44   : > { %4294 = vmatprep.mubr.msk.bf16.mxu1 %vm199_vm0, %v523_v24  ;;  %v5257_v24 = vpack.c.bf16 %v1861_v20, %v1860_v19  ;;  %v5296_v61 = vpack.c.bf16 %v1873_v3, %v1872_v58  ;;  %v450_v63 = vld [vmem:[#allocation2 + $0x98] sm:$0xff]  ;;  %v451_v0 = vld [vmem:[#allocation2 + $0xa0] sm:$0xff]  ;;  %v1875_v7 = vld [vmem:[#allocation2 + $0xac] sm:$0xff] }
  0x45   : > { %4427 = vmatmul.mubr.msk.bf16.gmra.mrb[16].mxu0 %vm199_vm0, %v1599_v25  ;;  %v5263_v25 = vld [vmem:[%s5666_s3 + $0x38] sm:$0xff]   ;;  %v472_v8 = vpack.c.bf16 %v450_v63, %v449_v62  ;;  %v453_v12 = vld [vmem:[#allocation2 + $0xb0] sm:$0xff]  ;;  %v455_v14 = vld [vmem:[#allocation2 + $0xc0] sm:$0xff] }
  0x46   : > { %4430 = vmatprep.mubr.msk.bf16.mxu0 %vm199_vm0, %v1600_v26  ;;  %v437_v26 = vld [vmem:[#allocation2 + $0x30] sm:$0xff]  ;;  %v454_v13 = vld [vmem:[#allocation2 + $0xb8] sm:$0xff]  ;;  %v456_v15 = vld [vmem:[#allocation2 + $0xc8] sm:$0xff] }
  0x47   : > { %v466_v33 = vpack.c.bf16 %v438_v27, %v437_v26  ;;  %v1878_v16 = vld [vmem:[#allocation2 + $0xc4] sm:$0xff]  ;;  %v474_v19 = vpack.c.bf16 %v454_v13, %v453_v12  ;;  %v1880_v20 = vld [vmem:[#allocation2 + $0xd4] sm:$0xff]  ;;  %v475_v26 = vpack.c.bf16 %v456_v15, %v455_v14  ;;  %v4076_v13 = vunpack.c.h.bf16 %v5235_v57 }
  0x48   : > { %v457_v29 = vld [vmem:[#allocation2 + $0xd0] sm:$0xff]  ;;  %v458_v30 = vld [vmem:[#allocation2 + $0xd8] sm:$0xff]  ;;  %v459_v32 = vld [vmem:[#allocation2 + $0xe0] sm:$0xff] }
  0x49   : > { %v461_v44 = vld [vmem:[#allocation2 + $0xf0] sm:$0xff]  ;;  %v5349_v62 = vld [vmem:[%s5666_s3 + $0x8] sm:$0xff]   ;;  %v5356_v63 = vld [vmem:[%s5666_s3 + $0x40] sm:$0xff]  }
  0x4a   : > { %v967_v58 = vld [vmem:[#allocation2 + $0x2a] sm:$0xff]  ;;  %v977_v12 = vld [vmem:[#allocation2 + $0x7a] sm:$0xff]  ;;  %v980_v57 = vld [vmem:[#allocation2 + $0x92] sm:$0xff] }
  0x4b   : > { %4295 = vmatmul.mubr.msk.bf16.gmra.mrb[20].mxu1 %vm199_vm0, %v524_v34  ;;  %v1865_v34 = vld [vmem:[#allocation2 + $0x5c] sm:$0xff]  ;;  %v979_v14 = vld [vmem:[#allocation2 + $0x8a] sm:$0xff] }
  0x4c   : > { %4298 = vmatprep.mubr.msk.bf16.mxu1 %vm199_vm0, %v525_v39 }
  0x4d   : > { %4431 = vmatmul.mubr.msk.bf16.gmra.mrb[20].mxu0 %vm199_vm0, %v1601_v40  ;;  %v441_v40 = vld [vmem:[#allocation2 + $0x50] sm:$0xff] }
  0x4e   : > { %4434 = vmatprep.mubr.msk.bf16.mxu0 %vm199_vm0, %v1602_v41  ;;  %v442_v41 = vld [vmem:[#allocation2 + $0x58] sm:$0xff] }
  0x4f   : > { %v468_v45 = vpack.c.bf16 %v442_v41, %v441_v40  ;;  %v1884_v40 = vld [vmem:[#allocation2 + $0xf4] sm:$0xff]  ;;  %v1885_v41 = vld [vmem:[#allocation2 + $0xfc] sm:$0xff] }
  0x50   : > { %v5326_v43 = vpack.c.bf16 %v1885_v41, %v1884_v40  ;;  %v992_v41 = vld [vmem:[#allocation2 + $0xf2] sm:$0xff] }
  0x53   : > { %4299 = vmatmul.mubr.msk.bf16.gmra.mrb[24].mxu1 %vm199_vm0, %v526_v50  ;;  %v5286_v50 = vpack.c.bf16 %v1869_v47, %v1868_v46  ;;  %v962_v46 = vld [vmem:[#allocation2 + $0x2] sm:$0xff]  ;;  %v963_v47 = vld [vmem:[#allocation2 + $0xa] sm:$0xff] }
  0x54   : > { %4302 = vmatprep.mubr.msk.bf16.mxu1 %vm199_vm0, %v527_v53  ;;  %v448_v53 = vld [vmem:[#allocation2 + $0x88] sm:$0xff] }
  0x55   : > { %4435 = vmatmul.mubr.msk.bf16.gmra.mrb[24].mxu0 %vm199_vm0, %v1603_v54  ;;  %v1870_v54 = vld [vmem:[#allocation2 + $0x84] sm:$0xff]  ;;  %v471_v59 = vpack.c.bf16 %v448_v53, %v447_v31  ;;  %v994_v31 = vpack.c.bf16 %v963_v47, %v962_v46  ;;  %v2453_v46 = vld [vmem:[#allocation2 + $0x2d] sm:$0xff] }
  0x56   : > { %4438 = vmatprep.mubr.msk.bf16.mxu0 %vm199_vm0, %v1604_v56  ;;  %v470_v56 = vpack.c.bf16 %v446_v52, %v445_v51  ;;  %v5294_v60 = vpack.c.bf16 %v1871_v55, %v1870_v54  ;;  %v1887_v51 = vld [vmem:[#allocation2 + $0x10c] sm:$0xff]  ;;  %v965_v55 = vld [vmem:[#allocation2 + $0x1a] sm:$0xff] }
  0x57   : > { %v964_v54 = vld [vmem:[#allocation2 + $0x12] sm:$0xff] }
  0x58   : > { %v5342_v3 = vpack.c.bf16 %v965_v55, %v964_v54  ;;  %v5460_v54 = vld [vmem:[%s5666_s3] sm:$0xff]  }
  0x5b   : > { %4303 = vmatmul.mubr.msk.bf16.gmra.mrb[28].mxu1 %vm199_vm0, %v528_v1  ;;  %v452_v1 = vld [vmem:[#allocation2 + $0xa8] sm:$0xff] }
  0x5c   : > { %4308 = vmatprep.mubr.msk.bf16.mxu1 %vm199_vm0, %v463_v9  ;;  %v1876_v9 = vld [vmem:[#allocation2 + $0xb4] sm:$0xff]  ;;  %v473_v11 = vpack.c.bf16 %v452_v1, %v451_v0  ;;  %v970_v1 = vld [vmem:[#allocation2 + $0x42] sm:$0xff] }
  0x5d   : > { %4439 = vmatmul.mubr.msk.bf16.gmra.mrb[28].mxu0 %vm199_vm0, %v1605_v10  ;;  %v1877_v10 = vld [vmem:[#allocation2 + $0xbc] sm:$0xff] }
  0x5e   : > { %4444 = vmatprep.mubr.msk.bf16.mxu0 %vm199_vm0, %v1888_v4  ;;  %v5304_v4 = vpack.c.bf16 %v1875_v7, %v1874_v6  ;;  %v5306_v5 = vpack.c.bf16 %v1877_v10, %v1876_v9  ;;  %v969_v0 = vld [vmem:[#allocation2 + $0x3a] sm:$0xff]  ;;  %v971_v6 = vld [vmem:[#allocation2 + $0x4a] sm:$0xff] }
  0x5f   : > { %v975_v9 = vld [vmem:[#allocation2 + $0x6a] sm:$0xff] }
  0x63   : > { %4309 = vmatmul.mubr.msk.bf16.vlgmr.msra.gmra.mrb[0].mxu1 %vm199_vm0, %v464_v18  ;;  %v1879_v18 = vld [vmem:[#allocation2 + $0xcc] sm:$0xff] }
  0x64   : > { %4341 = vmatpush3.bf16.msra.mxu1 %v5142_v36  ;;  %4312 = vmatprep.mubr.msk.bf16.mxu1 %vm199_vm0, %v465_v21  ;;  %v1864_v36 = vld [vmem:[#allocation2 + $0x54] sm:$0xff]  ;;  %v1881_v21 = vld [vmem:[#allocation2 + $0xdc] sm:$0xff]  ;;  %v5314_v27 = vpack.c.bf16 %v1879_v18, %v1878_v16 }
  0x65   : > { %4445 = vmatmul.mubr.msk.bf16.vlgmr.msra.gmra.mrb[0].mxu0 %vm199_vm0, %v5250_v22  ;;  %4374 = vmatprep.subr.bf16.mxu1 %v5255_v23  ;;  %v5276_v39 = vpack.c.bf16 %v1865_v34, %v1864_v36  ;;  %v5316_v28 = vpack.c.bf16 %v1881_v21, %v1880_v20  ;;  %v1882_v36 = vld [vmem:[#allocation2 + $0xe4] sm:$0xff]  ;;  %v1883_v34 = vld [vmem:[#allocation2 + $0xec] sm:$0xff]  ;;  %v4948_v16 = vld [vmem:[%s5664_s1] ss:$0 sm:$0xff] }
  0x66   : > { %4448 = vmatprep.mubr.msk.bf16.mxu0 %vm199_vm0, %v5257_v24  ;;  %4477 = vmatpush3.bf16.msra.mxu0 %v5147_v37  ;;  %v443_v37 = vld [vmem:[#allocation2 + $0x60] sm:$0xff]  ;;  %v423_v18 = vmul.f32 %v4948_v16, %v4076_v13  ;;  %v983_v21 = vld [vmem:[#allocation2 + $0xaa] sm:$0xff] }
  0x67   : > { %4510 = vmatprep.subr.bf16.mxu0 %v5263_v25  ;;  %v469_v48 = vpack.c.bf16 %v444_v42, %v443_v37  ;;  %v5324_v42 = vpack.c.bf16 %v1883_v34, %v1882_v36  ;;  %v982_v20 = vld [vmem:[#allocation2 + $0xa2] sm:$0xff]  ;;  %v988_v36 = vld [vmem:[#allocation2 + $0xd2] sm:$0xff]  ;;  %v989_v34 = vld [vmem:[#allocation2 + $0xda] sm:$0xff] }
  0x68   : > { %v2473_v13 = vld [vmem:[#allocation2 + $0xcd] sm:$0xff]  ;;  %v2476_v16 = vld [vmem:[#allocation2 + $0xe5] sm:$0xff] }
  0x6b   : > { %4313 = vmatmul.mubr.msk.bf16.gmra.mrb[4].mxu1 %vm199_vm0, %v466_v33  ;;  %v460_v33 = vld [vmem:[#allocation2 + $0xe8] sm:$0xff] }
  0x6c   : > { %4316 = vmatprep.mubr.msk.bf16.mxu1 %vm199_vm0, %v467_v35  ;;  %v476_v35 = vpack.c.bf16 %v458_v30, %v457_v29  ;;  %v477_v37 = vpack.c.bf16 %v460_v33, %v459_v32  ;;  %v984_v29 = vld [vmem:[#allocation2 + $0xb2] sm:$0xff]  ;;  %v985_v30 = vld [vmem:[#allocation2 + $0xba] sm:$0xff]  ;;  %v987_v32 = vld [vmem:[#allocation2 + $0xca] sm:$0xff] }
  0x6d   : > { %4449 = vmatmul.mubr.msk.bf16.gmra.mrb[4].mxu0 %vm199_vm0, %v5274_v38 }
  0x6e   : > { %4452 = vmatprep.mubr.msk.bf16.mxu0 %vm199_vm0, %v5276_v39 }
  0x73   : > { %4317 = vmatmul.mubr.msk.bf16.gmra.mrb[8].mxu1 %vm199_vm0, %v468_v45  ;;  %v462_v45 = vld [vmem:[#allocation2 + $0xf8] sm:$0xff] }
  0x74   : > { %4320 = vmatprep.mubr.msk.bf16.mxu1 %vm199_vm0, %v469_v48  ;;  %v1886_v48 = vld [vmem:[#allocation2 + $0x104] sm:$0xff]  ;;  %v478_v52 = vpack.c.bf16 %v462_v45, %v461_v44 }
  0x75   : > { %4453 = vmatmul.mubr.msk.bf16.gmra.mrb[8].mxu0 %vm199_vm0, %v5284_v49  ;;  %v5334_v53 = vpack.c.bf16 %v1887_v51, %v1886_v48  ;;  %v2452_v45 = vld [vmem:[#allocation2 + $0x25] sm:$0xff]  ;;  %v2455_v51 = vld [vmem:[#allocation2 + $0x3d] sm:$0xff] }
  0x76   : > { %4456 = vmatprep.mubr.msk.bf16.mxu0 %vm199_vm0, %v5286_v50  ;;  %v2484_v48 = vpack.c.bf16 %v2453_v46, %v2452_v45  ;;  %v2753_v45 = vld [vmem:[#allocation2 + $0x3e] sm:$0xff] }
  0x7b   : > { %4321 = vmatmul.mubr.msk.bf16.gmra.mrb[12].mxu1 %vm199_vm0, %v470_v56  ;;  %v966_v56 = vld [vmem:[#allocation2 + $0x22] sm:$0xff] }
  0x7c   : > { %4324 = vmatprep.mubr.msk.bf16.mxu1 %vm199_vm0, %v471_v59  ;;  %v5344_v59 = vpack.c.bf16 %v967_v58, %v966_v56  ;;  %v2458_v56 = vld [vmem:[#allocation2 + $0x55] sm:$0xff]  ;;  %v2459_v58 = vld [vmem:[#allocation2 + $0x5d] sm:$0xff] }
  0x7d   : > { %4457 = vmatmul.mubr.msk.bf16.gmra.mrb[12].mxu0 %vm199_vm0, %v5294_v60 }
  0x7e   : > { %4460 = vmatprep.mubr.msk.bf16.mxu0 %vm199_vm0, %v5296_v61 }
  0x83   : > { %4325 = vmatmul.mubr.msk.bf16.gmra.mrb[16].mxu1 %vm199_vm0, %v472_v8  ;;  %v973_v8 = vld [vmem:[#allocation2 + $0x5a] sm:$0xff] }
  0x84   : > { %4328 = vmatprep.mubr.msk.bf16.mxu1 %vm199_vm0, %v473_v11  ;;  %v976_v11 = vld [vmem:[#allocation2 + $0x72] sm:$0xff] }
  0x85   : > { %4461 = vmatmul.mubr.msk.bf16.gmra.mrb[16].mxu0 %vm199_vm0, %v5304_v4 }
  0x86   : > { %4464 = vmatprep.mubr.msk.bf16.mxu0 %vm199_vm0, %v5306_v5 }
  0x8b   : > { %4329 = vmatmul.mubr.msk.bf16.gmra.mrb[20].mxu1 %vm199_vm0, %v474_v19  ;;  %v425_v19 = vadd.f32 %v5080_v17, %v423_v18  ;;  %v2477_v18 = vld [vmem:[#allocation2 + $0xed] sm:$0xff] }
  0x8c   : > { %4332 = vmatprep.mubr.msk.bf16.mxu1 %vm199_vm0, %v475_v26  ;;  %v5412_v26 = vpack.c.bf16 %v983_v21, %v982_v20  ;;  %v2480_v20 = vld [vmem:[#allocation2 + $0x105] sm:$0xff]  ;;  %v2481_v21 = vld [vmem:[#allocation2 + $0x10d] sm:$0xff] }
  0x8d   : > { %4465 = vmatmul.mubr.msk.bf16.gmra.mrb[20].mxu0 %vm199_vm0, %v5314_v27 }
  0x8e   : > { %4468 = vmatprep.mubr.msk.bf16.mxu0 %vm199_vm0, %v5316_v28 }
  0x93   : > { %4333 = vmatmul.mubr.msk.bf16.gmra.mrb[24].mxu1 %vm199_vm0, %v476_v35  ;;  %v991_v35 = vld [vmem:[#allocation2 + $0xea] sm:$0xff] }
  0x94   : > { %4336 = vmatprep.mubr.msk.bf16.mxu1 %vm199_vm0, %v477_v37  ;;  %v993_v37 = vld [vmem:[#allocation2 + $0xfa] sm:$0xff] }
  0x95   : > { %4469 = vmatmul.mubr.msk.bf16.gmra.mrb[24].mxu0 %vm199_vm0, %v5324_v42  ;;  %v5446_v44 = vpack.c.bf16 %v993_v37, %v992_v41  ;;  %v3091_v37 = vld [vmem:[#allocation2 + $0x119] sm:$0xff] }
  0x96   : > { %4472 = vmatprep.mubr.msk.bf16.mxu0 %vm199_vm0, %v5326_v43 }
  0x9b   : > { %4337 = vmatmul.mubr.msk.bf16.gmra.mrb[28].mxu1 %vm199_vm0, %v478_v52  ;;  %v2456_v52 = vld [vmem:[#allocation2 + $0x45] sm:$0xff] }
  0x9c   : > { %4342 = vmatprep.mubr.msk.bf16.mxu1 %vm199_vm0, %v994_v31  ;;  %v2457_v31 = vld [vmem:[#allocation2 + $0x4d] sm:$0xff] }
  0x9d   : > { %4473 = vmatmul.mubr.msk.bf16.gmra.mrb[28].mxu0 %vm199_vm0, %v5334_v53  ;;  %v2486_v55 = vpack.c.bf16 %v2457_v31, %v2456_v52  ;;  %v4941_v31 = vld [vmem:[%s5666_s3 + $0x10] sm:$0xff]  }
  0x9e   : > { %4478 = vmatprep.mubr.msk.bf16.mxu0 %vm199_vm0, %v5250_v22  ;;  %v968_v22 = vld [vmem:[#allocation2 + $0x32] sm:$0xff] }
  0x9f   : > { %v5367_v7 = vpack.c.bf16 %v969_v0, %v968_v22  ;;  %v2487_v22 = vpack.c.bf16 %v2459_v58, %v2458_v56  ;;  %v2757_v56 = vld [vmem:[#allocation2 + $0x5e] sm:$0xff]  ;;  %v2758_v58 = vld [vmem:[#allocation2 + $0x66] sm:$0xff] }
  0xa3   : > { %4343 = vmatmul.mubr.msk.bf16.vlgmr.msra.gmra.mrb[0].mxu1 %vm199_vm0, %v5342_v3 }
  0xa4   : > { %4375 = vmatpush3.bf16.msra.mxu1 %v5255_v23  ;;  %4346 = vmatprep.mubr.msk.bf16.mxu1 %vm199_vm0, %v5344_v59  ;;  %v5370_v23 = vpack.c.bf16 %v971_v6, %v970_v1  ;;  %v2464_v1 = vld [vmem:[#allocation2 + $0x85] sm:$0xff]  ;;  %v2465_v6 = vld [vmem:[#allocation2 + $0x8d] sm:$0xff] }
  0xa5   : > { %4479 = vmatmul.mubr.msk.bf16.vlgmr.msra.gmra.mrb[0].mxu0 %vm199_vm0, %v5257_v24  ;;  %4578 = vmatprep.subr.bf16.mxu1 %v5349_v62  ;;  %v972_v24 = vld [vmem:[#allocation2 + $0x52] sm:$0xff] }
  0xa6   : > { %4482 = vmatprep.mubr.msk.bf16.mxu0 %vm199_vm0, %v5274_v38  ;;  %4511 = vmatpush3.bf16.msra.mxu0 %v5263_v25  ;;  %v974_v38 = vld [vmem:[#allocation2 + $0x62] sm:$0xff]  ;;  %v5380_v25 = vpack.c.bf16 %v973_v8, %v972_v24 }
  0xa7   : > { %4544 = vmatprep.subr.bf16.mxu0 %v5356_v63  ;;  %v5382_v10 = vpack.c.bf16 %v975_v9, %v974_v38  ;;  %v2467_v24 = vld [vmem:[#allocation2 + $0x9d] sm:$0xff]  ;;  %v2468_v8 = vld [vmem:[#allocation2 + $0xa5] sm:$0xff]  ;;  %v2469_v38 = vld [vmem:[#allocation2 + $0xad] sm:$0xff] }
  0xab   : > { %4347 = vmatmul.mubr.msk.bf16.gmra.mrb[4].mxu1 %vm199_vm0, %v5367_v7 }
  0xac   : > { %4350 = vmatprep.mubr.msk.bf16.mxu1 %vm199_vm0, %v5370_v23 }
  0xad   : > { %4483 = vmatmul.mubr.msk.bf16.gmra.mrb[4].mxu0 %vm199_vm0, %v5276_v39  ;;  %v978_v39 = vld [vmem:[#allocation2 + $0x82] sm:$0xff] }
  0xae   : > { %4486 = vmatprep.mubr.msk.bf16.mxu0 %vm199_vm0, %v5284_v49  ;;  %v5393_v49 = vpack.c.bf16 %v977_v12, %v976_v11  ;;  %v5395_v15 = vpack.c.bf16 %v979_v14, %v978_v39  ;;  %v2471_v11 = vld [vmem:[#allocation2 + $0xbd] sm:$0xff]  ;;  %v2472_v12 = vld [vmem:[#allocation2 + $0xc5] sm:$0xff] }
  0xaf   : > { %v2494_v14 = vpack.c.bf16 %v2473_v13, %v2472_v12  ;;  %v2767_v12 = vld [vmem:[#allocation2 + $0xae] sm:$0xff] }
  0xb3   : > { %4351 = vmatmul.mubr.msk.bf16.gmra.mrb[8].mxu1 %vm199_vm0, %v5380_v25 }
  0xb4   : > { %4354 = vmatprep.mubr.msk.bf16.mxu1 %vm199_vm0, %v5382_v10 }
  0xb5   : > { %4487 = vmatmul.mubr.msk.bf16.gmra.mrb[8].mxu0 %vm199_vm0, %v5286_v50  ;;  %v981_v50 = vld [vmem:[#allocation2 + $0x9a] sm:$0xff] }
  0xb6   : > { %4490 = vmatprep.mubr.msk.bf16.mxu0 %vm199_vm0, %v5294_v60  ;;  %v427_v60 = vmax.f32 %v425_v19, 0.0  ;;  %v5410_v17 = vpack.c.bf16 %v981_v50, %v980_v57  ;;  %v2496_v57 = vpack.c.bf16 %v2477_v18, %v2476_v16  ;;  %v2478_v50 = vld [vmem:[#allocation2 + $0xf5] sm:$0xff]  ;;  %v2770_v16 = vld [vmem:[#allocation2 + $0xc6] sm:$0xff] }
  0xb7   : > { %v2771_v18 = vld [vmem:[#allocation2 + $0xce] sm:$0xff] }
  0xb8   : > { %429 = vst.msk [vmem:[#allocation2 + $0x129] sm:$0xff] %vm199_vm0, %v427_v60  ;;  %v2479_v60 = vld [vmem:[#allocation2 + $0xfd] sm:$0xff] }
  0xbb   : > { %4355 = vmatmul.mubr.msk.bf16.gmra.mrb[12].mxu1 %vm199_vm0, %v5393_v49 }
  0xbc   : > { %4358 = vmatprep.mubr.msk.bf16.mxu1 %vm199_vm0, %v5395_v15 }
  0xbd   : > { %4491 = vmatmul.mubr.msk.bf16.gmra.mrb[12].mxu0 %vm199_vm0, %v5296_v61  ;;  %v986_v61 = vld [vmem:[#allocation2 + $0xc2] sm:$0xff] }
  0xbe   : > { %4494 = vmatprep.mubr.msk.bf16.mxu0 %vm199_vm0, %v5304_v4  ;;  %v5422_v4 = vpack.c.bf16 %v985_v30, %v984_v29  ;;  %v5424_v33 = vpack.c.bf16 %v987_v32, %v986_v61  ;;  %v1290_v29 = vld [vmem:[#allocation2 + $0x102] sm:$0xff]  ;;  %v1291_v30 = vld [vmem:[#allocation2 + $0x10a] sm:$0xff] }
  0xbf   : > { %v3088_v61 = vld [vmem:[#allocation2 + $0x101] sm:$0xff]  ;;  %v3089_v32 = vld [vmem:[#allocation2 + $0x109] sm:$0xff] }
  0xc3   : > { %4359 = vmatmul.mubr.msk.bf16.gmra.mrb[16].mxu1 %vm199_vm0, %v5410_v17 }
  0xc4   : > { %4362 = vmatprep.mubr.msk.bf16.mxu1 %vm199_vm0, %v5412_v26 }
  0xc5   : > { %4495 = vmatmul.mubr.msk.bf16.gmra.mrb[16].mxu0 %vm199_vm0, %v5306_v5  ;;  %v990_v5 = vld [vmem:[#allocation2 + $0xe2] sm:$0xff] }
  0xc6   : > { %4498 = vmatprep.mubr.msk.bf16.mxu0 %vm199_vm0, %v5314_v27  ;;  %v5434_v27 = vpack.c.bf16 %v989_v34, %v988_v36  ;;  %v5436_v40 = vpack.c.bf16 %v991_v35, %v990_v5  ;;  %v1307_v36 = vpack.c.bf16 %v1291_v30, %v1290_v29  ;;  %v2750_v34 = vld [vmem:[#allocation2 + $0x26] sm:$0xff]  ;;  %v2751_v5 = vld [vmem:[#allocation2 + $0x2e] sm:$0xff]  ;;  %v3092_v35 = vpack.c.bf16 %v3089_v32, %v3088_v61  ;;  %v2772_v30 = vld [vmem:[#allocation2 + $0xd6] sm:$0xff] }
  0xc7   : > { %v2782_v41 = vpack.c.bf16 %v2751_v5, %v2750_v34  ;;  %v4944_v29 = vld [vmem:[%s5666_s3 + $0x28] sm:$0xff]   ;;  %v2773_v61 = vld [vmem:[#allocation2 + $0xde] sm:$0xff] }
  0xc8   : > { %v2774_v32 = vld [vmem:[#allocation2 + $0xe6] sm:$0xff] }
  0xc9   : > { %v3366_v34 = vld [vmem:[#allocation2 + $0x123] sm:$0xff]  ;;  %v3367_v5 = vld [vmem:[#allocation2 + $0x12b] sm:$0xff] }
  0xcb   : > { %4363 = vmatmul.mubr.msk.bf16.gmra.mrb[20].mxu1 %vm199_vm0, %v5422_v4 }
  0xcc   : > { %4366 = vmatprep.mubr.msk.bf16.mxu1 %vm199_vm0, %v5424_v33 }
  0xcd   : > { %4499 = vmatmul.mubr.msk.bf16.gmra.mrb[20].mxu0 %vm199_vm0, %v5316_v28  ;;  %v2184_v28 = vld [vmem:[#allocation2 + $0x114] sm:$0xff] }
  0xce   : > { %4502 = vmatprep.mubr.msk.bf16.mxu0 %vm199_vm0, %v5324_v42  ;;  %v2185_v42 = vld [vmem:[#allocation2 + $0x11c] sm:$0xff] }
  0xcf   : > { %v5448_v47 = vpack.c.bf16 %v2185_v42, %v2184_v28  ;;  %v3080_v28 = vld [vmem:[#allocation2 + $0x100] sm:$0xff]  ;;  %v3081_v42 = vld [vmem:[#allocation2 + $0x108] sm:$0xff] }
  0xd3   : > { %4367 = vmatmul.mubr.msk.bf16.gmra.mrb[24].mxu1 %vm199_vm0, %v5434_v27 }
  0xd4   : > { %4370 = vmatprep.mubr.msk.bf16.mxu1 %vm199_vm0, %v5436_v40 }
  0xd5   : > { %4503 = vmatmul.mubr.msk.bf16.gmra.mrb[24].mxu0 %vm199_vm0, %v5326_v43  ;;  %v2454_v43 = vld [vmem:[#allocation2 + $0x35] sm:$0xff] }
  0xd6   : > { %4506 = vmatprep.mubr.msk.bf16.mxu0 %vm199_vm0, %v5334_v53  ;;  %v2485_v53 = vpack.c.bf16 %v2455_v51, %v2454_v43  ;;  %v2755_v43 = vld [vmem:[#allocation2 + $0x4e] sm:$0xff]  ;;  %v3084_v51 = vpack.c.bf16 %v3081_v42, %v3080_v28 }
  0xd7   : > { %v4945_v42 = vld [vmem:[%s5666_s3 + $0x30] sm:$0xff]  }
  0xdb   : > { %4371 = vmatmul.mubr.msk.bf16.gmra.mrb[28].mxu1 %vm199_vm0, %v5446_v44 }
  0xdc   : > { %4376 = vmatprep.mubr.msk.bf16.mxu1 %vm199_vm0, %v5342_v3  ;;  %v2460_v3 = vld [vmem:[#allocation2 + $0x65] sm:$0xff] }
  0xdd   : > { %4507 = vmatmul.mubr.msk.bf16.gmra.mrb[28].mxu0 %vm199_vm0, %v5448_v47  ;;  %v2488_v0 = vpack.c.bf16 %v2461_v2, %v2460_v3  ;;  %v2759_v3 = vld [vmem:[#allocation2 + $0x6e] sm:$0xff] }
  0xde   : > { %4512 = vmatprep.mubr.msk.bf16.mxu0 %vm199_vm0, %v2484_v48  ;;  %v2754_v48 = vld [vmem:[#allocation2 + $0x46] sm:$0xff]  ;;  %v3082_v2 = vld [vmem:[#allocation2 + $0x110] sm:$0xff] }
  0xe3   : > { %4377 = vmatmul.mubr.msk.bf16.vlgmr.msra.gmra.mrb[0].mxu1 %vm199_vm0, %v5344_v59  ;;  %v2462_v59 = vld [vmem:[#allocation2 + $0x75] sm:$0xff] }
  0xe4   : > { %4579 = vmatpush3.bf16.msra.mxu1 %v5349_v62  ;;  %4380 = vmatprep.mubr.msk.bf16.mxu1 %vm199_vm0, %v5367_v7  ;;  %v2463_v62 = vld [vmem:[#allocation2 + $0x7d] sm:$0xff] }
  0xe5   : > { %4513 = vmatmul.mubr.msk.bf16.vlgmr.msra.gmra.mrb[0].mxu0 %vm199_vm0, %v2485_v53  ;;  %4584 = vmatprep.subr.bf16.mxu1 %v5460_v54  ;;  %v2489_v7 = vpack.c.bf16 %v2463_v62, %v2462_v59  ;;  %v2784_v53 = vpack.c.bf16 %v2755_v43, %v2754_v48  ;;  %v2786_v59 = vpack.c.bf16 %v2759_v3, %v2758_v58  ;;  %v3439_v48 = vld [vmem:[#allocation2 + $0x124] sm:$0xff]  ;;  %v3440_v43 = vld [vmem:[#allocation2 + $0x12c] sm:$0xff] }
  0xe6   : > { %4516 = vmatprep.mubr.msk.bf16.mxu0 %vm199_vm0, %v2486_v55  ;;  %4545 = vmatpush3.bf16.msra.mxu0 %v5356_v63  ;;  %v2490_v63 = vpack.c.bf16 %v2465_v6, %v2464_v1  ;;  %v2756_v55 = vld [vmem:[#allocation2 + $0x56] sm:$0xff]  ;;  %v2761_v6 = vld [vmem:[#allocation2 + $0x7e] sm:$0xff] }
  0xe7   : > { %v2760_v1 = vld [vmem:[#allocation2 + $0x76] sm:$0xff] }
  0xeb   : > { %4381 = vmatmul.mubr.msk.bf16.gmra.mrb[4].mxu1 %vm199_vm0, %v5370_v23  ;;  %v2466_v23 = vld [vmem:[#allocation2 + $0x95] sm:$0xff] }
  0xec   : > { %4384 = vmatprep.mubr.msk.bf16.mxu1 %vm199_vm0, %v5380_v25  ;;  %v2491_v9 = vpack.c.bf16 %v2467_v24, %v2466_v23  ;;  %v2492_v25 = vpack.c.bf16 %v2469_v38, %v2468_v8  ;;  %v2787_v23 = vpack.c.bf16 %v2761_v6, %v2760_v1  ;;  %v3220_v8 = vld [vmem:[#allocation2 + $0x112] sm:$0xff]  ;;  %v3221_v38 = vld [vmem:[#allocation2 + $0x11a] sm:$0xff] }
  0xed   : > { %4517 = vmatmul.mubr.msk.bf16.gmra.mrb[4].mxu0 %vm199_vm0, %v2487_v22  ;;  %v3083_v22 = vld [vmem:[#allocation2 + $0x118] sm:$0xff] }
  0xee   : > { %4520 = vmatprep.mubr.msk.bf16.mxu0 %vm199_vm0, %v2488_v0  ;;  %v2785_v0 = vpack.c.bf16 %v2757_v56, %v2756_v55  ;;  %v3085_v62 = vpack.c.bf16 %v3083_v22, %v3082_v2  ;;  %v3583_v55 = vld [vmem:[#allocation2 + $0x125] sm:$0xff]  ;;  %v3584_v56 = vld [vmem:[#allocation2 + $0x12d] sm:$0xff]  ;;  %v3585_v22 = vld [vmem:[#allocation2 + $0x135] sm:$0xff] }
  0xef   : > { %v3587_v3 = vpack.c.bf16 %v3584_v56, %v3583_v55  ;;  %v4947_v2 = vld [vmem:[%s5666_s3 + $0x40] sm:$0xff]   ;;  %v3658_v6 = vld [vmem:[#allocation2 + $0x136] sm:$0xff] }
  0xf3   : > { %4385 = vmatmul.mubr.msk.bf16.gmra.mrb[8].mxu1 %vm199_vm0, %v5382_v10  ;;  %v2470_v10 = vld [vmem:[#allocation2 + $0xb5] sm:$0xff] }
  0xf4   : > { %4388 = vmatprep.mubr.msk.bf16.mxu1 %vm199_vm0, %v5393_v49  ;;  %v2493_v39 = vpack.c.bf16 %v2471_v11, %v2470_v10  ;;  %v2474_v49 = vld [vmem:[#allocation2 + $0xd5] sm:$0xff]  ;;  %v3223_v10 = vpack.c.bf16 %v3221_v38, %v3220_v8  ;;  %v2766_v11 = vld [vmem:[#allocation2 + $0xa6] sm:$0xff] }
  0xf5   : > { %4521 = vmatmul.mubr.msk.bf16.gmra.mrb[8].mxu0 %vm199_vm0, %v2489_v7  ;;  %v2762_v7 = vld [vmem:[#allocation2 + $0x86] sm:$0xff] }
  0xf6   : > { %4524 = vmatprep.mubr.msk.bf16.mxu0 %vm199_vm0, %v2490_v63  ;;  %v2763_v63 = vld [vmem:[#allocation2 + $0x8e] sm:$0xff] }
  0xf7   : > { %v2788_v24 = vpack.c.bf16 %v2763_v63, %v2762_v7  ;;  %v3659_v7 = vld [vmem:[#allocation2 + $0x13e] sm:$0xff] }
  0xf8   : > { %v3661_v63 = vpack.c.bf16 %v3659_v7, %v3658_v6 }
  0xfb   : > { %4389 = vmatmul.mubr.msk.bf16.gmra.mrb[12].mxu1 %vm199_vm0, %v5395_v15  ;;  %v2475_v15 = vld [vmem:[#allocation2 + $0xdd] sm:$0xff] }
  0xfc   : > { %4392 = vmatprep.mubr.msk.bf16.mxu1 %vm199_vm0, %v5410_v17  ;;  %v2495_v19 = vpack.c.bf16 %v2475_v15, %v2474_v49  ;;  %v2497_v17 = vpack.c.bf16 %v2479_v60, %v2478_v50  ;;  %v2768_v49 = vld [vmem:[#allocation2 + $0xb6] sm:$0xff]  ;;  %v2769_v15 = vld [vmem:[#allocation2 + $0xbe] sm:$0xff] }
  0xfd   : > { %4525 = vmatmul.mubr.msk.bf16.gmra.mrb[12].mxu0 %vm199_vm0, %v2491_v9  ;;  %v2764_v9 = vld [vmem:[#allocation2 + $0x96] sm:$0xff]  ;;  %v2791_v50 = vpack.c.bf16 %v2769_v15, %v2768_v49 }
  0xfe   : > { %4528 = vmatprep.mubr.msk.bf16.mxu0 %vm199_vm0, %v2492_v25  ;;  %v2765_v25 = vld [vmem:[#allocation2 + $0x9e] sm:$0xff]  ;;  %v3364_v60 = vld [vmem:[#allocation2 + $0x113] sm:$0xff] }
  0xff   : > { %v2789_v13 = vpack.c.bf16 %v2765_v25, %v2764_v9 }
 0x103   : > { %4393 = vmatmul.mubr.msk.bf16.gmra.mrb[16].mxu1 %vm199_vm0, %v5412_v26  ;;  %v2498_v26 = vpack.c.bf16 %v2481_v21, %v2480_v20  ;;  %v3365_v20 = vld [vmem:[#allocation2 + $0x11b] sm:$0xff]  ;;  %v2792_v21 = vpack.c.bf16 %v2771_v18, %v2770_v16 }
 0x104   : > { %4396 = vmatprep.mubr.msk.bf16.mxu1 %vm199_vm0, %v5422_v4  ;;  %v2482_v4 = vld [vmem:[#allocation2 + $0x115] sm:$0xff] }
 0x105   : > { %4529 = vmatmul.mubr.msk.bf16.gmra.mrb[16].mxu0 %vm199_vm0, %v2493_v39  ;;  %v4943_v39 = vld [vmem:[%s5666_s3 + $0x20] sm:$0xff]  }
 0x106   : > { %4532 = vmatprep.mubr.msk.bf16.mxu0 %vm199_vm0, %v2494_v14  ;;  %v2790_v14 = vpack.c.bf16 %v2767_v12, %v2766_v11 }
 0x10b   : > { %4397 = vmatmul.mubr.msk.bf16.gmra.mrb[20].mxu1 %vm199_vm0, %v5424_v33  ;;  %v2483_v33 = vld [vmem:[#allocation2 + $0x11d] sm:$0xff] }
 0x10c   : > { %4400 = vmatprep.mubr.msk.bf16.mxu1 %vm199_vm0, %v5434_v27  ;;  %v2499_v27 = vpack.c.bf16 %v2483_v33, %v2482_v4  ;;  %v2775_v4 = vld [vmem:[#allocation2 + $0xee] sm:$0xff]  ;;  %v2793_v33 = vpack.c.bf16 %v2773_v61, %v2772_v30 }
 0x10d   : > { %4533 = vmatmul.mubr.msk.bf16.gmra.mrb[20].mxu0 %vm199_vm0, %v2495_v19  ;;  %v3293_v19 = vld [vmem:[#allocation2 + $0x122] sm:$0xff] }
 0x10e   : > { %4536 = vmatprep.mubr.msk.bf16.mxu0 %vm199_vm0, %v2496_v57  ;;  %v3294_v57 = vld [vmem:[#allocation2 + $0x12a] sm:$0xff] }
 0x113   : > { %4401 = vmatmul.mubr.msk.bf16.gmra.mrb[24].mxu1 %vm199_vm0, %v5436_v40  ;;  %v3090_v40 = vld [vmem:[#allocation2 + $0x111] sm:$0xff] }
 0x114   : > { %4404 = vmatprep.mubr.msk.bf16.mxu1 %vm199_vm0, %v5446_v44  ;;  %v2752_v44 = vld [vmem:[#allocation2 + $0x36] sm:$0xff]  ;;  %v3093_v46 = vpack.c.bf16 %v3091_v37, %v3090_v40  ;;  %v2778_v40 = vld [vmem:[#allocation2 + $0x106] sm:$0xff]  ;;  %v2779_v37 = vld [vmem:[#allocation2 + $0x10e] sm:$0xff] }
 0x115   : > { %4537 = vmatmul.mubr.msk.bf16.gmra.mrb[24].mxu0 %vm199_vm0, %v2497_v17  ;;  %v2783_v52 = vpack.c.bf16 %v2753_v45, %v2752_v44  ;;  %v3296_v17 = vpack.c.bf16 %v3294_v57, %v3293_v19  ;;  %v2796_v44 = vpack.c.bf16 %v2779_v37, %v2778_v40  ;;  %v2780_v45 = vld [vmem:[#allocation2 + $0x116] sm:$0xff] }
 0x116   : > { %4540 = vmatprep.mubr.msk.bf16.mxu0 %vm199_vm0, %v2498_v26  ;;  %v3368_v26 = vpack.c.bf16 %v3365_v20, %v3364_v60 }
 0x11b   : > { %4405 = vmatmul.mubr.msk.bf16.gmra.mrb[28].mxu1 %vm199_vm0, %v1307_v36 }
 0x11c   : > { %4580 = vmatprep.mubr.msk.bf16.mxu1 %vm199_vm0, %v3092_v35  ;;  %v2776_v35 = vld [vmem:[#allocation2 + $0xf6] sm:$0xff] }
 0x11d   : > { %4541 = vmatmul.mubr.msk.bf16.gmra.mrb[28].mxu0 %vm199_vm0, %v2499_v27  ;;  %v2777_v27 = vld [vmem:[#allocation2 + $0xfe] sm:$0xff] }
 0x11e   : > { %4546 = vmatprep.mubr.msk.bf16.mxu0 %vm199_vm0, %v2782_v41  ;;  %v3369_v41 = vpack.c.bf16 %v3367_v5, %v3366_v34  ;;  %v2795_v28 = vpack.c.bf16 %v2777_v27, %v2776_v35 }
 0x123   : > { %4581 = vmatmul.mubr.msk.bf16.vlgmr.msra.gmra.mrb[32].mxu1 %vm199_vm0, %v3093_v46  ;;  %v2781_v46 = vld [vmem:[#allocation2 + $0x11e] sm:$0xff] }
 0x124   : > { %4585 = vmatpush3.bf16.msra.mxu1 %v5460_v54  ;;  %4586 = vmatprep.mubr.msk.bf16.mxu1 %vm199_vm0, %v3084_v51  ;;  %v4942_v54 = vld [vmem:[%s5666_s3 + $0x18] sm:$0xff]   ;;  %v2797_v51 = vpack.c.bf16 %v2781_v46, %v2780_v45 }
 0x125   : > { %4547 = vmatmul.mubr.msk.bf16.vlgmr.msra.gmra.mrb[0].mxu0 %vm199_vm0, %v2783_v52  ;;  %4590 = vmatprep.subr.bf16.mxu1 %v4941_v31  ;;  %v3442_v52 = vpack.c.bf16 %v3440_v43, %v3439_v48 }
 0x126   : > { %4550 = vmatprep.mubr.msk.bf16.mxu0 %vm199_vm0, %v2784_v53  ;;  %v3513_v53 = vld [vmem:[#allocation2 + $0x13c] sm:$0xff] }
 0x12d   : > { %4551 = vmatmul.mubr.msk.bf16.gmra.mrb[4].mxu0 %vm199_vm0, %v2785_v0  ;;  %v3586_v0 = vld [vmem:[#allocation2 + $0x13d] sm:$0xff] }
 0x12e   : > { %4554 = vmatprep.mubr.msk.bf16.mxu0 %vm199_vm0, %v2786_v59  ;;  %v3656_v59 = vld [vmem:[#allocation2 + $0x126] sm:$0xff] }
 0x12f   : > { %4587 = vmatmul.mubr.msk.bf16.vlgmr.msra.gmra.mrb[32].mxu1 %vm199_vm0, %v3085_v62  ;;  %v3657_v62 = vld [vmem:[#allocation2 + $0x12e] sm:$0xff] }
 0x130   : > { %4591 = vmatpush3.bf16.msra.mxu1 %v4941_v31  ;;  %4592 = vmatprep.mubr.msk.bf16.mxu1 %vm199_vm0, %v1307_v36  ;;  %v2794_v36 = vpack.c.bf16 %v2775_v4, %v2774_v32  ;;  %v4946_v31 = vld [vmem:[%s5666_s3 + $0x38] sm:$0xff]   ;;  %v3660_v1 = vpack.c.bf16 %v3657_v62, %v3656_v59 }
 0x131   : > { %4596 = vmatprep.subr.bf16.mxu1 %v4942_v54 }
 0x135   : > { %4555 = vmatmul.mubr.msk.bf16.gmra.mrb[8].mxu0 %vm199_vm0, %v2787_v23 }
 0x136   : > { %4558 = vmatprep.mubr.msk.bf16.mxu0 %vm199_vm0, %v2788_v24 }
 0x13b   : > { %4593 = vmatmul.mubr.msk.bf16.vlgmr.msra.gmra.mrb[32].mxu1 %vm199_vm0, %v3223_v10 }
 0x13c   : > { %4597 = vmatpush3.bf16.msra.mxu1 %v4942_v54  ;;  %4598 = vmatprep.mubr.msk.bf16.mxu1 %vm199_vm0, %v3223_v10  ;;  %v3588_v54 = vpack.c.bf16 %v3586_v0, %v3585_v22 }
 0x13d   : > { %4559 = vmatmul.mubr.msk.bf16.gmra.mrb[12].mxu0 %vm199_vm0, %v2789_v13  ;;  %4602 = vmatprep.subr.bf16.mxu1 %v4943_v39 }
 0x13e   : > { %4562 = vmatprep.mubr.msk.bf16.mxu0 %vm199_vm0, %v2790_v14 }
 0x145   : > { %4563 = vmatmul.mubr.msk.bf16.gmra.mrb[16].mxu0 %vm199_vm0, %v2791_v50 }
 0x146   : > { %4566 = vmatprep.mubr.msk.bf16.mxu0 %vm199_vm0, %v2792_v21 }
 0x147   : > { %4599 = vmatmul.mubr.msk.bf16.vlgmr.msra.gmra.mrb[32].mxu1 %vm199_vm0, %v3296_v17 }
 0x148   : > { %4603 = vmatpush3.bf16.msra.mxu1 %v4943_v39  ;;  %4604 = vmatprep.mubr.msk.bf16.mxu1 %vm199_vm0, %v3368_v26 }
 0x149   : > { %4608 = vmatprep.subr.bf16.mxu1 %v4944_v29 }
 0x14d   : > { %4567 = vmatmul.mubr.msk.bf16.gmra.mrb[20].mxu0 %vm199_vm0, %v2793_v33 }
 0x14e   : > { %4570 = vmatprep.mubr.msk.bf16.mxu0 %vm199_vm0, %v2794_v36 }
 0x153   : > { %4605 = vmatmul.mubr.msk.bf16.vlgmr.msra.gmra.mrb[32].mxu1 %vm199_vm0, %v3369_v41 }
 0x154   : > { %4609 = vmatpush3.bf16.msra.mxu1 %v4944_v29  ;;  %4610 = vmatprep.mubr.msk.bf16.mxu1 %vm199_vm0, %v5448_v47  ;;  %v3512_v47 = vld [vmem:[#allocation2 + $0x134] sm:$0xff] }
 0x155   : > { %4571 = vmatmul.mubr.msk.bf16.gmra.mrb[24].mxu0 %vm199_vm0, %v2795_v28  ;;  %4614 = vmatprep.subr.bf16.mxu1 %v4945_v42  ;;  %v3515_v58 = vpack.c.bf16 %v3513_v53, %v3512_v47 }
 0x156   : > { %4574 = vmatprep.mubr.msk.bf16.mxu0 %vm199_vm0, %v2796_v44 }
 0x15d   : > { %4575 = vmatmul.mubr.msk.bf16.gmra.mrb[28].mxu0 %vm199_vm0, %v2797_v51 }
 0x15f   : > { %4611 = vmatmul.mubr.msk.bf16.vlgmr.msra.gmra.mrb[32].mxu1 %vm199_vm0, %v3442_v52 }
 0x160   : > { %4615 = vmatpush3.bf16.msra.mxu1 %v4945_v42  ;;  %4616 = vmatprep.mubr.msk.bf16.mxu1 %vm199_vm0, %v3442_v52 }
 0x161   : > { %4620 = vmatprep.subr.bf16.mxu1 %v4946_v31 }
 0x16b   : > { %4617 = vmatmul.mubr.msk.bf16.vlgmr.msra.gmra.mrb[32].mxu1 %vm199_vm0, %v3515_v58 }
 0x16c   : > { %4621 = vmatpush3.bf16.msra.mxu1 %v4946_v31  ;;  %4622 = vmatprep.mubr.msk.bf16.mxu1 %vm199_vm0, %v3587_v3 }
 0x16d   : > { %4626 = vmatprep.subr.bf16.mxu1 %v4947_v2 }
 0x177   : > { %4623 = vmatmul.mubr.msk.bf16.vlgmr.msra.gmra.mrb[32].mxu1 %vm199_vm0, %v3588_v54 }
 0x178   : > { %4627 = vmatpush3.bf16.msra.mxu1 %v4947_v2  ;;  %4628 = vmatprep.mubr.msk.bf16.mxu1 %vm199_vm0, %v3660_v1 }
 0x183   : > { %4629 = vmatmul.mubr.msk.bf16.vlgmr.msra.gmra.mrb[32].mxu1 %vm199_vm0, %v3661_v63 }
 0x1b6   : > { %v4378_v23 = vpop.f32.mrb[0].mxu1 }
 0x1b7   : > { %v1399_v24 = vpop.f32.mrb[1].mxu1 }
 0x1b8   : > { %v4379_v8 = vpop.f32.mrb[2].mxu1 }
 0x1b9   : > { %v1402_v38 = vpop.f32.mrb[3].mxu1 }
 0x1be   : > { %v4382_v9 = vpop.f32.mrb[4].mxu1 }
 0x1bf   : > { %v1415_v25 = vpop.f32.mrb[5].mxu1 }
 0x1c0   : > { %v4383_v10 = vpop.f32.mrb[6].mxu1 }
 0x1c1   : > { %v1418_v11 = vpop.f32.mrb[7].mxu1 }
 0x1c6   : > { %v4386_v12 = vpop.f32.mrb[8].mxu1 }
 0x1c7   : > { %v1431_v13 = vpop.f32.mrb[9].mxu1 }
 0x1c8   : > { %v4387_v39 = vpop.f32.mrb[10].mxu1 }
 0x1c9   : > { %v1434_v14 = vpop.f32.mrb[11].mxu1 }
 0x1ce   : > { %v4390_v49 = vpop.f32.mrb[12].mxu1 }
 0x1cf   : > { %v1447_v15 = vpop.f32.mrb[13].mxu1 }
 0x1d0   : > { %v4391_v16 = vpop.f32.mrb[14].mxu1 }
 0x1d1   : > { %v5567_v18 = vpop.f32.mrb[15].mxu1 }
 0x1d6   : > { %v5569_v19 = vpop.f32.mrb[16].mxu1 }
 0x1d7   : > { %v5571_v57 = vpop.f32.mrb[17].mxu1 }
 0x1d8   : > { %v5573_v50 = vpop.f32.mrb[18].mxu1 }
 0x1d9   : > { %v5575_v60 = vpop.f32.mrb[19].mxu1 }
 0x1de   : > { %v5577_v20 = vpop.f32.mrb[20].mxu1 }
 0x1df   : > { %v5579_v21 = vpop.f32.mrb[21].mxu1 }
 0x1e0   : > { %v5581_v17 = vpop.f32.mrb[22].mxu1 }
 0x1e1   : > { %v5583_v26 = vpop.f32.mrb[23].mxu1 }
 0x1e6   : > { %v5585_v29 = vpop.f32.mrb[24].mxu1 }
 0x1e7   : > { %v5587_v30 = vpop.f32.mrb[25].mxu1 }
 0x1e8   : > { %v5589_v61 = vpop.f32.mrb[26].mxu1 }
 0x1e9   : > { %v5591_v32 = vpop.f32.mrb[27].mxu1 }
 0x1ee   : > { %v5593_v4 = vpop.f32.mrb[28].mxu1 }
 0x1ef   : > { %v5595_v33 = vpop.f32.mrb[29].mxu1 }
 0x1f0   : > { %v5597_v36 = vpop.f32.mrb[30].mxu1 }
 0x1f1   : > { %v5599_v34 = vpop.f32.mrb[31].mxu1 }
 0x1f8   : > { %v4548_v5 = vpop.f32.mrb[0].mxu0 }
 0x1f9   : > { %v4632_v35 = vadd.f32 %v4548_v5, %v4378_v23  ;;  %v2889_v27 = vpop.f32.mrb[1].mxu0 }
 0x1fa   : > { %v4633_v41 = vadd.f32 %v2889_v27, %v1399_v24  ;;  %v4549_v40 = vpop.f32.mrb[2].mxu0 }
 0x1fb   : > { %3050 = vst [vmem:[%s5605_s19 + $0x10] sm:$0xff] %v4632_v35  ;;  %v4634_v37 = vadd.f32 %v4549_v40, %v4379_v8  ;;  %v2892_v28 = vpop.f32.mrb[3].mxu0 }
 0x1fc   : > { %3048 = vst [vmem:[%s5605_s19] sm:$0xff] %v4633_v41  ;;  %v4635_v42 = vadd.f32 %v2892_v28, %v1402_v38 }
 0x1fd   : > { %3051 = vst [vmem:[%s5605_s19 + $0x18] sm:$0xff] %v4634_v37 }
 0x1fe   : > { %3049 = vst [vmem:[%s5605_s19 + $0x8] sm:$0xff] %v4635_v42 }
 0x200   : > { %v4552_v44 = vpop.f32.mrb[4].mxu0 }
 0x201   : > { %v4636_v45 = vadd.f32 %v4552_v44, %v4382_v9  ;;  %v2905_v46 = vpop.f32.mrb[5].mxu0 }
 0x202   : > { %v4637_v48 = vadd.f32 %v2905_v46, %v1415_v25  ;;  %v4553_v43 = vpop.f32.mrb[6].mxu0 }
 0x203   : > { %3054 = vst [vmem:[%s5605_s19 + $0x30] sm:$0xff] %v4636_v45  ;;  %v4638_v51 = vadd.f32 %v4553_v43, %v4383_v10  ;;  %v2908_v52 = vpop.f32.mrb[7].mxu0 }
 0x204   : > { %3052 = vst [vmem:[%s5605_s19 + $0x20] sm:$0xff] %v4637_v48  ;;  %v4639_v31 = vadd.f32 %v2908_v52, %v1418_v11 }
 0x205   : > { %3055 = vst [vmem:[%s5605_s19 + $0x38] sm:$0xff] %v4638_v51 }
 0x206   : > { %3053 = vst [vmem:[%s5605_s19 + $0x28] sm:$0xff] %v4639_v31 }
 0x208   : > { %v4556_v47 = vpop.f32.mrb[8].mxu0 }
 0x209   : > { %v4640_v53 = vadd.f32 %v4556_v47, %v4386_v12  ;;  %v2921_v55 = vpop.f32.mrb[9].mxu0 }
 0x20a   : > { %v4641_v56 = vadd.f32 %v2921_v55, %v1431_v13  ;;  %v4557_v58 = vpop.f32.mrb[10].mxu0 }
 0x20b   : > { %3058 = vst [vmem:[%s5605_s19 + $0x50] sm:$0xff] %v4640_v53  ;;  %v4642_v3 = vadd.f32 %v4557_v58, %v4387_v39  ;;  %v2924_v2 = vpop.f32.mrb[11].mxu0 }
 0x20c   : > { %3056 = vst [vmem:[%s5605_s19 + $0x40] sm:$0xff] %v4641_v56  ;;  %v4643_v22 = vadd.f32 %v2924_v2, %v1434_v14 }
 0x20d   : > { %3059 = vst [vmem:[%s5605_s19 + $0x58] sm:$0xff] %v4642_v3 }
 0x20e   : > { %3057 = vst [vmem:[%s5605_s19 + $0x48] sm:$0xff] %v4643_v22 }
 0x210   : > { %v4560_v0 = vpop.f32.mrb[12].mxu0 }
 0x211   : > { %v4644_v59 = vadd.f32 %v4560_v0, %v4390_v49  ;;  %v2937_v62 = vpop.f32.mrb[13].mxu0 }
 0x212   : > { %v4645_v54 = vadd.f32 %v2937_v62, %v1447_v15  ;;  %v4561_v1 = vpop.f32.mrb[14].mxu0 }
 0x213   : > { %3062 = vst [vmem:[%s5605_s19 + $0x70] sm:$0xff] %v4644_v59  ;;  %v4646_v6 = vadd.f32 %v4561_v1, %v4391_v16  ;;  %v2940_v7 = vpop.f32.mrb[15].mxu0 }
 0x214   : > { %3060 = vst [vmem:[%s5605_s19 + $0x60] sm:$0xff] %v4645_v54  ;;  %v4647_v63 = vadd.f32 %v2940_v7, %v5567_v18 }
 0x215   : > { %3063 = vst [vmem:[%s5605_s19 + $0x78] sm:$0xff] %v4646_v6 }
 0x216   : > { %3061 = vst [vmem:[%s5605_s19 + $0x68] sm:$0xff] %v4647_v63 }
 0x218   : > { %v4564_v23 = vpop.f32.mrb[16].mxu0 }
 0x219   : > { %v4648_v24 = vadd.f32 %v4564_v23, %v5569_v19  ;;  %v2953_v8 = vpop.f32.mrb[17].mxu0 }
 0x21a   : > { %v4649_v38 = vadd.f32 %v2953_v8, %v5571_v57  ;;  %v4565_v9 = vpop.f32.mrb[18].mxu0 }
 0x21b   : > { %3066 = vst [vmem:[%s5605_s19 + $0x90] sm:$0xff] %v4648_v24  ;;  %v4650_v25 = vadd.f32 %v4565_v9, %v5573_v50  ;;  %v2956_v10 = vpop.f32.mrb[19].mxu0 }
 0x21c   : > { %3064 = vst [vmem:[%s5605_s19 + $0x80] sm:$0xff] %v4649_v38  ;;  %v4651_v11 = vadd.f32 %v2956_v10, %v5575_v60 }
 0x21d   : > { %3067 = vst [vmem:[%s5605_s19 + $0x98] sm:$0xff] %v4650_v25 }
 0x21e   : > { %3065 = vst [vmem:[%s5605_s19 + $0x88] sm:$0xff] %v4651_v11 }
 0x220   : > { %v4568_v12 = vpop.f32.mrb[20].mxu0 }
 0x221   : > { %v4652_v13 = vadd.f32 %v4568_v12, %v5577_v20  ;;  %v2969_v39 = vpop.f32.mrb[21].mxu0 }
 0x222   : > { %v4653_v14 = vadd.f32 %v2969_v39, %v5579_v21  ;;  %v4569_v49 = vpop.f32.mrb[22].mxu0 }
 0x223   : > { %3070 = vst [vmem:[%s5605_s19 + $0xb0] sm:$0xff] %v4652_v13  ;;  %v4654_v15 = vadd.f32 %v4569_v49, %v5581_v17  ;;  %v2972_v16 = vpop.f32.mrb[23].mxu0 }
 0x224   : > { %3068 = vst [vmem:[%s5605_s19 + $0xa0] sm:$0xff] %v4653_v14  ;;  %v4655_v18 = vadd.f32 %v2972_v16, %v5583_v26 }
 0x225   : > { %3071 = vst [vmem:[%s5605_s19 + $0xb8] sm:$0xff] %v4654_v15 }
 0x226   : > { %3069 = vst [vmem:[%s5605_s19 + $0xa8] sm:$0xff] %v4655_v18 }
 0x228   : > { %v4572_v19 = vpop.f32.mrb[24].mxu0 }
 0x229   : > { %v4656_v57 = vadd.f32 %v4572_v19, %v5585_v29  ;;  %v2985_v50 = vpop.f32.mrb[25].mxu0 }
 0x22a   : > { %v4657_v60 = vadd.f32 %v2985_v50, %v5587_v30  ;;  %v4573_v20 = vpop.f32.mrb[26].mxu0 }
 0x22b   : > { %3074 = vst [vmem:[%s5605_s19 + $0xd0] sm:$0xff] %v4656_v57  ;;  %v4658_v21 = vadd.f32 %v4573_v20, %v5589_v61  ;;  %v2988_v17 = vpop.f32.mrb[27].mxu0 }
 0x22c   : > { %3072 = vst [vmem:[%s5605_s19 + $0xc0] sm:$0xff] %v4657_v60  ;;  %v4659_v26 = vadd.f32 %v2988_v17, %v5591_v32 }
 0x22d   : > { %3075 = vst [vmem:[%s5605_s19 + $0xd8] sm:$0xff] %v4658_v21 }
 0x22e   : > { %3073 = vst [vmem:[%s5605_s19 + $0xc8] sm:$0xff] %v4659_v26 }
 0x230   : > { %v4576_v29 = vpop.f32.mrb[28].mxu0 }
 0x231   : > { %v4660_v5 = vadd.f32 %v4576_v29, %v5593_v4  ;;  %v3001_v30 = vpop.f32.mrb[29].mxu0 }
 0x232   : > { %v4661_v35 = vadd.f32 %v3001_v30, %v5595_v33  ;;  %v4577_v27 = vpop.f32.mrb[30].mxu0 }
 0x233   : > { %3078 = vst [vmem:[%s5605_s19 + $0xf0] sm:$0xff] %v4660_v5  ;;  %v4662_v61 = vadd.f32 %v4577_v27, %v5597_v36  ;;  %v3004_v41 = vpop.f32.mrb[31].mxu0 }
 0x234   : > { %3076 = vst [vmem:[%s5605_s19 + $0xe0] sm:$0xff] %v4661_v35  ;;  %v4663_v32 = vadd.f32 %v3004_v41, %v5599_v34 }
 0x235   : > { %3079 = vst [vmem:[%s5605_s19 + $0xf8] sm:$0xff] %v4662_v61 }
 0x236   : > { %3077 = vst [vmem:[%s5605_s19 + $0xe8] sm:$0xff] %v4663_v32 }
 0x256   : > { %v4630_v40 = vpop.f32.mrb[32].mxu1 }
 0x257   : > { %3731 = vst [vmem:[%s5605_s19 + $0x110] sm:$0xff] %v4630_v40  ;;  %v3710_v37 = vpop.f32.mrb[33].mxu1 }
 0x258   : > { %3729 = vst [vmem:[%s5605_s19 + $0x100] sm:$0xff] %v3710_v37  ;;  %v4631_v4 = vpop.f32.mrb[34].mxu1 }
 0x259   : > { %3732 = vst [vmem:[%s5605_s19 + $0x118] sm:$0xff] %v4631_v4  ;;  %v3713_v28 = vpop.f32.mrb[35].mxu1 }
 0x25a   : > { %3730 = vst [vmem:[%s5605_s19 + $0x108] sm:$0xff] %v3713_v28 }
 0x25b PF: > { %s14_s15 = sadd.s32 1, %s4955_s15  }
 0x25c   : > { %p11_p4 = scmp.ge.s32.totalorder %s14_s15, 4  }
 0x25e   :  { %13 = sbr.rel (!%p11_p4) target bundleno = 1 (0x1), region = 74 }

</bundles_post_ra>
